<compile_context>
chip_gen: v5e
topology: v5e:2x2
jax: 0.10.0
libtpu: 0.0.40
codegen_flags: <defaults>
</compile_context>

<pallas_src>
import functools

import numpy as np

import jax
import jax.numpy as jnp
from jax.experimental import pallas as pl
from jax.experimental.pallas import tpu as pltpu

BN_EPS = 1e-5
LANE = 128


def _round_up(n, m):
    return ((n + m - 1) // m) * m


# ------------------------------ Pallas kernel -------------------------------

@functools.lru_cache(maxsize=None)
def make_fused_kernel(layer_meta, d_out, out_pad):
    """Build the fused conv+BN+ReLU stack + dueling-head kernel.

    layer_meta: tuple of (inv_count, has_ggt) per conv layer, where
        inv_count = 1/(B*OH*OW) (static python float) and has_ggt says
        whether a channel-grouping matrix is passed (OH*OW > 1).
    """
    def kernel(*refs):
        # refs layout:
        #   [0]                      xflat (B, P0_pad)
        #   per conv layer:          Wbig, gamma_b, beta_b [, GGT]
        #   then:                    Whead, bhead
        #   [-1]                     out slab (B, out_pad)
        x_ref = refs[0]
        out_ref = refs[-1]

        act = x_ref[...]                                       # (B, P0) f32
        idx = 1
        for inv, has_ggt in layer_meta:
            wb, gam, bet = refs[idx], refs[idx + 1], refs[idx + 2]
            idx += 3
            if has_ggt:
                ggt = refs[idx]
                idx += 1
            # Conv2d as a single dense matmul (bias folded away: cancelled by
            # the BatchNorm mean subtraction below).
            y = jnp.dot(act, wb[...], preferred_element_type=jnp.float32)
            # nn.BatchNorm2d, training mode: per-channel batch stats over
            # (N, H, W) -> per channel-group of columns, over all rows.
            rowsum = jnp.sum(y, axis=0, keepdims=True)         # (1, P)
            if has_ggt:
                mean_b = jnp.dot(rowsum, ggt[...],
                                 preferred_element_type=jnp.float32) * inv
            else:                                              # OH*OW == 1
                mean_b = rowsum * inv
            d = y - mean_b
            sqsum = jnp.sum(d * d, axis=0, keepdims=True)      # (1, P)
            if has_ggt:
                var_b = jnp.dot(sqsum, ggt[...],
                                preferred_element_type=jnp.float32) * inv
            else:
                var_b = sqsum * inv
            yn = d * jax.lax.rsqrt(var_b + BN_EPS)
            act = jnp.maximum(yn * gam[...] + bet[...], 0.0)   # affine + ReLU

        wh_ref, bh_ref = refs[idx], refs[idx + 1]
        # Dueling head: one lane-dense matmul for [policy | V | A | 0-pad].
        h = jnp.dot(act, wh_ref[...],
                    preferred_element_type=jnp.float32) + bh_ref[...]
        logits = h[:, :d_out]                                  # (B, D)
        val = h[:, d_out:d_out + 1]                            # (B, 1)
        adv = h[:, d_out + 1:2 * d_out + 1]                    # (B, D)
        adv_mean = jnp.sum(adv, axis=1, keepdims=True) * (1.0 / d_out)
        q = val + adv - adv_mean                               # dueling Q

        m = jnp.max(logits, axis=1, keepdims=True)             # softmax
        e = jnp.exp(logits - m)
        prob = e / jnp.sum(e, axis=1, keepdims=True)

        bsz = h.shape[0]
        pieces = [logits, prob, q]
        if out_pad > 3 * d_out:
            pieces.append(jnp.zeros((bsz, out_pad - 3 * d_out), jnp.float32))
        out_ref[...] = jnp.concatenate(pieces, axis=1)         # one dense store

    return kernel


# ------------------------------ call wrapper --------------------------------

def _full_spec(shape):
    nd = len(shape)
    return pl.BlockSpec(shape, lambda *_: (0,) * nd)


def fused_forward_call(params, xflat):
    B = xflat.shape[0]
    D = params['D_out']
    in_pad = params['in_pad']
    out_pad = params['out_pad']
    if xflat.shape[1] < in_pad:
        xflat = jnp.pad(xflat, ((0, 0), (0, in_pad - xflat.shape[1])))

    layer_meta = tuple((1.0 / (B * l['ohw']), l['GGT'] is not None)
                       for l in params['conv'])
    kernel = make_fused_kernel(layer_meta, D, out_pad)

    inputs = [xflat]
    for l in params['conv']:
        inputs += [l['Wbig'], l['gamma_b'], l['beta_b']]
        if l['GGT'] is not None:
            inputs.append(l['GGT'])
    inputs += [params['Whead'], params['bhead']]

    out = pl.pallas_call(
        kernel,
        grid=(1,),
        in_specs=[_full_spec(a.shape) for a in inputs],
        out_specs=_full_spec((B, out_pad)),
        out_shape=jax.ShapeDtypeStruct((B, out_pad), jnp.float32),
        compiler_params=pltpu.CompilerParams(
            dimension_semantics=("arbitrary",)),
    )(*inputs)

    logits = out[:, :D]
    prob = out[:, D:2 * D]
    q_val = out[:, 2 * D:3 * D]
    return logits, prob, q_val


# ---------------------------- parameter building ----------------------------

def conv_weight_to_dense_np(Wconv, Cin, H, W, K, S):
    """Fold a PyTorch-layout Conv2d weight (Cout, Cin, K, K) into a dense
    matrix mapping NCHW-flattened input (Cin*H*W,) -> NCHW-flattened output
    (Cout*OH*OW,).  Valid conv, stride S.  Pure numpy (cheap init)."""
    Cout = Wconv.shape[0]
    OH = (H - K) // S + 1
    OW = (W - K) // S + 1
    co, ci, kh, kw, oh, ow = np.meshgrid(
        np.arange(Cout), np.arange(Cin), np.arange(K), np.arange(K),
        np.arange(OH), np.arange(OW), indexing='ij')
    pin = (ci * H + oh * S + kh) * W + (ow * S + kw)     # NCHW input index
    pout = (co * OH + oh) * OW + ow                      # NCHW output index
    dense = np.zeros((Cin * H * W, Cout * OH * OW), np.float32)
    dense[pin.ravel(), pout.ravel()] = Wconv[co.ravel(), ci.ravel(),
                                             kh.ravel(), kw.ravel()]
    return dense, OH, OW


def init_params(key, D_shape_in, D_out, cnn_hiddens, kernel_sizes, strides):
    n = len(cnn_hiddens)
    keys = jax.random.split(key, n + 3)

    Cin, H, W = D_shape_in
    prev_c, h_cur, w_cur = Cin, H, W
    prev_real = Cin * H * W
    prev_pad = _round_up(prev_real, LANE)
    in_pad = prev_pad

    conv = []
    for li, (hd, k, s) in enumerate(zip(cnn_hiddens, kernel_sizes, strides)):
        Wconv = np.asarray(
            0.1 * jax.random.normal(keys[li], (hd, prev_c, k, k), jnp.float32))
        dense, OH, OW = conv_weight_to_dense_np(Wconv, prev_c, h_cur, w_cur, k, s)
        P = hd * OH * OW
        P_pad = _round_up(P, LANE)

        Wbig = np.zeros((prev_pad, P_pad), np.float32)
        Wbig[:prev_real, :P] = dense

        gamma = np.ones((hd,), np.float32)                 # BN weight init
        beta = np.zeros((hd,), np.float32)                 # BN bias init
        gamma_b = np.zeros((1, P_pad), np.float32)
        beta_b = np.zeros((1, P_pad), np.float32)
        gamma_b[0, :P] = np.repeat(gamma, OH * OW)         # pre-broadcast (1,P)
        beta_b[0, :P] = np.repeat(beta, OH * OW)

        if OH * OW > 1:
            ch = np.arange(P) // (OH * OW)
            ggt = np.zeros((P_pad, P_pad), np.float32)
            ggt[:P, :P] = (ch[:, None] == ch[None, :]).astype(np.float32)
            GGT = jnp.asarray(ggt)
        else:
            GGT = None                                     # identity: skip matmuls

        conv.append(dict(
            Wbig=jnp.asarray(Wbig), GGT=GGT,
            gamma_b=jnp.asarray(gamma_b), beta_b=jnp.asarray(beta_b),
            ohw=OH * OW,
        ))
        prev_c, h_cur, w_cur = hd, OH, OW
        prev_real, prev_pad = P, P_pad

    feat_real, feat_pad = prev_real, prev_pad
    head_pad = _round_up(2 * D_out + 1, LANE)
    out_pad = _round_up(3 * D_out, LANE)

    small = 0.01
    Wp = np.asarray(small * jax.random.normal(keys[n], (feat_real, D_out), jnp.float32))
    Wv = np.asarray(small * jax.random.normal(keys[n + 1], (feat_real, 1), jnp.float32))
    Wa = np.asarray(small * jax.random.normal(keys[n + 2], (feat_real, D_out), jnp.float32))
    Whead = np.zeros((feat_pad, head_pad), np.float32)     # [policy | V | A | 0]
    Whead[:feat_real, :D_out] = Wp
    Whead[:feat_real, D_out:D_out + 1] = Wv
    Whead[:feat_real, D_out + 1:2 * D_out + 1] = Wa
    bhead = np.zeros((1, head_pad), np.float32)

    return dict(conv=conv, feat_size=feat_real, D_out=D_out,
                in_pad=in_pad, out_pad=out_pad,
                Whead=jnp.asarray(Whead), bhead=jnp.asarray(bhead))


# --------------------------------- forward ----------------------------------

def forward(params, x, sample_key, sample_action=True):
    """Returns (act, q_val, logits, prob) — the default (return_q_value=True)
    forward path of DiscreteCNNPolicyQFunc."""
    B = x.shape[0]
    xflat = x.reshape(B, -1)                    # NCHW flatten (free reshape)
    logits, prob, q_val = fused_forward_call(params, xflat)
    if sample_action:
        # TODO(synk): prob.multinomial() is implemented with
        # jax.random.categorical outside the kernel (same distribution,
        # different RNG stream than PyTorch).
        act = jax.random.categorical(sample_key, logits, axis=-1).reshape(B, 1)
    else:
        act = jnp.argmax(logits, axis=1, keepdims=True)
    return act, q_val, logits, prob


if __name__ == "__main__":
    key = jax.random.PRNGKey(0)
    k_param, k_x, k_sample = jax.random.split(key, 3)

    # D_shape_in=(4,16,16), D_out=6, cnn_hiddens=[8,16], kernel=5, stride=2
    D_shape_in = (4, 16, 16)
    D_out = 6
    params = init_params(k_param, D_shape_in, D_out,
                         cnn_hiddens=[8, 16], kernel_sizes=[5, 5], strides=[2, 2])

    x = jax.random.normal(k_x, (2,) + D_shape_in, jnp.float32)

    act, q_val, logits, prob = forward(params, x, k_sample, sample_action=True)
    jax.block_until_ready((act, q_val, logits, prob))

    assert act.shape == (2, 1)
    assert q_val.shape == (2, D_out)
    assert logits.shape == (2, D_out)
    assert prob.shape == (2, D_out)
    assert bool(jnp.all(jnp.isfinite(q_val)))
    assert bool(jnp.all(jnp.isfinite(logits)))
    assert bool(jnp.allclose(jnp.sum(prob, axis=1), 1.0, atol=1e-5))
    print("KERNEL_OK")
</pallas_src>

<mosaic_0001>
module attributes {stable_mosaic.version = 11 : i64} {
  func.func @kernel(%arg0: i32, %arg1: memref<2x1024xf32, #tpu.memory_space<vmem>>, %arg2: memref<1024x384xf32, #tpu.memory_space<vmem>>, %arg3: memref<1x384xf32, #tpu.memory_space<vmem>>, %arg4: memref<1x384xf32, #tpu.memory_space<vmem>>, %arg5: memref<384x384xf32, #tpu.memory_space<vmem>>, %arg6: memref<384x128xf32, #tpu.memory_space<vmem>>, %arg7: memref<1x128xf32, #tpu.memory_space<vmem>>, %arg8: memref<1x128xf32, #tpu.memory_space<vmem>>, %arg9: memref<128x128xf32, #tpu.memory_space<vmem>>, %arg10: memref<1x128xf32, #tpu.memory_space<vmem>>, %arg11: memref<2x128xf32, #tpu.memory_space<vmem>>) attributes {dimension_semantics = [#tpu.dimension_semantics<arbitrary>], iteration_bounds = array<i64: 1>, scalar_prefetch = 0 : i64, scratch_operands = 0 : i64, tpu.core_type = #tpu.core_type<tc>, window_params = [{pipeline_mode = #tpu.pipeline_mode<synchronous>, transform_indices = @transform_0, window_bounds = array<i64: 2, 1024>}, {pipeline_mode = #tpu.pipeline_mode<synchronous>, transform_indices = @transform_1, window_bounds = array<i64: 1024, 384>}, {pipeline_mode = #tpu.pipeline_mode<synchronous>, transform_indices = @transform_2, window_bounds = array<i64: 1, 384>}, {pipeline_mode = #tpu.pipeline_mode<synchronous>, transform_indices = @transform_3, window_bounds = array<i64: 1, 384>}, {pipeline_mode = #tpu.pipeline_mode<synchronous>, transform_indices = @transform_4, window_bounds = array<i64: 384, 384>}, {pipeline_mode = #tpu.pipeline_mode<synchronous>, transform_indices = @transform_5, window_bounds = array<i64: 384, 128>}, {pipeline_mode = #tpu.pipeline_mode<synchronous>, transform_indices = @transform_6, window_bounds = array<i64: 1, 128>}, {pipeline_mode = #tpu.pipeline_mode<synchronous>, transform_indices = @transform_7, window_bounds = array<i64: 1, 128>}, {pipeline_mode = #tpu.pipeline_mode<synchronous>, transform_indices = @transform_8, window_bounds = array<i64: 128, 128>}, {pipeline_mode = #tpu.pipeline_mode<synchronous>, transform_indices = @transform_9, window_bounds = array<i64: 1, 128>}, {pipeline_mode = #tpu.pipeline_mode<synchronous>, transform_indices = @transform_10, window_bounds = array<i64: 2, 128>}]} {
    %c0 = arith.constant 0 : index
    %c0_0 = arith.constant 0 : index
    %0 = vector.load %arg1[%c0, %c0_0] : memref<2x1024xf32, #tpu.memory_space<vmem>>, vector<2x1024xf32>
    %c0_1 = arith.constant 0 : index
    %c0_2 = arith.constant 0 : index
    %1 = vector.load %arg2[%c0_1, %c0_2] : memref<1024x384xf32, #tpu.memory_space<vmem>>, vector<1024x384xf32>
    %cst = arith.constant dense<0.000000e+00> : vector<2x384xf32>
    %2 = tpu.matmul %0, %1, %cst {dimension_numbers = #tpu.dot_dimension_numbers<[1], [0], [0], [1], [0, 0, 1, 1], [], []>} : vector<2x1024xf32>, vector<1024x384xf32>, vector<2x384xf32> -> vector<2x384xf32>
    %cst_3 = arith.constant dense<0.000000e+00> : vector<384xf32>
    %3 = vector.multi_reduction <add>, %2, %cst_3 [0] : vector<2x384xf32> to vector<384xf32>
    %4 = vector.shape_cast %3 : vector<384xf32> to vector<1x384xf32>
    %c0_4 = arith.constant 0 : index
    %c0_5 = arith.constant 0 : index
    %5 = vector.load %arg5[%c0_4, %c0_5] : memref<384x384xf32, #tpu.memory_space<vmem>>, vector<384x384xf32>
    %cst_6 = arith.constant dense<0.000000e+00> : vector<1x384xf32>
    %6 = tpu.matmul %4, %5, %cst_6 {dimension_numbers = #tpu.dot_dimension_numbers<[1], [0], [0], [1], [0, 0, 1, 1], [], []>} : vector<1x384xf32>, vector<384x384xf32>, vector<1x384xf32> -> vector<1x384xf32>
    %cst_7 = arith.constant 0.013888889 : f32
    %7 = vector.broadcast %cst_7 : f32 to vector<1x384xf32>
    %8 = arith.mulf %6, %7 : vector<1x384xf32>
    %9 = vector.broadcast %8 : vector<1x384xf32> to vector<2x384xf32>
    %10 = arith.subf %2, %9 : vector<2x384xf32>
    %11 = arith.mulf %10, %10 : vector<2x384xf32>
    %cst_8 = arith.constant dense<0.000000e+00> : vector<384xf32>
    %12 = vector.multi_reduction <add>, %11, %cst_8 [0] : vector<2x384xf32> to vector<384xf32>
    %13 = vector.shape_cast %12 : vector<384xf32> to vector<1x384xf32>
    %c0_9 = arith.constant 0 : index
    %c0_10 = arith.constant 0 : index
    %14 = vector.load %arg5[%c0_9, %c0_10] : memref<384x384xf32, #tpu.memory_space<vmem>>, vector<384x384xf32>
    %cst_11 = arith.constant dense<0.000000e+00> : vector<1x384xf32>
    %15 = tpu.matmul %13, %14, %cst_11 {dimension_numbers = #tpu.dot_dimension_numbers<[1], [0], [0], [1], [0, 0, 1, 1], [], []>} : vector<1x384xf32>, vector<384x384xf32>, vector<1x384xf32> -> vector<1x384xf32>
    %cst_12 = arith.constant 0.013888889 : f32
    %16 = vector.broadcast %cst_12 : f32 to vector<1x384xf32>
    %17 = arith.mulf %15, %16 : vector<1x384xf32>
    %cst_13 = arith.constant 9.99999974E-6 : f32
    %18 = vector.broadcast %cst_13 : f32 to vector<1x384xf32>
    %19 = arith.addf %17, %18 : vector<1x384xf32>
    %20 = math.rsqrt %19 : vector<1x384xf32>
    %21 = vector.broadcast %20 : vector<1x384xf32> to vector<2x384xf32>
    %22 = arith.mulf %10, %21 : vector<2x384xf32>
    %c0_14 = arith.constant 0 : index
    %c0_15 = arith.constant 0 : index
    %23 = vector.load %arg3[%c0_14, %c0_15] : memref<1x384xf32, #tpu.memory_space<vmem>>, vector<1x384xf32>
    %24 = vector.broadcast %23 : vector<1x384xf32> to vector<2x384xf32>
    %25 = arith.mulf %22, %24 : vector<2x384xf32>
    %c0_16 = arith.constant 0 : index
    %c0_17 = arith.constant 0 : index
    %26 = vector.load %arg4[%c0_16, %c0_17] : memref<1x384xf32, #tpu.memory_space<vmem>>, vector<1x384xf32>
    %27 = vector.broadcast %26 : vector<1x384xf32> to vector<2x384xf32>
    %28 = arith.addf %25, %27 : vector<2x384xf32>
    %cst_18 = arith.constant 0.000000e+00 : f32
    %29 = vector.broadcast %cst_18 : f32 to vector<2x384xf32>
    %30 = arith.maximumf %28, %29 : vector<2x384xf32>
    %c0_19 = arith.constant 0 : index
    %c0_20 = arith.constant 0 : index
    %31 = vector.load %arg6[%c0_19, %c0_20] : memref<384x128xf32, #tpu.memory_space<vmem>>, vector<384x128xf32>
    %cst_21 = arith.constant dense<0.000000e+00> : vector<2x128xf32>
    %32 = tpu.matmul %30, %31, %cst_21 {dimension_numbers = #tpu.dot_dimension_numbers<[1], [0], [0], [1], [0, 0, 1, 1], [], []>} : vector<2x384xf32>, vector<384x128xf32>, vector<2x128xf32> -> vector<2x128xf32>
    %cst_22 = arith.constant dense<0.000000e+00> : vector<128xf32>
    %33 = vector.multi_reduction <add>, %32, %cst_22 [0] : vector<2x128xf32> to vector<128xf32>
    %34 = vector.shape_cast %33 : vector<128xf32> to vector<1x128xf32>
    %cst_23 = arith.constant 5.000000e-01 : f32
    %35 = vector.broadcast %cst_23 : f32 to vector<1x128xf32>
    %36 = arith.mulf %34, %35 : vector<1x128xf32>
    %37 = vector.broadcast %36 : vector<1x128xf32> to vector<2x128xf32>
    %38 = arith.subf %32, %37 : vector<2x128xf32>
    %39 = arith.mulf %38, %38 : vector<2x128xf32>
    %cst_24 = arith.constant dense<0.000000e+00> : vector<128xf32>
    %40 = vector.multi_reduction <add>, %39, %cst_24 [0] : vector<2x128xf32> to vector<128xf32>
    %41 = vector.shape_cast %40 : vector<128xf32> to vector<1x128xf32>
    %cst_25 = arith.constant 5.000000e-01 : f32
    %42 = vector.broadcast %cst_25 : f32 to vector<1x128xf32>
    %43 = arith.mulf %41, %42 : vector<1x128xf32>
    %cst_26 = arith.constant 9.99999974E-6 : f32
    %44 = vector.broadcast %cst_26 : f32 to vector<1x128xf32>
    %45 = arith.addf %43, %44 : vector<1x128xf32>
    %46 = math.rsqrt %45 : vector<1x128xf32>
    %47 = vector.broadcast %46 : vector<1x128xf32> to vector<2x128xf32>
    %48 = arith.mulf %38, %47 : vector<2x128xf32>
    %c0_27 = arith.constant 0 : index
    %c0_28 = arith.constant 0 : index
    %49 = vector.load %arg7[%c0_27, %c0_28] : memref<1x128xf32, #tpu.memory_space<vmem>>, vector<1x128xf32>
    %50 = vector.broadcast %49 : vector<1x128xf32> to vector<2x128xf32>
    %51 = arith.mulf %48, %50 : vector<2x128xf32>
    %c0_29 = arith.constant 0 : index
    %c0_30 = arith.constant 0 : index
    %52 = vector.load %arg8[%c0_29, %c0_30] : memref<1x128xf32, #tpu.memory_space<vmem>>, vector<1x128xf32>
    %53 = vector.broadcast %52 : vector<1x128xf32> to vector<2x128xf32>
    %54 = arith.addf %51, %53 : vector<2x128xf32>
    %cst_31 = arith.constant 0.000000e+00 : f32
    %55 = vector.broadcast %cst_31 : f32 to vector<2x128xf32>
    %56 = arith.maximumf %54, %55 : vector<2x128xf32>
    %c0_32 = arith.constant 0 : index
    %c0_33 = arith.constant 0 : index
    %57 = vector.load %arg9[%c0_32, %c0_33] : memref<128x128xf32, #tpu.memory_space<vmem>>, vector<128x128xf32>
    %cst_34 = arith.constant dense<0.000000e+00> : vector<2x128xf32>
    %58 = tpu.matmul %56, %57, %cst_34 {dimension_numbers = #tpu.dot_dimension_numbers<[1], [0], [0], [1], [0, 0, 1, 1], [], []>} : vector<2x128xf32>, vector<128x128xf32>, vector<2x128xf32> -> vector<2x128xf32>
    %c0_35 = arith.constant 0 : index
    %c0_36 = arith.constant 0 : index
    %59 = vector.load %arg10[%c0_35, %c0_36] : memref<1x128xf32, #tpu.memory_space<vmem>>, vector<1x128xf32>
    %60 = vector.broadcast %59 : vector<1x128xf32> to vector<2x128xf32>
    %61 = arith.addf %58, %60 : vector<2x128xf32>
    %62 = vector.extract_strided_slice %61 {offsets = [0, 0], sizes = [2, 6], strides = [1, 1]} : vector<2x128xf32> to vector<2x6xf32>
    %63 = vector.extract_strided_slice %61 {offsets = [0, 6], sizes = [2, 1], strides = [1, 1]} : vector<2x128xf32> to vector<2x1xf32>
    %64 = vector.extract_strided_slice %61 {offsets = [0, 7], sizes = [2, 6], strides = [1, 1]} : vector<2x128xf32> to vector<2x6xf32>
    %cst_37 = arith.constant dense<0.000000e+00> : vector<2xf32>
    %65 = vector.multi_reduction <add>, %64, %cst_37 [1] : vector<2x6xf32> to vector<2xf32>
    %66 = vector.shape_cast %65 : vector<2xf32> to vector<2x1xf32>
    %cst_38 = arith.constant 0.166666672 : f32
    %67 = vector.broadcast %cst_38 : f32 to vector<2x1xf32>
    %68 = arith.mulf %66, %67 : vector<2x1xf32>
    %69 = vector.broadcast %63 : vector<2x1xf32> to vector<2x6xf32>
    %70 = arith.addf %69, %64 : vector<2x6xf32>
    %71 = vector.broadcast %68 : vector<2x1xf32> to vector<2x6xf32>
    %72 = arith.subf %70, %71 : vector<2x6xf32>
    %cst_39 = arith.constant dense<0xFF800000> : vector<2xf32>
    %73 = vector.multi_reduction <maximumf>, %62, %cst_39 [1] : vector<2x6xf32> to vector<2xf32>
    %74 = vector.shape_cast %73 : vector<2xf32> to vector<2x1xf32>
    %75 = vector.broadcast %74 : vector<2x1xf32> to vector<2x6xf32>
    %76 = arith.subf %62, %75 : vector<2x6xf32>
    %77 = math.exp %76 : vector<2x6xf32>
    %cst_40 = arith.constant dense<0.000000e+00> : vector<2xf32>
    %78 = vector.multi_reduction <add>, %77, %cst_40 [1] : vector<2x6xf32> to vector<2xf32>
    %79 = vector.shape_cast %78 : vector<2xf32> to vector<2x1xf32>
    %80 = vector.broadcast %79 : vector<2x1xf32> to vector<2x6xf32>
    %81 = arith.divf %77, %80 : vector<2x6xf32>
    %cst_41 = arith.constant 0.000000e+00 : f32
    %82 = vector.broadcast %cst_41 : f32 to vector<2x110xf32>
    %83 = tpu.concatenate %62, %81, %72, %82 in 1 : vector<2x6xf32>, vector<2x6xf32>, vector<2x6xf32>, vector<2x110xf32> -> vector<2x128xf32>
    %c0_42 = arith.constant 0 : index
    %c0_43 = arith.constant 0 : index
    %84 = vector.load %arg11[%c0_42, %c0_43] : memref<2x128xf32, #tpu.memory_space<vmem>>, vector<2x128xf32>
    tpu.vector_store %arg11[%c0_42, %c0_43], %83 {strides = array<i32>} : memref<2x128xf32, #tpu.memory_space<vmem>>, vector<2x128xf32>,
    return
  }
  func.func @transform_0(%arg0: i32) -> (i32, i32) {
    %c0_i32 = arith.constant 0 : i32
    %c0_i32_0 = arith.constant 0 : i32
    %c0_i32_1 = arith.constant 0 : i32
    return %c0_i32, %c0_i32_0 : i32, i32
  }
  func.func @transform_1(%arg0: i32) -> (i32, i32) {
    %c0_i32 = arith.constant 0 : i32
    %c0_i32_0 = arith.constant 0 : i32
    %c0_i32_1 = arith.constant 0 : i32
    return %c0_i32, %c0_i32_0 : i32, i32
  }
  func.func @transform_2(%arg0: i32) -> (i32, i32) {
    %c0_i32 = arith.constant 0 : i32
    %c0_i32_0 = arith.constant 0 : i32
    %c0_i32_1 = arith.constant 0 : i32
    return %c0_i32, %c0_i32_0 : i32, i32
  }
  func.func @transform_3(%arg0: i32) -> (i32, i32) {
    %c0_i32 = arith.constant 0 : i32
    %c0_i32_0 = arith.constant 0 : i32
    %c0_i32_1 = arith.constant 0 : i32
    return %c0_i32, %c0_i32_0 : i32, i32
  }
  func.func @transform_4(%arg0: i32) -> (i32, i32) {
    %c0_i32 = arith.constant 0 : i32
    %c0_i32_0 = arith.constant 0 : i32
    %c0_i32_1 = arith.constant 0 : i32
    return %c0_i32, %c0_i32_0 : i32, i32
  }
  func.func @transform_5(%arg0: i32) -> (i32, i32) {
    %c0_i32 = arith.constant 0 : i32
    %c0_i32_0 = arith.constant 0 : i32
    %c0_i32_1 = arith.constant 0 : i32
    return %c0_i32, %c0_i32_0 : i32, i32
  }
  func.func @transform_6(%arg0: i32) -> (i32, i32) {
    %c0_i32 = arith.constant 0 : i32
    %c0_i32_0 = arith.constant 0 : i32
    %c0_i32_1 = arith.constant 0 : i32
    return %c0_i32, %c0_i32_0 : i32, i32
  }
  func.func @transform_7(%arg0: i32) -> (i32, i32) {
    %c0_i32 = arith.constant 0 : i32
    %c0_i32_0 = arith.constant 0 : i32
    %c0_i32_1 = arith.constant 0 : i32
    return %c0_i32, %c0_i32_0 : i32, i32
  }
  func.func @transform_8(%arg0: i32) -> (i32, i32) {
    %c0_i32 = arith.constant 0 : i32
    %c0_i32_0 = arith.constant 0 : i32
    %c0_i32_1 = arith.constant 0 : i32
    return %c0_i32, %c0_i32_0 : i32, i32
  }
  func.func @transform_9(%arg0: i32) -> (i32, i32) {
    %c0_i32 = arith.constant 0 : i32
    %c0_i32_0 = arith.constant 0 : i32
    %c0_i32_1 = arith.constant 0 : i32
    return %c0_i32, %c0_i32_0 : i32, i32
  }
  func.func @transform_10(%arg0: i32) -> (i32, i32) {
    %c0_i32 = arith.constant 0 : i32
    %c0_i32_0 = arith.constant 0 : i32
    %c0_i32_1 = arith.constant 0 : i32
    return %c0_i32, %c0_i32_0 : i32, i32
  }
}

</mosaic_0001>

<bundles_post_ra>
// kernel: tpu_custom_call.1
= control target key start
LH: loop header
LB: loop body
LE: loop exit
PB: predicated region body
PF: predicated region fallthrough
CT: control target
= control target key end

     0   :  { %15 = vsyncpa [#allocation3], 0  ;;  %s2919_s0 = inlined_call_operand.hbm [shape: f32[2,1024], index: 0, kind: input, shape index: {}]   ;;  %s2920_s1 = inlined_call_operand.hbm [shape: f32[1024,384], index: 1, kind: input, shape index: {}]   ;;  %s2921_s2 = inlined_call_operand.hbm [shape: f32[1,384], index: 2, kind: input, shape index: {}]   ;;  %s2922_s3 = inlined_call_operand.hbm [shape: f32[1,384], index: 3, kind: input, shape index: {}]   ;;  %s2923_s4 = inlined_call_operand.hbm [shape: f32[384,384], index: 4, kind: input, shape index: {}]   ;;  %s2924_s5 = inlined_call_operand.hbm [shape: f32[384,128], index: 5, kind: input, shape index: {}]   ;;  %s2925_s6 = inlined_call_operand.hbm [shape: f32[1,128], index: 6, kind: input, shape index: {}]   ;;  %s2926_s7 = inlined_call_operand.hbm [shape: f32[1,128], index: 7, kind: input, shape index: {}]   ;;  %s2927_s8 = inlined_call_operand.hbm [shape: f32[128,128], index: 8, kind: input, shape index: {}]   ;;  %s2928_s9 = inlined_call_operand.hbm [shape: f32[1,128], index: 9, kind: input, shape index: {}]   ;;  %s2929_s10 = inlined_call_operand.hbm [shape: f32[2,128], index: 10, kind: output, shape index: {}]  }
   0x1   :  { %16 = vsyncpa [#allocation6], 0 }
   0x2   :  { %17 = vsyncpa [#allocation9], 0 }
   0x3   :  { %18 = vsyncpa [#allocation12], 0 }
   0x4   :  { %19 = vsyncpa [#allocation15], 0 }
   0x5   :  { %20 = vsyncpa [#allocation18], 0  ;;  %s37_s15 = sshll.u32 %s2920_s1, 4  ;;  %s38_s15 = int_to_ptr.hbm [resolvable:$true] %s37_s15 }
   0x6   :  { %21 = vsyncpa [#allocation4], 0  ;;  %s2280_s16 = smov [#allocation5]   ;;  %s62_s20 = sshll.u32 %s2922_s3, 4  ;;  %s63_s20 = int_to_ptr.hbm [resolvable:$true] %s62_s20 }
   0x7   :  { %s39_s17 = sshll.u32 %s2280_s16, 4  ;;  %s2281_s21 = smov 384   ;;  %s40_s17 = int_to_ptr.vmem [resolvable:$true] %s39_s17 }
   0x8   :  { %s2282_s22 = smov 24   ;;  %s2283_s23 = smov [#allocation8]  }
   0x9   :  { %45 = dma.hbm_to_vmem [thread:$0]  %s38_s15, 49152, %s40_s17, [#allocation6], %s2281_s21, %s2281_s21, %s2282_s22  }
   0xa   :  { %s64_s24 = sshll.u32 %s2283_s23, 4  ;;  %s85_s26 = sshll.u32 %s2924_s5, 4  ;;  %s65_s24 = int_to_ptr.vmem [resolvable:$true] %s64_s24  ;;  %s86_s26 = int_to_ptr.hbm [resolvable:$true] %s85_s26 }
   0xb   :  { %67 = dma.hbm_to_vmem [thread:$0]  %s63_s20, 48, %s65_s24, [#allocation9]  }
   0xc   :  { %s2284_s27 = smov [#allocation11]   ;;  %s110_s30 = sshll.u32 %s2926_s7, 4  ;;  %s111_s30 = int_to_ptr.hbm [resolvable:$true] %s110_s30 }
   0xd   :  { %s87_s28 = sshll.u32 %s2284_s27, 4  ;;  %s2285_s11 = smov 128   ;;  %s88_s28 = int_to_ptr.vmem [resolvable:$true] %s87_s28 }
   0xe   :  { %s2286_s12 = smov 8   ;;  %s2287_s13 = smov [#allocation14]  }
   0xf   :  { %93 = dma.hbm_to_vmem [thread:$0]  %s86_s26, 6144, %s88_s28, [#allocation12], %s2285_s11, %s2285_s11, %s2286_s12  }
  0x10   :  { %s112_s14 = sshll.u32 %s2287_s13, 4  ;;  %s27_s16 = sshll.u32 %s2919_s0, 4  ;;  %s113_s14 = int_to_ptr.vmem [resolvable:$true] %s112_s14  ;;  %s28_s16 = int_to_ptr.hbm [resolvable:$true] %s27_s16 }
  0x11   :  { %115 = dma.hbm_to_vmem [thread:$0]  %s111_s30, 16, %s113_s14, [#allocation15]  }
  0x12   :  { %s51_s7 = sshll.u32 %s2921_s2, 4  ;;  %s2288_s19 = smov [#allocation2]   ;;  %s52_s7 = int_to_ptr.hbm [resolvable:$true] %s51_s7 }
  0x13   :  { %s29_s20 = sshll.u32 %s2288_s19, 4  ;;  %s2289_s23 = smov [#allocation7]   ;;  %s30_s20 = int_to_ptr.vmem [resolvable:$true] %s29_s20 }
  0x14   :  { %32 = dma.hbm_to_vmem [thread:$0]  %s28_s16, 256, %s30_s20, [#allocation3]  }
  0x15   :  { %s53_s24 = sshll.u32 %s2289_s23, 4  ;;  %s72_s26 = sshll.u32 %s2923_s4, 4  ;;  %s54_s24 = int_to_ptr.vmem [resolvable:$true] %s53_s24  ;;  %s73_s26 = int_to_ptr.hbm [resolvable:$true] %s72_s26 }
  0x16   :  { %56 = dma.hbm_to_vmem [thread:$0]  %s52_s7, 48, %s54_s24, [#allocation6]  }
  0x17   :  { %s99_s28 = sshll.u32 %s2925_s6, 4  ;;  %s2290_s3 = smov [#allocation10]   ;;  %s100_s28 = int_to_ptr.hbm [resolvable:$true] %s99_s28 }
  0x18   :  { %s74_s2 = sshll.u32 %s2290_s3, 4  ;;  %s2291_s29 = smov [#allocation13]   ;;  %s75_s2 = int_to_ptr.vmem [resolvable:$true] %s74_s2 }
  0x19   :  { %80 = dma.hbm_to_vmem [thread:$0]  %s73_s26, 18432, %s75_s2, [#allocation9], %s2281_s21, %s2281_s21, %s2282_s22  }
  0x1a   :  { %s101_s30 = sshll.u32 %s2291_s29, 4  ;;  %s120_s4 = sshll.u32 %s2927_s8, 4  ;;  %s102_s30 = int_to_ptr.vmem [resolvable:$true] %s101_s30  ;;  %s121_s4 = int_to_ptr.hbm [resolvable:$true] %s120_s4 }
  0x1b   :  { %104 = dma.hbm_to_vmem [thread:$0]  %s100_s28, 16, %s102_s30, [#allocation12]  }
  0x1c   :  { %s134_s6 = sshll.u32 %s2928_s9, 4  ;;  %s2292_s16 = smov [#allocation16]   ;;  %s135_s6 = int_to_ptr.hbm [resolvable:$true] %s134_s6 }
  0x1d   :  { %s122_s17 = sshll.u32 %s2292_s16, 4  ;;  %s2293_s21 = smov [#allocation17]   ;;  %s123_s17 = int_to_ptr.vmem [resolvable:$true] %s122_s17 }
  0x1e   :  { %128 = dma.hbm_to_vmem [thread:$0]  %s121_s4, 2048, %s123_s17, [#allocation15], %s2285_s11, %s2285_s11, %s2286_s12  }
  0x1f   :  { %s136_s22 = sshll.u32 %s2293_s21, 4  ;;  %s137_s22 = int_to_ptr.vmem [resolvable:$true] %s136_s22 }
  0x20   :  { %139 = dma.hbm_to_vmem [thread:$0]  %s135_s6, 16, %s137_s22, [#allocation18]  }
  0x21   :  { %2266 = dma.done.wait [#allocation3], 256  }
  0x22   :  { %2267 = vsyncadd [#allocation3], 4294967040 }
  0x23   :  { %2268 = dma.done.wait [#allocation6], 49200  }
  0x24   :  { %2269 = vsyncadd [#allocation6], 4294918096 }
  0x25   :  { %2270 = dma.done.wait [#allocation9], 18480  }
  0x26   :  { %2271 = vsyncadd [#allocation9], 4294948816 }
  0x27   :  { %2272 = dma.done.wait [#allocation12], 6160  }
  0x28   :  { %2273 = vsyncadd [#allocation12], 4294961136 }
  0x29   :  { %2274 = dma.done.wait [#allocation15], 2064  }
  0x2a   :  { %2275 = vsyncadd [#allocation15], 4294965232 }
  0x2b   :  { %2276 = dma.done.wait [#allocation18], 16  }
  0x2c   :  { %2277 = vsyncadd [#allocation18], 4294967280  ;;  %v227_v0 = vld [vmem:[#allocation5 + $0x168] sm:$0xff]  ;;  %v224_v3 = vld [vmem:[#allocation5 + $0x150] sm:$0xff]  ;;  %vm1067_vm0 = vcmask 1041408   ;;  %vm1886_vm13 = vcmask 41984  }
  0x2d   :  { %v323_v1 = vld [vmem:[#allocation5 + $0x468] sm:$0xff]  ;;  %587 = vmatpush.msra.mxu0 %v227_v0  ;;  %v320_v5 = vld [vmem:[#allocation5 + $0x450] sm:$0xff]  ;;  %v221_v7 = vld [vmem:[#allocation5 + $0x138] sm:$0xff]  ;;  %s2295_s8 = smov 121   ;;  %s2296_s9 = smov 5  }
  0x2e   :  { %v371_v2 = vld [vmem:[#allocation5 + $0x5e8] sm:$0xff]  ;;  %627 = vmatpush.msra.mxu2 %v323_v1  ;;  %v368_v6 = vld [vmem:[#allocation5 + $0x5d0] sm:$0xff]  ;;  %v317_v9 = vld [vmem:[#allocation5 + $0x438] sm:$0xff]  ;;  %s2297_s11 = smov 6   ;;  %s2298_s12 = smov [#allocation19]  }
  0x2f   :  { %v275_v4 = vld [vmem:[#allocation5 + $0x2e8] sm:$0xff]  ;;  %647 = vmatpush.msra.mxu3 %v371_v2  ;;  %v272_v8 = vld [vmem:[#allocation5 + $0x2d0] sm:$0xff]  ;;  %588 = vmatpush.msra.mxu0 %v224_v3  ;;  %v365_v10 = vld [vmem:[#allocation5 + $0x5b8] sm:$0xff]  ;;  %s1941_s18 = sshll.u32 %s2298_s12, 4  ;;  %s1943_s20 = sshll.u32 %s2929_s10, 4  ;;  %s1942_s18 = int_to_ptr.vmem [resolvable:$true] %s1941_s18  ;;  %s1944_s20 = int_to_ptr.hbm [resolvable:$true] %s1943_s20 }
  0x30   :  { %607 = vmatpush.msra.mxu1 %v275_v4  ;;  %628 = vmatpush.msra.mxu2 %v320_v5  ;;  %v218_v11 = vld [vmem:[#allocation5 + $0x120] sm:$0xff]  ;;  %v269_v12 = vld [vmem:[#allocation5 + $0x2b8] sm:$0xff]  ;;  %v215_v16 = vld [vmem:[#allocation5 + $0x108] sm:$0xff] }
  0x31   :  { %648 = vmatpush.msra.mxu3 %v368_v6  ;;  %v314_v13 = vld [vmem:[#allocation5 + $0x420] sm:$0xff]  ;;  %589 = vmatpush.msra.mxu0 %v221_v7  ;;  %v311_v17 = vld [vmem:[#allocation5 + $0x408] sm:$0xff]  ;;  %v212_v20 = vld [vmem:[#allocation5 + $0xf0] sm:$0xff] }
  0x32   :  { %608 = vmatpush.msra.mxu1 %v272_v8  ;;  %629 = vmatpush.msra.mxu2 %v317_v9  ;;  %v362_v14 = vld [vmem:[#allocation5 + $0x5a0] sm:$0xff]  ;;  %v359_v18 = vld [vmem:[#allocation5 + $0x588] sm:$0xff]  ;;  %v308_v21 = vld [vmem:[#allocation5 + $0x3f0] sm:$0xff] }
  0x33   :  { %v266_v15 = vld [vmem:[#allocation5 + $0x2a0] sm:$0xff]  ;;  %649 = vmatpush.msra.mxu3 %v365_v10  ;;  %590 = vmatpush.msra.mxu0 %v218_v11  ;;  %v263_v19 = vld [vmem:[#allocation5 + $0x288] sm:$0xff]  ;;  %v356_v22 = vld [vmem:[#allocation5 + $0x570] sm:$0xff] }
  0x34   :  { %609 = vmatpush.msra.mxu1 %v269_v12  ;;  %630 = vmatpush.msra.mxu2 %v314_v13  ;;  %v260_v23 = vld [vmem:[#allocation5 + $0x270] sm:$0xff]  ;;  %v209_v24 = vld [vmem:[#allocation5 + $0xd8] sm:$0xff]  ;;  %v206_v28 = vld [vmem:[#allocation5 + $0xc0] sm:$0xff] }
  0x35   :  { %650 = vmatpush.msra.mxu3 %v362_v14  ;;  %591 = vmatpush.msra.mxu0 %v215_v16  ;;  %v305_v25 = vld [vmem:[#allocation5 + $0x3d8] sm:$0xff]  ;;  %v302_v29 = vld [vmem:[#allocation5 + $0x3c0] sm:$0xff]  ;;  %v203_v32 = vld [vmem:[#allocation5 + $0xa8] sm:$0xff] }
  0x36   :  { %610 = vmatpush.msra.mxu1 %v266_v15  ;;  %631 = vmatpush.msra.mxu2 %v311_v17  ;;  %v353_v26 = vld [vmem:[#allocation5 + $0x558] sm:$0xff]  ;;  %v350_v30 = vld [vmem:[#allocation5 + $0x540] sm:$0xff]  ;;  %v299_v33 = vld [vmem:[#allocation5 + $0x3a8] sm:$0xff] }
  0x37   :  { %651 = vmatpush.msra.mxu3 %v359_v18  ;;  %592 = vmatpush.msra.mxu0 %v212_v20  ;;  %v257_v27 = vld [vmem:[#allocation5 + $0x258] sm:$0xff]  ;;  %v254_v31 = vld [vmem:[#allocation5 + $0x240] sm:$0xff]  ;;  %v347_v34 = vld [vmem:[#allocation5 + $0x528] sm:$0xff] }
  0x38   :  { %611 = vmatpush.msra.mxu1 %v263_v19  ;;  %632 = vmatpush.msra.mxu2 %v308_v21  ;;  %v251_v35 = vld [vmem:[#allocation5 + $0x228] sm:$0xff]  ;;  %v200_v36 = vld [vmem:[#allocation5 + $0x90] sm:$0xff]  ;;  %v197_v40 = vld [vmem:[#allocation5 + $0x78] sm:$0xff] }
  0x39   :  { %652 = vmatpush.msra.mxu3 %v356_v22  ;;  %593 = vmatpush.msra.mxu0 %v209_v24  ;;  %v296_v37 = vld [vmem:[#allocation5 + $0x390] sm:$0xff]  ;;  %v293_v41 = vld [vmem:[#allocation5 + $0x378] sm:$0xff]  ;;  %v194_v44 = vld [vmem:[#allocation5 + $0x60] sm:$0xff] }
  0x3a   :  { %612 = vmatpush.msra.mxu1 %v260_v23  ;;  %633 = vmatpush.msra.mxu2 %v305_v25  ;;  %v344_v38 = vld [vmem:[#allocation5 + $0x510] sm:$0xff]  ;;  %v341_v42 = vld [vmem:[#allocation5 + $0x4f8] sm:$0xff]  ;;  %v290_v45 = vld [vmem:[#allocation5 + $0x360] sm:$0xff] }
  0x3b   :  { %653 = vmatpush.msra.mxu3 %v353_v26  ;;  %594 = vmatpush.msra.mxu0 %v206_v28  ;;  %v248_v39 = vld [vmem:[#allocation5 + $0x210] sm:$0xff]  ;;  %v245_v43 = vld [vmem:[#allocation5 + $0x1f8] sm:$0xff]  ;;  %v338_v46 = vld [vmem:[#allocation5 + $0x4e0] sm:$0xff] }
  0x3c   :  { %613 = vmatpush.msra.mxu1 %v257_v27  ;;  %634 = vmatpush.msra.mxu2 %v302_v29  ;;  %v242_v47 = vld [vmem:[#allocation5 + $0x1e0] sm:$0xff]  ;;  %v191_v48 = vld [vmem:[#allocation5 + $0x48] sm:$0xff]  ;;  %v188_v52 = vld [vmem:[#allocation5 + $0x30] sm:$0xff] }
  0x3d   :  { %654 = vmatpush.msra.mxu3 %v350_v30  ;;  %595 = vmatpush.msra.mxu0 %v203_v32  ;;  %v287_v49 = vld [vmem:[#allocation5 + $0x348] sm:$0xff]  ;;  %v284_v53 = vld [vmem:[#allocation5 + $0x330] sm:$0xff]  ;;  %v185_v56 = vld [vmem:[#allocation5 + $0x18] sm:$0xff] }
  0x3e   :  { %614 = vmatpush.msra.mxu1 %v254_v31  ;;  %635 = vmatpush.msra.mxu2 %v299_v33  ;;  %v335_v50 = vld [vmem:[#allocation5 + $0x4c8] sm:$0xff]  ;;  %v332_v54 = vld [vmem:[#allocation5 + $0x4b0] sm:$0xff]  ;;  %v281_v57 = vld [vmem:[#allocation5 + $0x318] sm:$0xff] }
  0x3f   :  { %655 = vmatpush.msra.mxu3 %v347_v34  ;;  %596 = vmatpush.msra.mxu0 %v200_v36  ;;  %v239_v51 = vld [vmem:[#allocation5 + $0x1c8] sm:$0xff]  ;;  %v236_v55 = vld [vmem:[#allocation5 + $0x1b0] sm:$0xff]  ;;  %v329_v58 = vld [vmem:[#allocation5 + $0x498] sm:$0xff] }
  0x40   :  { %615 = vmatpush.msra.mxu1 %v251_v35  ;;  %636 = vmatpush.msra.mxu2 %v296_v37  ;;  %v233_v59 = vld [vmem:[#allocation5 + $0x198] sm:$0xff]  ;;  %v182_v60 = vld [vmem:[#allocation5] sm:$0xff]  ;;  %v419_v63 = vld [vmem:[#allocation5 + $0x768] sm:$0xff] }
  0x41   :  { %656 = vmatpush.msra.mxu3 %v344_v38  ;;  %597 = vmatpush.msra.mxu0 %v197_v40  ;;  %v278_v61 = vld [vmem:[#allocation5 + $0x300] sm:$0xff]  ;;  %v515_v0 = vld [vmem:[#allocation5 + $0xa68] sm:$0xff]  ;;  %v416_v3 = vld [vmem:[#allocation5 + $0x750] sm:$0xff] }
  0x42   :  { %616 = vmatpush.msra.mxu1 %v248_v39  ;;  %637 = vmatpush.msra.mxu2 %v293_v41  ;;  %v326_v62 = vld [vmem:[#allocation5 + $0x480] sm:$0xff]  ;;  %v563_v1 = vld [vmem:[#allocation5 + $0xbe8] sm:$0xff]  ;;  %v512_v5 = vld [vmem:[#allocation5 + $0xa50] sm:$0xff] }
  0x43   :  { %657 = vmatpush.msra.mxu3 %v341_v42  ;;  %598 = vmatpush.msra.mxu0 %v194_v44  ;;  %v230_v2 = vld [vmem:[#allocation5 + $0x180] sm:$0xff]  ;;  %v467_v4 = vld [vmem:[#allocation5 + $0x8e8] sm:$0xff]  ;;  %v560_v6 = vld [vmem:[#allocation5 + $0xbd0] sm:$0xff] }
  0x44   :  { %617 = vmatpush.msra.mxu1 %v245_v43  ;;  %638 = vmatpush.msra.mxu2 %v290_v45  ;;  %v413_v7 = vld [vmem:[#allocation5 + $0x738] sm:$0xff]  ;;  %v464_v8 = vld [vmem:[#allocation5 + $0x8d0] sm:$0xff]  ;;  %v410_v11 = vld [vmem:[#allocation5 + $0x720] sm:$0xff] }
  0x45   :  { %658 = vmatpush.msra.mxu3 %v338_v46  ;;  %599 = vmatpush.msra.mxu0 %v191_v48  ;;  %v509_v9 = vld [vmem:[#allocation5 + $0xa38] sm:$0xff]  ;;  %v506_v13 = vld [vmem:[#allocation5 + $0xa20] sm:$0xff]  ;;  %v407_v15 = vld [vmem:[#allocation5 + $0x708] sm:$0xff] }
  0x46   :  { %618 = vmatpush.msra.mxu1 %v242_v47  ;;  %639 = vmatpush.msra.mxu2 %v287_v49  ;;  %v557_v10 = vld [vmem:[#allocation5 + $0xbb8] sm:$0xff]  ;;  %v554_v14 = vld [vmem:[#allocation5 + $0xba0] sm:$0xff]  ;;  %v180_v16 = vld [vmem:[#allocation2] sm:$0xff] }
  0x47   :  { %659 = vmatpush.msra.mxu3 %v335_v50  ;;  %600 = vmatpush.msra.mxu0 %v188_v52  ;;  %v461_v12 = vld [vmem:[#allocation5 + $0x8b8] sm:$0xff]  ;;  %v458_v17 = vld [vmem:[#allocation5 + $0x8a0] sm:$0xff]  ;;  %v503_v18 = vld [vmem:[#allocation5 + $0xa08] sm:$0xff]  ;;  %568 = vst [vmem:[#allocation1] ss:$4 sm:$0xff] %v180_v16 }
  0x48   :  { %619 = vmatpush.msra.mxu1 %v239_v51  ;;  %640 = vmatpush.msra.mxu2 %v284_v53  ;;  %v551_v19 = vld [vmem:[#allocation5 + $0xb88] sm:$0xff]  ;;  %v404_v20 = vld [vmem:[#allocation5 + $0x6f0] sm:$0xff]  ;;  %v401_v24 = vld [vmem:[#allocation5 + $0x6d8] sm:$0xff] }
  0x49   :  { %660 = vmatpush.msra.mxu3 %v332_v54  ;;  %601 = vmatpush.msra.mxu0 %v185_v56  ;;  %v455_v21 = vld [vmem:[#allocation5 + $0x888] sm:$0xff]  ;;  %v500_v22 = vld [vmem:[#allocation5 + $0x9f0] sm:$0xff]  ;;  %v497_v26 = vld [vmem:[#allocation5 + $0x9d8] sm:$0xff] }
  0x4a   :  { %620 = vmatpush.msra.mxu1 %v236_v55  ;;  %641 = vmatpush.msra.mxu2 %v281_v57  ;;  %v548_v23 = vld [vmem:[#allocation5 + $0xb70] sm:$0xff]  ;;  %v181_v27 = vld [vmem:[#allocation2 + $0x8] sm:$0xff]  ;;  %v398_v29 = vld [vmem:[#allocation5 + $0x6c0] sm:$0xff] }
  0x4b   :  { %661 = vmatpush.msra.mxu3 %v329_v58  ;;  %602 = vmatpush.msra.mxu0 %v182_v60  ;;  %v452_v25 = vld [vmem:[#allocation5 + $0x870] sm:$0xff]  ;;  %v545_v28 = vld [vmem:[#allocation5 + $0xb58] sm:$0xff]  ;;  %570 = vst [vmem:[#allocation1 + $0x20] ss:$4 sm:$0xff] %v181_v27  ;;  %v494_v31 = vld [vmem:[#allocation5 + $0x9c0] sm:$0xff] }
  0x4c   :  { %621 = vmatpush.msra.mxu1 %v233_v59  ;;  %642 = vmatpush.msra.mxu2 %v278_v61  ;;  %v449_v30 = vld [vmem:[#allocation5 + $0x858] sm:$0xff]  ;;  %v542_v32 = vld [vmem:[#allocation5 + $0xb40] sm:$0xff]  ;;  %v395_v33 = vld [vmem:[#allocation5 + $0x6a8] sm:$0xff] }
  0x4d   :  { %662 = vmatpush.msra.mxu3 %v326_v62  ;;  %667 = vmatpush.msrb.mxu0 %v419_v63  ;;  %v446_v34 = vld [vmem:[#allocation5 + $0x840] sm:$0xff]  ;;  %v491_v35 = vld [vmem:[#allocation5 + $0x9a8] sm:$0xff]  ;;  %v392_v37 = vld [vmem:[#allocation5 + $0x690] sm:$0xff] }
  0x4e   :  { %707 = vmatpush.msrb.mxu2 %v515_v0  ;;  %622 = vmatpush.msra.mxu1 %v230_v2  ;;  %v539_v36 = vld [vmem:[#allocation5 + $0xb28] sm:$0xff]  ;;  %v488_v39 = vld [vmem:[#allocation5 + $0x990] sm:$0xff]  ;;  %v389_v41 = vld [vmem:[#allocation5 + $0x678] sm:$0xff] }
  0x4f   :  { %727 = vmatpush.msrb.mxu3 %v563_v1  ;;  %668 = vmatpush.msrb.mxu0 %v416_v3  ;;  %v443_v38 = vld [vmem:[#allocation5 + $0x828] sm:$0xff]  ;;  %v536_v40 = vld [vmem:[#allocation5 + $0xb10] sm:$0xff]  ;;  %v485_v43 = vld [vmem:[#allocation5 + $0x978] sm:$0xff] }
  0x50   :  { %687 = vmatpush.msrb.mxu1 %v467_v4  ;;  %708 = vmatpush.msrb.mxu2 %v512_v5  ;;  %v440_v42 = vld [vmem:[#allocation5 + $0x810] sm:$0xff]  ;;  %v533_v44 = vld [vmem:[#allocation5 + $0xaf8] sm:$0xff]  ;;  %v386_v45 = vld [vmem:[#allocation5 + $0x660] sm:$0xff] }
  0x51   :  { %728 = vmatpush.msrb.mxu3 %v560_v6  ;;  %669 = vmatpush.msrb.mxu0 %v413_v7  ;;  %v437_v46 = vld [vmem:[#allocation5 + $0x7f8] sm:$0xff]  ;;  %v482_v47 = vld [vmem:[#allocation5 + $0x960] sm:$0xff]  ;;  %v383_v50 = vld [vmem:[#allocation5 + $0x648] sm:$0xff] }
  0x52   :  { %688 = vmatpush.msrb.mxu1 %v464_v8  ;;  %709 = vmatpush.msrb.mxu2 %v509_v9  ;;  %v530_v48 = vld [vmem:[#allocation5 + $0xae0] sm:$0xff]  ;;  %v2396_v49 = vld.sshfl [vmem:[#allocation1 + $0x10] sm:$0xff pattern:$0x73625140]  ;;  %v479_v52 = vld [vmem:[#allocation5 + $0x948] sm:$0xff] }
  0x53   :  { %729 = vmatpush.msrb.mxu3 %v557_v10  ;;  %670 = vmatpush.msrb.mxu0 %v410_v11  ;;  %v434_v51 = vld [vmem:[#allocation5 + $0x7e0] sm:$0xff]  ;;  %v527_v53 = vld [vmem:[#allocation5 + $0xac8] sm:$0xff]  ;;  %v380_v56 = vld [vmem:[#allocation5 + $0x630] sm:$0xff] }
  0x54   :  { %689 = vmatpush.msrb.mxu1 %v461_v12  ;;  %710 = vmatpush.msrb.mxu2 %v506_v13  ;;  %v2399_v54 = vld.sshfl [vmem:[#allocation1] sm:$0xff pattern:$0x73625140]  ;;  %v2401_v55 = vld.sshfl [vmem:[#allocation1 + $0x18] sm:$0xff pattern:$0x73625140] }
  0x55   :  { %730 = vmatpush.msrb.mxu3 %v554_v14  ;;  %671 = vmatpush.msrb.mxu0 %v407_v15  ;;  %v431_v57 = vld [vmem:[#allocation5 + $0x7c8] sm:$0xff]  ;;  %v476_v58 = vld [vmem:[#allocation5 + $0x930] sm:$0xff]  ;;  %v377_v61 = vld [vmem:[#allocation5 + $0x618] sm:$0xff] }
  0x56   :  { %690 = vmatpush.msrb.mxu1 %v458_v17  ;;  %711 = vmatpush.msrb.mxu2 %v503_v18  ;;  %v524_v59 = vld [vmem:[#allocation5 + $0xab0] sm:$0xff]  ;;  %v473_v63 = vld [vmem:[#allocation5 + $0x918] sm:$0xff]  ;;  %v374_v1 = vld [vmem:[#allocation5 + $0x600] sm:$0xff] }
  0x57   :  { %731 = vmatpush.msrb.mxu3 %v551_v19  ;;  %672 = vmatpush.msrb.mxu0 %v404_v20  ;;  %v2405_v60 = vld.sshfl [vmem:[#allocation1 + $0x8] sm:$0xff pattern:$0x73625140]  ;;  %v521_v0 = vld [vmem:[#allocation5 + $0xa98] sm:$0xff]  ;;  %v470_v3 = vld [vmem:[#allocation5 + $0x900] sm:$0xff] }
  0x58   :  { %691 = vmatpush.msrb.mxu1 %v455_v21  ;;  %712 = vmatpush.msrb.mxu2 %v500_v22  ;;  %v428_v62 = vld [vmem:[#allocation5 + $0x7b0] sm:$0xff]  ;;  %v425_v2 = vld [vmem:[#allocation5 + $0x798] sm:$0xff]  ;;  %v518_v4 = vld [vmem:[#allocation5 + $0xa80] sm:$0xff] }
  0x59   :  { %732 = vmatpush.msrb.mxu3 %v548_v23  ;;  %673 = vmatpush.msrb.mxu0 %v401_v24  ;;  %v2408_v5 = vld.sshfl [vmem:[#allocation1 + $0x30] sm:$0xff pattern:$0x73625140]  ;;  %v228_v6 = vld [vmem:[#allocation5 + $0x170] sm:$0xff]  ;;  %v422_v9 = vld [vmem:[#allocation5 + $0x780] sm:$0xff] }
  0x5a   :  { %692 = vmatpush.msrb.mxu1 %v452_v25  ;;  %713 = vmatpush.msrb.mxu2 %v497_v26  ;;  %v324_v7 = vld [vmem:[#allocation5 + $0x470] sm:$0xff]  ;;  %v2411_v10 = vld.sshfl [vmem:[#allocation1 + $0x20] sm:$0xff pattern:$0x73625140]  ;;  %v225_v12 = vld [vmem:[#allocation5 + $0x158] sm:$0xff] }
  0x5b   :  { %733 = vmatpush.msrb.mxu3 %v545_v28  ;;  %674 = vmatpush.msrb.mxu0 %v398_v29  ;;  %v372_v8 = vld [vmem:[#allocation5 + $0x5f0] sm:$0xff]  ;;  %v2413_v11 = vld.sshfl [vmem:[#allocation1 + $0x38] sm:$0xff pattern:$0x73625140]  ;;  %v321_v14 = vld [vmem:[#allocation5 + $0x458] sm:$0xff] }
  0x5c   :  { %693 = vmatpush.msrb.mxu1 %v449_v30  ;;  %714 = vmatpush.msrb.mxu2 %v494_v31  ;;  %v276_v13 = vld [vmem:[#allocation5 + $0x2f0] sm:$0xff]  ;;  %v369_v15 = vld [vmem:[#allocation5 + $0x5d8] sm:$0xff]  ;;  %v222_v17 = vld [vmem:[#allocation5 + $0x140] sm:$0xff] }
  0x5d   :  { %734 = vmatpush.msrb.mxu3 %v542_v32  ;;  %675 = vmatpush.msrb.mxu0 %v395_v33  ;;  %v2417_v16 = vld.sshfl [vmem:[#allocation1 + $0x28] sm:$0xff pattern:$0x73625140]  ;;  %v273_v18 = vld [vmem:[#allocation5 + $0x2d8] sm:$0xff]  ;;  %v318_v19 = vld [vmem:[#allocation5 + $0x440] sm:$0xff] }
  0x5e   :  { %694 = vmatpush.msrb.mxu1 %v446_v34  ;;  %715 = vmatpush.msrb.mxu2 %v491_v35  ;;  %v366_v20 = vld [vmem:[#allocation5 + $0x5c0] sm:$0xff]  ;;  %v219_v21 = vld [vmem:[#allocation5 + $0x128] sm:$0xff]  ;;  %v216_v25 = vld [vmem:[#allocation5 + $0x110] sm:$0xff] }
  0x5f   :  { %735 = vmatpush.msrb.mxu3 %v539_v36  ;;  %676 = vmatpush.msrb.mxu0 %v392_v37  ;;  %v270_v22 = vld [vmem:[#allocation5 + $0x2c0] sm:$0xff]  ;;  %v315_v23 = vld [vmem:[#allocation5 + $0x428] sm:$0xff]  ;;  %v312_v27 = vld [vmem:[#allocation5 + $0x410] sm:$0xff] }
  0x60   :  { %695 = vmatpush.msrb.mxu1 %v443_v38  ;;  %716 = vmatpush.msrb.mxu2 %v488_v39  ;;  %v363_v24 = vld [vmem:[#allocation5 + $0x5a8] sm:$0xff]  ;;  %v360_v28 = vld [vmem:[#allocation5 + $0x590] sm:$0xff]  ;;  %v213_v29 = vld [vmem:[#allocation5 + $0xf8] sm:$0xff] }
  0x61   :  { %736 = vmatpush.msrb.mxu3 %v536_v40  ;;  %677 = vmatpush.msrb.mxu0 %v389_v41  ;;  %v267_v26 = vld [vmem:[#allocation5 + $0x2a8] sm:$0xff]  ;;  %v264_v30 = vld [vmem:[#allocation5 + $0x290] sm:$0xff]  ;;  %v309_v31 = vld [vmem:[#allocation5 + $0x3f8] sm:$0xff] }
  0x62   :  { %696 = vmatpush.msrb.mxu1 %v440_v42  ;;  %717 = vmatpush.msrb.mxu2 %v485_v43  ;;  %v357_v32 = vld [vmem:[#allocation5 + $0x578] sm:$0xff]  ;;  %v210_v33 = vld [vmem:[#allocation5 + $0xe0] sm:$0xff]  ;;  %v207_v37 = vld [vmem:[#allocation5 + $0xc8] sm:$0xff] }
  0x63   :  { %737 = vmatpush.msrb.mxu3 %v533_v44  ;;  %678 = vmatpush.msrb.mxu0 %v386_v45  ;;  %v261_v34 = vld [vmem:[#allocation5 + $0x278] sm:$0xff]  ;;  %v306_v35 = vld [vmem:[#allocation5 + $0x3e0] sm:$0xff]  ;;  %v303_v39 = vld [vmem:[#allocation5 + $0x3c8] sm:$0xff] }
  0x64   :  { %697 = vmatpush.msrb.mxu1 %v437_v46  ;;  %718 = vmatpush.msrb.mxu2 %v482_v47  ;;  %v354_v36 = vld [vmem:[#allocation5 + $0x560] sm:$0xff]  ;;  %v351_v40 = vld [vmem:[#allocation5 + $0x548] sm:$0xff]  ;;  %v204_v41 = vld [vmem:[#allocation5 + $0xb0] sm:$0xff] }
  0x65   :  { %738 = vmatpush.msrb.mxu3 %v530_v48  ;;  %643 = vmatmul.f32.vlgmr.msra.gmra.mxu2 %v2396_v49  ;;  %v258_v38 = vld [vmem:[#allocation5 + $0x260] sm:$0xff]  ;;  %v255_v42 = vld [vmem:[#allocation5 + $0x248] sm:$0xff]  ;;  %v300_v43 = vld [vmem:[#allocation5 + $0x3b0] sm:$0xff] }
  0x66   :  { %679 = vmatpush.msrb.mxu0 %v383_v50  ;;  %698 = vmatpush.msrb.mxu1 %v434_v51  ;;  %v348_v44 = vld [vmem:[#allocation5 + $0x530] sm:$0xff]  ;;  %v201_v45 = vld [vmem:[#allocation5 + $0x98] sm:$0xff]  ;;  %v198_v50 = vld [vmem:[#allocation5 + $0x80] sm:$0xff] }
  0x67   :  { %719 = vmatpush.msrb.mxu2 %v479_v52  ;;  %739 = vmatpush.msrb.mxu3 %v527_v53  ;;  %v252_v46 = vld [vmem:[#allocation5 + $0x230] sm:$0xff]  ;;  %v297_v47 = vld [vmem:[#allocation5 + $0x398] sm:$0xff]  ;;  %v294_v52 = vld [vmem:[#allocation5 + $0x380] sm:$0xff] }
  0x68   :  { %603 = vmatmul.f32.vlgmr.msra.gmra.mxu0 %v2399_v54  ;;  %663 = vmatmul.f32.vlgmr.msra.gmra.mxu3 %v2401_v55  ;;  %v345_v48 = vld [vmem:[#allocation5 + $0x518] sm:$0xff]  ;;  %v342_v53 = vld [vmem:[#allocation5 + $0x500] sm:$0xff] }
  0x69   :  { %680 = vmatpush.msrb.mxu0 %v380_v56  ;;  %699 = vmatpush.msrb.mxu1 %v431_v57  ;;  %v249_v51 = vld [vmem:[#allocation5 + $0x218] sm:$0xff]  ;;  %v195_v56 = vld [vmem:[#allocation5 + $0x68] sm:$0xff]  ;;  %v246_v57 = vld [vmem:[#allocation5 + $0x200] sm:$0xff] }
  0x6a   :  { %720 = vmatpush.msrb.mxu2 %v476_v58  ;;  %740 = vmatpush.msrb.mxu3 %v524_v59  ;;  %v291_v58 = vld [vmem:[#allocation5 + $0x368] sm:$0xff] }
  0x6b   :  { %623 = vmatmul.f32.vlgmr.msra.gmra.mxu1 %v2405_v60  ;;  %681 = vmatpush.msrb.mxu0 %v377_v61  ;;  %v339_v59 = vld [vmem:[#allocation5 + $0x4e8] sm:$0xff]  ;;  %v192_v61 = vld [vmem:[#allocation5 + $0x50] sm:$0xff] }
  0x6c   :  { %700 = vmatpush.msrb.mxu1 %v428_v62  ;;  %721 = vmatpush.msrb.mxu2 %v473_v63  ;;  %v243_v62 = vld [vmem:[#allocation5 + $0x1e8] sm:$0xff]  ;;  %v288_v63 = vld [vmem:[#allocation5 + $0x350] sm:$0xff] }
  0x6d   :  { %741 = vmatpush.msrb.mxu3 %v521_v0  ;;  %682 = vmatpush.msrb.mxu0 %v374_v1  ;;  %v336_v0 = vld [vmem:[#allocation5 + $0x4d0] sm:$0xff]  ;;  %v189_v1 = vld [vmem:[#allocation5 + $0x38] sm:$0xff] }
  0x6e   :  { %701 = vmatpush.msrb.mxu1 %v425_v2  ;;  %722 = vmatpush.msrb.mxu2 %v470_v3  ;;  %v240_v2 = vld [vmem:[#allocation5 + $0x1d0] sm:$0xff]  ;;  %v285_v3 = vld [vmem:[#allocation5 + $0x338] sm:$0xff] }
  0x6f   :  { %742 = vmatpush.msrb.mxu3 %v518_v4  ;;  %723 = vmatmul.f32.vlgmr.msrb.gmra.mxu2 %v2408_v5  ;;  %v333_v4 = vld [vmem:[#allocation5 + $0x4b8] sm:$0xff] }
  0x70   :  { %747 = vmatpush.msra.mxu0 %v228_v6  ;;  %787 = vmatpush.msra.mxu2 %v324_v7  ;;  %v186_v6 = vld [vmem:[#allocation5 + $0x20] sm:$0xff]  ;;  %v237_v7 = vld [vmem:[#allocation5 + $0x1b8] sm:$0xff] }
  0x71   :  { %807 = vmatpush.msra.mxu3 %v372_v8  ;;  %702 = vmatpush.msrb.mxu1 %v422_v9  ;;  %v282_v8 = vld [vmem:[#allocation5 + $0x320] sm:$0xff] }
  0x72   :  { %683 = vmatmul.f32.vlgmr.msrb.gmra.mxu0 %v2411_v10  ;;  %743 = vmatmul.f32.vlgmr.msrb.gmra.mxu3 %v2413_v11  ;;  %v330_v9 = vld [vmem:[#allocation5 + $0x4a0] sm:$0xff] }
  0x73   :  { %748 = vmatpush.msra.mxu0 %v225_v12  ;;  %767 = vmatpush.msra.mxu1 %v276_v13  ;;  %v183_v12 = vld [vmem:[#allocation5 + $0x8] sm:$0xff]  ;;  %v234_v13 = vld [vmem:[#allocation5 + $0x1a0] sm:$0xff] }
  0x74   :  { %788 = vmatpush.msra.mxu2 %v321_v14  ;;  %808 = vmatpush.msra.mxu3 %v369_v15  ;;  %v279_v14 = vld [vmem:[#allocation5 + $0x308] sm:$0xff] }
  0x75   :  { %703 = vmatmul.f32.vlgmr.msrb.gmra.mxu1 %v2417_v16  ;;  %749 = vmatpush.msra.mxu0 %v222_v17  ;;  %v327_v15 = vld [vmem:[#allocation5 + $0x488] sm:$0xff]  ;;  %v420_v17 = vld [vmem:[#allocation5 + $0x770] sm:$0xff] }
  0x76   :  { %768 = vmatpush.msra.mxu1 %v273_v18  ;;  %789 = vmatpush.msra.mxu2 %v318_v19  ;;  %v516_v18 = vld [vmem:[#allocation5 + $0xa70] sm:$0xff] }
  0x77   :  { %809 = vmatpush.msra.mxu3 %v366_v20  ;;  %750 = vmatpush.msra.mxu0 %v219_v21  ;;  %v564_v19 = vld [vmem:[#allocation5 + $0xbf0] sm:$0xff]  ;;  %v231_v20 = vld [vmem:[#allocation5 + $0x188] sm:$0xff]  ;;  %v417_v21 = vld [vmem:[#allocation5 + $0x758] sm:$0xff] }
  0x78   :  { %769 = vmatpush.msra.mxu1 %v270_v22  ;;  %790 = vmatpush.msra.mxu2 %v315_v23  ;;  %v468_v22 = vld [vmem:[#allocation5 + $0x8f0] sm:$0xff]  ;;  %v513_v23 = vld [vmem:[#allocation5 + $0xa58] sm:$0xff] }
  0x79   :  { %810 = vmatpush.msra.mxu3 %v363_v24  ;;  %751 = vmatpush.msra.mxu0 %v216_v25  ;;  %v561_v24 = vld [vmem:[#allocation5 + $0xbd8] sm:$0xff]  ;;  %v414_v25 = vld [vmem:[#allocation5 + $0x740] sm:$0xff] }
  0x7a   :  { %770 = vmatpush.msra.mxu1 %v267_v26  ;;  %791 = vmatpush.msra.mxu2 %v312_v27  ;;  %v465_v26 = vld [vmem:[#allocation5 + $0x8d8] sm:$0xff]  ;;  %v510_v27 = vld [vmem:[#allocation5 + $0xa40] sm:$0xff] }
  0x7b   :  { %811 = vmatpush.msra.mxu3 %v360_v28  ;;  %752 = vmatpush.msra.mxu0 %v213_v29  ;;  %v558_v28 = vld [vmem:[#allocation5 + $0xbc0] sm:$0xff]  ;;  %v411_v29 = vld [vmem:[#allocation5 + $0x728] sm:$0xff] }
  0x7c   :  { %771 = vmatpush.msra.mxu1 %v264_v30  ;;  %792 = vmatpush.msra.mxu2 %v309_v31  ;;  %v462_v30 = vld [vmem:[#allocation5 + $0x8c0] sm:$0xff]  ;;  %v507_v31 = vld [vmem:[#allocation5 + $0xa28] sm:$0xff] }
  0x7d   :  { %812 = vmatpush.msra.mxu3 %v357_v32  ;;  %753 = vmatpush.msra.mxu0 %v210_v33  ;;  %v555_v32 = vld [vmem:[#allocation5 + $0xba8] sm:$0xff]  ;;  %v408_v33 = vld [vmem:[#allocation5 + $0x710] sm:$0xff] }
  0x7e   :  { %772 = vmatpush.msra.mxu1 %v261_v34  ;;  %793 = vmatpush.msra.mxu2 %v306_v35  ;;  %v459_v34 = vld [vmem:[#allocation5 + $0x8a8] sm:$0xff]  ;;  %v504_v35 = vld [vmem:[#allocation5 + $0xa10] sm:$0xff] }
  0x7f   :  { %813 = vmatpush.msra.mxu3 %v354_v36  ;;  %754 = vmatpush.msra.mxu0 %v207_v37  ;;  %v552_v36 = vld [vmem:[#allocation5 + $0xb90] sm:$0xff]  ;;  %v405_v37 = vld [vmem:[#allocation5 + $0x6f8] sm:$0xff] }
  0x80   :  { %773 = vmatpush.msra.mxu1 %v258_v38  ;;  %794 = vmatpush.msra.mxu2 %v303_v39  ;;  %v456_v38 = vld [vmem:[#allocation5 + $0x890] sm:$0xff]  ;;  %v501_v39 = vld [vmem:[#allocation5 + $0x9f8] sm:$0xff] }
  0x81   :  { %814 = vmatpush.msra.mxu3 %v351_v40  ;;  %755 = vmatpush.msra.mxu0 %v204_v41  ;;  %v549_v40 = vld [vmem:[#allocation5 + $0xb78] sm:$0xff]  ;;  %v402_v41 = vld [vmem:[#allocation5 + $0x6e0] sm:$0xff] }
  0x82   :  { %774 = vmatpush.msra.mxu1 %v255_v42  ;;  %795 = vmatpush.msra.mxu2 %v300_v43  ;;  %v453_v42 = vld [vmem:[#allocation5 + $0x878] sm:$0xff]  ;;  %v498_v43 = vld [vmem:[#allocation5 + $0x9e0] sm:$0xff] }
  0x83   :  { %815 = vmatpush.msra.mxu3 %v348_v44  ;;  %756 = vmatpush.msra.mxu0 %v201_v45  ;;  %v546_v44 = vld [vmem:[#allocation5 + $0xb60] sm:$0xff]  ;;  %v399_v45 = vld [vmem:[#allocation5 + $0x6c8] sm:$0xff] }
  0x84   :  { %775 = vmatpush.msra.mxu1 %v252_v46  ;;  %796 = vmatpush.msra.mxu2 %v297_v47  ;;  %v450_v46 = vld [vmem:[#allocation5 + $0x860] sm:$0xff]  ;;  %v495_v47 = vld [vmem:[#allocation5 + $0x9c8] sm:$0xff] }
  0x85   :  { %816 = vmatpush.msra.mxu3 %v345_v48  ;;  %757 = vmatpush.msra.mxu0 %v198_v50  ;;  %v543_v48 = vld [vmem:[#allocation5 + $0xb48] sm:$0xff]  ;;  %v396_v50 = vld [vmem:[#allocation5 + $0x6b0] sm:$0xff] }
  0x86   :  { %776 = vmatpush.msra.mxu1 %v249_v51  ;;  %797 = vmatpush.msra.mxu2 %v294_v52  ;;  %v447_v51 = vld [vmem:[#allocation5 + $0x848] sm:$0xff]  ;;  %v492_v52 = vld [vmem:[#allocation5 + $0x9b0] sm:$0xff] }
  0x87   :  { %817 = vmatpush.msra.mxu3 %v342_v53  ;;  %758 = vmatpush.msra.mxu0 %v195_v56  ;;  %v540_v53 = vld [vmem:[#allocation5 + $0xb30] sm:$0xff]  ;;  %v393_v56 = vld [vmem:[#allocation5 + $0x698] sm:$0xff] }
  0x88   :  { %777 = vmatpush.msra.mxu1 %v246_v57  ;;  %798 = vmatpush.msra.mxu2 %v291_v58  ;;  %v444_v57 = vld [vmem:[#allocation5 + $0x830] sm:$0xff]  ;;  %v489_v58 = vld [vmem:[#allocation5 + $0x998] sm:$0xff] }
  0x89   :  { %818 = vmatpush.msra.mxu3 %v339_v59  ;;  %759 = vmatpush.msra.mxu0 %v192_v61  ;;  %v537_v59 = vld [vmem:[#allocation5 + $0xb18] sm:$0xff]  ;;  %v390_v61 = vld [vmem:[#allocation5 + $0x680] sm:$0xff] }
  0x8a   :  { %778 = vmatpush.msra.mxu1 %v243_v62  ;;  %799 = vmatpush.msra.mxu2 %v288_v63  ;;  %v441_v62 = vld [vmem:[#allocation5 + $0x818] sm:$0xff]  ;;  %v486_v63 = vld [vmem:[#allocation5 + $0x980] sm:$0xff] }
  0x8b   :  { %819 = vmatpush.msra.mxu3 %v336_v0  ;;  %760 = vmatpush.msra.mxu0 %v189_v1  ;;  %v534_v0 = vld [vmem:[#allocation5 + $0xb00] sm:$0xff]  ;;  %v387_v1 = vld [vmem:[#allocation5 + $0x668] sm:$0xff] }
  0x8c   :  { %779 = vmatpush.msra.mxu1 %v240_v2  ;;  %800 = vmatpush.msra.mxu2 %v285_v3  ;;  %v438_v2 = vld [vmem:[#allocation5 + $0x800] sm:$0xff]  ;;  %v483_v3 = vld [vmem:[#allocation5 + $0x968] sm:$0xff] }
  0x8d   :  { %820 = vmatpush.msra.mxu3 %v333_v4  ;;  %761 = vmatpush.msra.mxu0 %v186_v6  ;;  %v531_v4 = vld [vmem:[#allocation5 + $0xae8] sm:$0xff]  ;;  %v384_v6 = vld [vmem:[#allocation5 + $0x650] sm:$0xff] }
  0x8e   :  { %780 = vmatpush.msra.mxu1 %v237_v7  ;;  %801 = vmatpush.msra.mxu2 %v282_v8  ;;  %v435_v7 = vld [vmem:[#allocation5 + $0x7e8] sm:$0xff]  ;;  %v480_v8 = vld [vmem:[#allocation5 + $0x950] sm:$0xff] }
  0x8f   :  { %821 = vmatpush.msra.mxu3 %v330_v9  ;;  %762 = vmatpush.msra.mxu0 %v183_v12  ;;  %v528_v9 = vld [vmem:[#allocation5 + $0xad0] sm:$0xff]  ;;  %v381_v12 = vld [vmem:[#allocation5 + $0x638] sm:$0xff] }
  0x90   :  { %781 = vmatpush.msra.mxu1 %v234_v13  ;;  %802 = vmatpush.msra.mxu2 %v279_v14  ;;  %v432_v13 = vld [vmem:[#allocation5 + $0x7d0] sm:$0xff]  ;;  %v477_v14 = vld [vmem:[#allocation5 + $0x938] sm:$0xff] }
  0x91   :  { %822 = vmatpush.msra.mxu3 %v327_v15  ;;  %827 = vmatpush.msrb.mxu0 %v420_v17  ;;  %v525_v15 = vld [vmem:[#allocation5 + $0xab8] sm:$0xff]  ;;  %v378_v17 = vld [vmem:[#allocation5 + $0x620] sm:$0xff] }
  0x92   :  { %867 = vmatpush.msrb.mxu2 %v516_v18  ;;  %782 = vmatpush.msra.mxu1 %v231_v20  ;;  %v429_v18 = vld [vmem:[#allocation5 + $0x7b8] sm:$0xff]  ;;  %v375_v20 = vld [vmem:[#allocation5 + $0x608] sm:$0xff] }
  0x93   :  { %887 = vmatpush.msrb.mxu3 %v564_v19  ;;  %828 = vmatpush.msrb.mxu0 %v417_v21  ;;  %v474_v19 = vld [vmem:[#allocation5 + $0x920] sm:$0xff] }
  0x94   :  { %847 = vmatpush.msrb.mxu1 %v468_v22  ;;  %868 = vmatpush.msrb.mxu2 %v513_v23  ;;  %v426_v21 = vld [vmem:[#allocation5 + $0x7a0] sm:$0xff]  ;;  %v471_v22 = vld [vmem:[#allocation5 + $0x908] sm:$0xff] }
  0x95   :  { %888 = vmatpush.msrb.mxu3 %v561_v24  ;;  %829 = vmatpush.msrb.mxu0 %v414_v25  ;;  %v519_v23 = vld [vmem:[#allocation5 + $0xa88] sm:$0xff]  ;;  %v373_v24 = vld [vmem:[#allocation5 + $0x5f8] sm:$0xff] }
  0x96   :  { %848 = vmatpush.msrb.mxu1 %v465_v26  ;;  %869 = vmatpush.msrb.mxu2 %v510_v27  ;;  %v423_v25 = vld [vmem:[#allocation5 + $0x788] sm:$0xff]  ;;  %v277_v26 = vld [vmem:[#allocation5 + $0x2f8] sm:$0xff]  ;;  %v322_v27 = vld [vmem:[#allocation5 + $0x460] sm:$0xff] }
  0x97   :  { %889 = vmatpush.msrb.mxu3 %v558_v28  ;;  %830 = vmatpush.msrb.mxu0 %v411_v29  ;;  %v370_v28 = vld [vmem:[#allocation5 + $0x5e0] sm:$0xff]  ;;  %v223_v29 = vld [vmem:[#allocation5 + $0x148] sm:$0xff] }
  0x98   :  { %849 = vmatpush.msrb.mxu1 %v462_v30  ;;  %870 = vmatpush.msrb.mxu2 %v507_v31  ;;  %v274_v30 = vld [vmem:[#allocation5 + $0x2e0] sm:$0xff]  ;;  %v319_v31 = vld [vmem:[#allocation5 + $0x448] sm:$0xff] }
  0x99   :  { %890 = vmatpush.msrb.mxu3 %v555_v32  ;;  %831 = vmatpush.msrb.mxu0 %v408_v33  ;;  %v220_v32 = vld [vmem:[#allocation5 + $0x130] sm:$0xff]  ;;  %v271_v33 = vld [vmem:[#allocation5 + $0x2c8] sm:$0xff] }
  0x9a   :  { %850 = vmatpush.msrb.mxu1 %v459_v34  ;;  %871 = vmatpush.msrb.mxu2 %v504_v35  ;;  %v316_v34 = vld [vmem:[#allocation5 + $0x430] sm:$0xff] }
  0x9b   :  { %891 = vmatpush.msrb.mxu3 %v552_v36  ;;  %832 = vmatpush.msrb.mxu0 %v405_v37  ;;  %v364_v35 = vld [vmem:[#allocation5 + $0x5b0] sm:$0xff]  ;;  %v313_v36 = vld [vmem:[#allocation5 + $0x418] sm:$0xff] }
  0x9c   :  { %851 = vmatpush.msrb.mxu1 %v456_v38  ;;  %872 = vmatpush.msrb.mxu2 %v501_v39  ;;  %v361_v37 = vld [vmem:[#allocation5 + $0x598] sm:$0xff]  ;;  %v214_v38 = vld [vmem:[#allocation5 + $0x100] sm:$0xff] }
  0x9d   :  { %892 = vmatpush.msrb.mxu3 %v549_v40  ;;  %833 = vmatpush.msrb.mxu0 %v402_v41  ;;  %v265_v39 = vld [vmem:[#allocation5 + $0x298] sm:$0xff]  ;;  %v310_v40 = vld [vmem:[#allocation5 + $0x400] sm:$0xff]  ;;  %v211_v41 = vld [vmem:[#allocation5 + $0xe8] sm:$0xff] }
  0x9e   :  { %852 = vmatpush.msrb.mxu1 %v453_v42  ;;  %873 = vmatpush.msrb.mxu2 %v498_v43  ;;  %v262_v42 = vld [vmem:[#allocation5 + $0x280] sm:$0xff]  ;;  %v307_v43 = vld [vmem:[#allocation5 + $0x3e8] sm:$0xff] }
  0x9f   :  { %893 = vmatpush.msrb.mxu3 %v546_v44  ;;  %834 = vmatpush.msrb.mxu0 %v399_v45  ;;  %v355_v44 = vld [vmem:[#allocation5 + $0x568] sm:$0xff]  ;;  %v208_v45 = vld [vmem:[#allocation5 + $0xd0] sm:$0xff] }
  0xa0   :  { %853 = vmatpush.msrb.mxu1 %v450_v46  ;;  %874 = vmatpush.msrb.mxu2 %v495_v47  ;;  %v259_v46 = vld [vmem:[#allocation5 + $0x268] sm:$0xff]  ;;  %v304_v47 = vld [vmem:[#allocation5 + $0x3d0] sm:$0xff] }
  0xa1   :  { %894 = vmatpush.msrb.mxu3 %v543_v48  ;;  %835 = vmatpush.msrb.mxu0 %v396_v50  ;;  %v352_v48 = vld [vmem:[#allocation5 + $0x550] sm:$0xff]  ;;  %v205_v50 = vld [vmem:[#allocation5 + $0xb8] sm:$0xff] }
  0xa2   :  { %854 = vmatpush.msrb.mxu1 %v447_v51  ;;  %875 = vmatpush.msrb.mxu2 %v492_v52  ;;  %v256_v51 = vld [vmem:[#allocation5 + $0x250] sm:$0xff]  ;;  %v301_v52 = vld [vmem:[#allocation5 + $0x3b8] sm:$0xff] }
  0xa3   :  { %895 = vmatpush.msrb.mxu3 %v540_v53  ;;  %836 = vmatpush.msrb.mxu0 %v393_v56  ;;  %v349_v53 = vld [vmem:[#allocation5 + $0x538] sm:$0xff]  ;;  %v202_v56 = vld [vmem:[#allocation5 + $0xa0] sm:$0xff] }
  0xa4   :  { %855 = vmatpush.msrb.mxu1 %v444_v57  ;;  %876 = vmatpush.msrb.mxu2 %v489_v58  ;;  %v253_v57 = vld [vmem:[#allocation5 + $0x238] sm:$0xff]  ;;  %v298_v58 = vld [vmem:[#allocation5 + $0x3a0] sm:$0xff] }
  0xa5   :  { %896 = vmatpush.msrb.mxu3 %v537_v59  ;;  %837 = vmatpush.msrb.mxu0 %v390_v61  ;;  %v346_v59 = vld [vmem:[#allocation5 + $0x520] sm:$0xff]  ;;  %v199_v61 = vld [vmem:[#allocation5 + $0x88] sm:$0xff] }
  0xa6   :  { %856 = vmatpush.msrb.mxu1 %v441_v62  ;;  %877 = vmatpush.msrb.mxu2 %v486_v63  ;;  %v250_v62 = vld [vmem:[#allocation5 + $0x220] sm:$0xff]  ;;  %v295_v63 = vld [vmem:[#allocation5 + $0x388] sm:$0xff] }
  0xa7   :  { %897 = vmatpush.msrb.mxu3 %v534_v0  ;;  %838 = vmatpush.msrb.mxu0 %v387_v1  ;;  %v343_v0 = vld [vmem:[#allocation5 + $0x508] sm:$0xff]  ;;  %v196_v1 = vld [vmem:[#allocation5 + $0x70] sm:$0xff] }
  0xa8   :  { %857 = vmatpush.msrb.mxu1 %v438_v2  ;;  %878 = vmatpush.msrb.mxu2 %v483_v3  ;;  %v247_v2 = vld [vmem:[#allocation5 + $0x208] sm:$0xff]  ;;  %v292_v3 = vld [vmem:[#allocation5 + $0x370] sm:$0xff] }
  0xa9   :  { %898 = vmatpush.msrb.mxu3 %v531_v4  ;;  %803 = vmatmul.f32.vlgmr.msra.gmra.mxu2 %v2396_v49  ;;  %v522_v49 = vld [vmem:[#allocation5 + $0xaa0] sm:$0xff]  ;;  %v340_v4 = vld [vmem:[#allocation5 + $0x4f0] sm:$0xff] }
  0xaa   :  { %839 = vmatpush.msrb.mxu0 %v384_v6  ;;  %858 = vmatpush.msrb.mxu1 %v435_v7  ;;  %v193_v6 = vld [vmem:[#allocation5 + $0x58] sm:$0xff]  ;;  %v244_v7 = vld [vmem:[#allocation5 + $0x1f0] sm:$0xff] }
  0xab   :  { %879 = vmatpush.msrb.mxu2 %v480_v8  ;;  %899 = vmatpush.msrb.mxu3 %v528_v9  ;;  %v289_v8 = vld [vmem:[#allocation5 + $0x358] sm:$0xff] }
  0xac   :  { %763 = vmatmul.f32.vlgmr.msra.gmra.mxu0 %v2399_v54  ;;  %823 = vmatmul.f32.vlgmr.msra.gmra.mxu3 %v2401_v55  ;;  %v229_v54 = vld [vmem:[#allocation5 + $0x178] sm:$0xff] }
  0xad   :  { %840 = vmatpush.msrb.mxu0 %v381_v12  ;;  %859 = vmatpush.msrb.mxu1 %v432_v13  ;;  %v325_v55 = vld [vmem:[#allocation5 + $0x478] sm:$0xff]  ;;  %v190_v12 = vld [vmem:[#allocation5 + $0x40] sm:$0xff] }
  0xae   :  { %880 = vmatpush.msrb.mxu2 %v477_v14  ;;  %900 = vmatpush.msrb.mxu3 %v525_v15  ;;  %v337_v9 = vld [vmem:[#allocation5 + $0x4d8] sm:$0xff]  ;;  %v286_v14 = vld [vmem:[#allocation5 + $0x340] sm:$0xff] }
  0xaf   :  { %783 = vmatmul.f32.vlgmr.msra.gmra.mxu1 %v2405_v60  ;;  %841 = vmatpush.msrb.mxu0 %v378_v17  ;;  %v226_v60 = vld [vmem:[#allocation5 + $0x160] sm:$0xff]  ;;  %v241_v13 = vld [vmem:[#allocation5 + $0x1d8] sm:$0xff]  ;;  %v187_v17 = vld [vmem:[#allocation5 + $0x28] sm:$0xff] }
  0xb0   :  { %860 = vmatpush.msrb.mxu1 %v429_v18  ;;  %881 = vmatpush.msrb.mxu2 %v474_v19  ;;  %v334_v15 = vld [vmem:[#allocation5 + $0x4c0] sm:$0xff]  ;;  %v283_v19 = vld [vmem:[#allocation5 + $0x328] sm:$0xff] }
  0xb1   :  { %901 = vmatpush.msrb.mxu3 %v522_v49  ;;  %842 = vmatpush.msrb.mxu0 %v375_v20  ;;  %v238_v18 = vld [vmem:[#allocation5 + $0x1c0] sm:$0xff]  ;;  %v331_v49 = vld [vmem:[#allocation5 + $0x4a8] sm:$0xff]  ;;  %v184_v20 = vld [vmem:[#allocation5 + $0x10] sm:$0xff] }
  0xb2   :  { %861 = vmatpush.msrb.mxu1 %v426_v21  ;;  %882 = vmatpush.msrb.mxu2 %v471_v22  ;;  %v235_v21 = vld [vmem:[#allocation5 + $0x1a8] sm:$0xff]  ;;  %v280_v22 = vld [vmem:[#allocation5 + $0x310] sm:$0xff] }
  0xb3   :  { %902 = vmatpush.msrb.mxu3 %v519_v23  ;;  %883 = vmatmul.f32.vlgmr.msrb.gmra.mxu2 %v2408_v5  ;;  %v367_v5 = vld [vmem:[#allocation5 + $0x5c8] sm:$0xff]  ;;  %v328_v23 = vld [vmem:[#allocation5 + $0x490] sm:$0xff] }
  0xb4   :  { %907 = vmatpush.msra.mxu0 %v229_v54  ;;  %947 = vmatpush.msra.mxu2 %v325_v55  ;;  %v421_v54 = vld [vmem:[#allocation5 + $0x778] sm:$0xff] }
  0xb5   :  { %967 = vmatpush.msra.mxu3 %v373_v24  ;;  %862 = vmatpush.msrb.mxu1 %v423_v25  ;;  %v517_v55 = vld [vmem:[#allocation5 + $0xa78] sm:$0xff]  ;;  %v232_v25 = vld [vmem:[#allocation5 + $0x190] sm:$0xff] }
  0xb6   :  { %843 = vmatmul.f32.vlgmr.msrb.gmra.mxu0 %v2411_v10  ;;  %903 = vmatmul.f32.vlgmr.msrb.gmra.mxu3 %v2413_v11  ;;  %v217_v10 = vld [vmem:[#allocation5 + $0x118] sm:$0xff]  ;;  %v268_v11 = vld [vmem:[#allocation5 + $0x2b0] sm:$0xff] }
  0xb7   :  { %908 = vmatpush.msra.mxu0 %v226_v60  ;;  %927 = vmatpush.msra.mxu1 %v277_v26  ;;  %v565_v24 = vld [vmem:[#allocation5 + $0xbf8] sm:$0xff]  ;;  %v418_v60 = vld [vmem:[#allocation5 + $0x760] sm:$0xff] }
  0xb8   :  { %948 = vmatpush.msra.mxu2 %v322_v27  ;;  %968 = vmatpush.msra.mxu3 %v370_v28  ;;  %v469_v26 = vld [vmem:[#allocation5 + $0x8f8] sm:$0xff]  ;;  %v514_v27 = vld [vmem:[#allocation5 + $0xa60] sm:$0xff] }
  0xb9   :  { %863 = vmatmul.f32.vlgmr.msrb.gmra.mxu1 %v2417_v16  ;;  %909 = vmatpush.msra.mxu0 %v223_v29  ;;  %v358_v16 = vld [vmem:[#allocation5 + $0x580] sm:$0xff]  ;;  %v415_v29 = vld [vmem:[#allocation5 + $0x748] sm:$0xff] }
  0xba   :  { %928 = vmatpush.msra.mxu1 %v274_v30  ;;  %949 = vmatpush.msra.mxu2 %v319_v31  ;;  %v562_v28 = vld [vmem:[#allocation5 + $0xbe0] sm:$0xff]  ;;  %v511_v31 = vld [vmem:[#allocation5 + $0xa48] sm:$0xff] }
  0xbb   :  { %969 = vmatpush.msra.mxu3 %v367_v5  ;;  %910 = vmatpush.msra.mxu0 %v220_v32  ;;  %v466_v30 = vld [vmem:[#allocation5 + $0x8e0] sm:$0xff]  ;;  %v559_v5 = vld [vmem:[#allocation5 + $0xbc8] sm:$0xff]  ;;  %v412_v32 = vld [vmem:[#allocation5 + $0x730] sm:$0xff] }
  0xbc   :  { %929 = vmatpush.msra.mxu1 %v271_v33  ;;  %950 = vmatpush.msra.mxu2 %v316_v34  ;;  %v463_v33 = vld [vmem:[#allocation5 + $0x8c8] sm:$0xff]  ;;  %v508_v34 = vld [vmem:[#allocation5 + $0xa30] sm:$0xff] }
  0xbd   :  { %970 = vmatpush.msra.mxu3 %v364_v35  ;;  %911 = vmatpush.msra.mxu0 %v217_v10  ;;  %v556_v35 = vld [vmem:[#allocation5 + $0xbb0] sm:$0xff]  ;;  %v409_v10 = vld [vmem:[#allocation5 + $0x718] sm:$0xff] }
  0xbe   :  { %930 = vmatpush.msra.mxu1 %v268_v11  ;;  %951 = vmatpush.msra.mxu2 %v313_v36  ;;  %v460_v11 = vld [vmem:[#allocation5 + $0x8b0] sm:$0xff]  ;;  %v505_v36 = vld [vmem:[#allocation5 + $0xa18] sm:$0xff] }
  0xbf   :  { %971 = vmatpush.msra.mxu3 %v361_v37  ;;  %912 = vmatpush.msra.mxu0 %v214_v38  ;;  %v553_v37 = vld [vmem:[#allocation5 + $0xb98] sm:$0xff]  ;;  %v406_v38 = vld [vmem:[#allocation5 + $0x700] sm:$0xff] }
  0xc0   :  { %931 = vmatpush.msra.mxu1 %v265_v39  ;;  %952 = vmatpush.msra.mxu2 %v310_v40  ;;  %v457_v39 = vld [vmem:[#allocation5 + $0x898] sm:$0xff]  ;;  %v502_v40 = vld [vmem:[#allocation5 + $0xa00] sm:$0xff] }
  0xc1   :  { %972 = vmatpush.msra.mxu3 %v358_v16  ;;  %913 = vmatpush.msra.mxu0 %v211_v41  ;;  %v550_v16 = vld [vmem:[#allocation5 + $0xb80] sm:$0xff]  ;;  %v403_v41 = vld [vmem:[#allocation5 + $0x6e8] sm:$0xff] }
  0xc2   :  { %932 = vmatpush.msra.mxu1 %v262_v42  ;;  %953 = vmatpush.msra.mxu2 %v307_v43  ;;  %v454_v42 = vld [vmem:[#allocation5 + $0x880] sm:$0xff]  ;;  %v499_v43 = vld [vmem:[#allocation5 + $0x9e8] sm:$0xff] }
  0xc3   :  { %973 = vmatpush.msra.mxu3 %v355_v44  ;;  %914 = vmatpush.msra.mxu0 %v208_v45  ;;  %v547_v44 = vld [vmem:[#allocation5 + $0xb68] sm:$0xff]  ;;  %v400_v45 = vld [vmem:[#allocation5 + $0x6d0] sm:$0xff] }
  0xc4   :  { %933 = vmatpush.msra.mxu1 %v259_v46  ;;  %954 = vmatpush.msra.mxu2 %v304_v47  ;;  %v451_v46 = vld [vmem:[#allocation5 + $0x868] sm:$0xff]  ;;  %v496_v47 = vld [vmem:[#allocation5 + $0x9d0] sm:$0xff] }
  0xc5   :  { %974 = vmatpush.msra.mxu3 %v352_v48  ;;  %915 = vmatpush.msra.mxu0 %v205_v50  ;;  %v544_v48 = vld [vmem:[#allocation5 + $0xb50] sm:$0xff]  ;;  %v397_v50 = vld [vmem:[#allocation5 + $0x6b8] sm:$0xff] }
  0xc6   :  { %934 = vmatpush.msra.mxu1 %v256_v51  ;;  %955 = vmatpush.msra.mxu2 %v301_v52  ;;  %v448_v51 = vld [vmem:[#allocation5 + $0x850] sm:$0xff]  ;;  %v493_v52 = vld [vmem:[#allocation5 + $0x9b8] sm:$0xff] }
  0xc7   :  { %975 = vmatpush.msra.mxu3 %v349_v53  ;;  %916 = vmatpush.msra.mxu0 %v202_v56  ;;  %v541_v53 = vld [vmem:[#allocation5 + $0xb38] sm:$0xff]  ;;  %v394_v56 = vld [vmem:[#allocation5 + $0x6a0] sm:$0xff] }
  0xc8   :  { %935 = vmatpush.msra.mxu1 %v253_v57  ;;  %956 = vmatpush.msra.mxu2 %v298_v58  ;;  %v445_v57 = vld [vmem:[#allocation5 + $0x838] sm:$0xff]  ;;  %v490_v58 = vld [vmem:[#allocation5 + $0x9a0] sm:$0xff] }
  0xc9   :  { %976 = vmatpush.msra.mxu3 %v346_v59  ;;  %917 = vmatpush.msra.mxu0 %v199_v61  ;;  %v538_v61 = vld [vmem:[#allocation5 + $0xb20] sm:$0xff] }
  0xca   :  { %936 = vmatpush.msra.mxu1 %v250_v62  ;;  %957 = vmatpush.msra.mxu2 %v295_v63  ;;  %v391_v62 = vld [vmem:[#allocation5 + $0x688] sm:$0xff]  ;;  %v442_v63 = vld [vmem:[#allocation5 + $0x820] sm:$0xff] }
  0xcb   :  { %977 = vmatpush.msra.mxu3 %v343_v0  ;;  %918 = vmatpush.msra.mxu0 %v196_v1  ;;  %v487_v0 = vld [vmem:[#allocation5 + $0x988] sm:$0xff] }
  0xcc   :  { %937 = vmatpush.msra.mxu1 %v247_v2  ;;  %958 = vmatpush.msra.mxu2 %v292_v3  ;;  %v535_v1 = vld [vmem:[#allocation5 + $0xb08] sm:$0xff] }
  0xcd   :  { %978 = vmatpush.msra.mxu3 %v340_v4  ;;  %919 = vmatpush.msra.mxu0 %v193_v6  ;;  %v388_v4 = vld [vmem:[#allocation5 + $0x670] sm:$0xff]  ;;  %v439_v6 = vld [vmem:[#allocation5 + $0x808] sm:$0xff] }
  0xce   :  { %938 = vmatpush.msra.mxu1 %v244_v7  ;;  %959 = vmatpush.msra.mxu2 %v289_v8  ;;  %v484_v8 = vld [vmem:[#allocation5 + $0x970] sm:$0xff] }
  0xcf   :  { %979 = vmatpush.msra.mxu3 %v337_v9  ;;  %920 = vmatpush.msra.mxu0 %v190_v12  ;;  %v532_v9 = vld [vmem:[#allocation5 + $0xaf0] sm:$0xff]  ;;  %v1994_v12 = vld.sshfl [vmem:[#allocation1 + $0x10] sm:$0xff pattern:$0x73625140] }
  0xd0   :  { %939 = vmatpush.msra.mxu1 %v241_v13  ;;  %960 = vmatpush.msra.mxu2 %v286_v14 }
  0xd1   :  { %980 = vmatpush.msra.mxu3 %v334_v15  ;;  %921 = vmatpush.msra.mxu0 %v187_v17  ;;  %v385_v15 = vld [vmem:[#allocation5 + $0x658] sm:$0xff]  ;;  %v436_v17 = vld [vmem:[#allocation5 + $0x7f0] sm:$0xff] }
  0xd2   :  { %940 = vmatpush.msra.mxu1 %v238_v18  ;;  %961 = vmatpush.msra.mxu2 %v283_v19  ;;  %v481_v18 = vld [vmem:[#allocation5 + $0x958] sm:$0xff] }
  0xd3   :  { %981 = vmatpush.msra.mxu3 %v331_v49  ;;  %922 = vmatpush.msra.mxu0 %v184_v20  ;;  %v529_v19 = vld [vmem:[#allocation5 + $0xad8] sm:$0xff]  ;;  %v1995_v20 = vld.sshfl [vmem:[#allocation1] sm:$0xff pattern:$0x73625140] }
  0xd4   :  { %941 = vmatpush.msra.mxu1 %v235_v21  ;;  %962 = vmatpush.msra.mxu2 %v280_v22  ;;  %v1996_v21 = vld.sshfl [vmem:[#allocation1 + $0x18] sm:$0xff pattern:$0x73625140] }
  0xd5   :  { %982 = vmatpush.msra.mxu3 %v328_v23  ;;  %987 = vmatpush.msrb.mxu0 %v421_v54  ;;  %v382_v22 = vld [vmem:[#allocation5 + $0x640] sm:$0xff]  ;;  %v433_v23 = vld [vmem:[#allocation5 + $0x7d8] sm:$0xff] }
  0xd6   :  { %1027 = vmatpush.msrb.mxu2 %v517_v55  ;;  %942 = vmatpush.msra.mxu1 %v232_v25  ;;  %v478_v54 = vld [vmem:[#allocation5 + $0x940] sm:$0xff]  ;;  %v379_v25 = vld [vmem:[#allocation5 + $0x628] sm:$0xff] }
  0xd7   :  { %1047 = vmatpush.msrb.mxu3 %v565_v24  ;;  %988 = vmatpush.msrb.mxu0 %v418_v60  ;;  %v526_v24 = vld [vmem:[#allocation5 + $0xac0] sm:$0xff] }
  0xd8   :  { %1007 = vmatpush.msrb.mxu1 %v469_v26  ;;  %1028 = vmatpush.msrb.mxu2 %v514_v27  ;;  %v1997_v26 = vld.sshfl [vmem:[#allocation1 + $0x8] sm:$0xff pattern:$0x73625140]  ;;  %v430_v27 = vld [vmem:[#allocation5 + $0x7c0] sm:$0xff] }
  0xd9   :  { %1048 = vmatpush.msrb.mxu3 %v562_v28  ;;  %989 = vmatpush.msrb.mxu0 %v415_v29  ;;  %v475_v28 = vld [vmem:[#allocation5 + $0x928] sm:$0xff] }
  0xda   :  { %1008 = vmatpush.msrb.mxu1 %v466_v30  ;;  %1029 = vmatpush.msrb.mxu2 %v511_v31  ;;  %v523_v29 = vld [vmem:[#allocation5 + $0xaa8] sm:$0xff]  ;;  %v376_v30 = vld [vmem:[#allocation5 + $0x610] sm:$0xff] }
  0xdb   :  { %1049 = vmatpush.msrb.mxu3 %v559_v5  ;;  %990 = vmatpush.msrb.mxu0 %v412_v32  ;;  %v427_v5 = vld [vmem:[#allocation5 + $0x7a8] sm:$0xff]  ;;  %v472_v32 = vld [vmem:[#allocation5 + $0x910] sm:$0xff] }
  0xdc   :  { %1009 = vmatpush.msrb.mxu1 %v463_v33  ;;  %1030 = vmatpush.msrb.mxu2 %v508_v34  ;;  %v520_v34 = vld [vmem:[#allocation5 + $0xa90] sm:$0xff] }
  0xdd   :  { %1050 = vmatpush.msrb.mxu3 %v556_v35  ;;  %991 = vmatpush.msrb.mxu0 %v409_v10  ;;  %v2428_v10 = vld [vmem:[#allocation10 + $0x168] sm:$0xff] }
  0xde   :  { %1010 = vmatpush.msrb.mxu1 %v460_v11  ;;  %1031 = vmatpush.msrb.mxu2 %v505_v36  ;;  %v2430_v11 = vld [vmem:[#allocation10 + $0x170] sm:$0xff]  ;;  %v424_v36 = vld [vmem:[#allocation5 + $0x790] sm:$0xff] }
  0xdf   :  { %1051 = vmatpush.msrb.mxu3 %v553_v37  ;;  %992 = vmatpush.msrb.mxu0 %v406_v38  ;;  %v1998_v37 = vld.sshfl [vmem:[#allocation1 + $0x20] sm:$0xff pattern:$0x73625140] }
  0xe0   :  { %1011 = vmatpush.msrb.mxu1 %v457_v39  ;;  %1032 = vmatpush.msrb.mxu2 %v502_v40  ;;  %v1999_v39 = vld.sshfl [vmem:[#allocation1 + $0x30] sm:$0xff pattern:$0x73625140] }
  0xe1   :  { %1052 = vmatpush.msrb.mxu3 %v550_v16  ;;  %993 = vmatpush.msrb.mxu0 %v403_v41  ;;  %v2433_v40 = vld [vmem:[#allocation10 + $0x150] sm:$0xff]  ;;  %v2435_v16 = vld [vmem:[#allocation10 + $0x158] sm:$0xff] }
  0xe2   :  { %1012 = vmatpush.msrb.mxu1 %v454_v42  ;;  %1033 = vmatpush.msrb.mxu2 %v499_v43  ;;  %v2438_v42 = vld [vmem:[#allocation10 + $0x2e8] sm:$0xff] }
  0xe3   :  { %1053 = vmatpush.msrb.mxu3 %v547_v44  ;;  %994 = vmatpush.msrb.mxu0 %v400_v45  ;;  %v2000_v43 = vld.sshfl [vmem:[#allocation1 + $0x28] sm:$0xff pattern:$0x73625140]  ;;  %v2001_v44 = vld.sshfl [vmem:[#allocation1 + $0x38] sm:$0xff pattern:$0x73625140] }
  0xe4   :  { %1013 = vmatpush.msrb.mxu1 %v451_v46  ;;  %1034 = vmatpush.msrb.mxu2 %v496_v47  ;;  %v2440_v45 = vld [vmem:[#allocation10 + $0x138] sm:$0xff]  ;;  %v2442_v46 = vld [vmem:[#allocation10 + $0x140] sm:$0xff] }
  0xe5   :  { %1054 = vmatpush.msrb.mxu3 %v544_v48  ;;  %995 = vmatpush.msrb.mxu0 %v397_v50  ;;  %v604_v59 = vpop.f32.mrf.mxu0  ;;  %v2448_v48 = vld [vmem:[#allocation10 + $0x120] sm:$0xff]  ;;  %v2450_v50 = vld [vmem:[#allocation10 + $0x128] sm:$0xff] }
  0xe6   :  { %1014 = vmatpush.msrb.mxu1 %v448_v51  ;;  %1035 = vmatpush.msrb.mxu2 %v493_v52  ;;  %v2455_v51 = vld [vmem:[#allocation10 + $0x108] sm:$0xff]  ;;  %v2457_v52 = vld [vmem:[#allocation10 + $0x110] sm:$0xff] }
  0xe7   :  { %1055 = vmatpush.msrb.mxu3 %v541_v53  ;;  %996 = vmatpush.msrb.mxu0 %v394_v56  ;;  %v2463_v56 = vld [vmem:[#allocation10 + $0xf0] sm:$0xff] }
  0xe8   :  { %1015 = vmatpush.msrb.mxu1 %v445_v57  ;;  %1036 = vmatpush.msrb.mxu2 %v490_v58  ;;  %v624_v2 = vpop.f32.mrf.mxu1  ;;  %v644_v3 = vpop.f32.mrf.mxu2  ;;  %v2465_v57 = vld [vmem:[#allocation10 + $0xf8] sm:$0xff] }
  0xe9   :  { %1056 = vmatpush.msrb.mxu3 %v538_v61  ;;  %997 = vmatpush.msrb.mxu0 %v391_v62  ;;  %v625_v7 = vadd.f32 %v624_v2, %v604_v59  ;;  %v2469_v59 = vld [vmem:[#allocation10 + $0xd8] sm:$0xff]  ;;  %v2471_v61 = vld [vmem:[#allocation10 + $0xe0] sm:$0xff]  ;;  %v2483_v2 = vld [vmem:[#allocation10 + $0xb0] sm:$0xff] }
  0xea   :  { %1016 = vmatpush.msrb.mxu1 %v442_v63  ;;  %1037 = vmatpush.msrb.mxu2 %v487_v0  ;;  %v2475_v62 = vld [vmem:[#allocation10 + $0xc0] sm:$0xff]  ;;  %v2477_v63 = vld [vmem:[#allocation10 + $0xc8] sm:$0xff] }
  0xeb   :  { %1057 = vmatpush.msrb.mxu3 %v535_v1  ;;  %963 = vmatmul.f32.vlgmr.msra.gmra.mxu2 %v1994_v12  ;;  %v645_v13 = vadd.f32 %v644_v3, %v625_v7  ;;  %v664_v14 = vpop.f32.mrf.mxu3  ;;  %v2481_v1 = vld [vmem:[#allocation10 + $0xa8] sm:$0xff]  ;;  %v2487_v3 = vld [vmem:[#allocation10 + $0x90] sm:$0xff]  ;;  %v2502_v12 = vld [vmem:[#allocation10 + $0x60] sm:$0xff] }
  0xec   :  { %998 = vmatpush.msrb.mxu0 %v388_v4  ;;  %1017 = vmatpush.msrb.mxu1 %v439_v6  ;;  %v2489_v4 = vld [vmem:[#allocation10 + $0x98] sm:$0xff]  ;;  %v2493_v6 = vld [vmem:[#allocation10 + $0x2d0] sm:$0xff] }
  0xed   :  { %1038 = vmatpush.msrb.mxu2 %v484_v8  ;;  %1058 = vmatpush.msrb.mxu3 %v532_v9  ;;  %v665_v49 = vadd.f32 %v664_v14, %v645_v13  ;;  %v2495_v8 = vld [vmem:[#allocation10 + $0x78] sm:$0xff]  ;;  %v2497_v9 = vld [vmem:[#allocation10 + $0x80] sm:$0xff]  ;;  %v2504_v13 = vld [vmem:[#allocation10 + $0x68] sm:$0xff] }
  0xee   :  { %923 = vmatmul.f32.vlgmr.msra.gmra.mxu0 %v1995_v20  ;;  %983 = vmatmul.f32.vlgmr.msra.gmra.mxu3 %v1996_v21  ;;  %v2508_v14 = vld [vmem:[#allocation10 + $0x2b8] sm:$0xff]  ;;  %v2526_v21 = vld [vmem:[#allocation10 + $0x288] sm:$0xff] }
  0xef   :  { %999 = vmatpush.msrb.mxu0 %v385_v15  ;;  %1018 = vmatpush.msrb.mxu1 %v436_v17  ;;  %v684_v55 = vpop.f32.mrf.mxu0  ;;  %v2510_v17 = vld [vmem:[#allocation10 + $0x48] sm:$0xff]  ;;  %v2521_v20 = vld [vmem:[#allocation10 + $0x38] sm:$0xff] }
  0xf0   :  { %1039 = vmatpush.msrb.mxu2 %v481_v18  ;;  %1059 = vmatpush.msrb.mxu3 %v529_v19  ;;  %v685_v60 = vadd.f32 %v684_v55, %v665_v49  ;;  %v2512_v18 = vld [vmem:[#allocation10 + $0x50] sm:$0xff]  ;;  %v2517_v19 = vld [vmem:[#allocation10 + $0x2a0] sm:$0xff] }
  0xf1   :  { %943 = vmatmul.f32.vlgmr.msra.gmra.mxu1 %v1997_v26  ;;  %1000 = vmatpush.msrb.mxu0 %v382_v22  ;;  %v2519_v49 = vld [vmem:[#allocation10 + $0x30] sm:$0xff]  ;;  %v2535_v55 = vld [vmem:[#allocation10] sm:$0xff] }
  0xf2   :  { %1019 = vmatpush.msrb.mxu1 %v433_v23  ;;  %1040 = vmatpush.msrb.mxu2 %v478_v54  ;;  %v704_v31 = vpop.f32.mrf.mxu1  ;;  %v724_v35 = vpop.f32.mrf.mxu2  ;;  %v2528_v23 = vld [vmem:[#allocation10 + $0x18] sm:$0xff]  ;;  %v2530_v54 = vld [vmem:[#allocation10 + $0x20] sm:$0xff]  ;;  %v2545_v26 = vld [vmem:[#allocation10 + $0x2f0] sm:$0xff] }
  0xf3   :  { %1060 = vmatpush.msrb.mxu3 %v526_v24  ;;  %1001 = vmatpush.msrb.mxu0 %v379_v25  ;;  %v705_v33 = vadd.f32 %v704_v31, %v685_v60  ;;  %v2537_v24 = vld [vmem:[#allocation10 + $0x8] sm:$0xff]  ;;  %v2539_v25 = vld [vmem:[#allocation10 + $0x270] sm:$0xff]  ;;  %v2562_v31 = vld [vmem:[#allocation10 + $0x240] sm:$0xff] }
  0xf4   :  { %1020 = vmatpush.msrb.mxu1 %v430_v27  ;;  %1041 = vmatpush.msrb.mxu2 %v475_v28  ;;  %2995 = vst [vmem:[#allocation28_spill] sm:$0xff] %v2539_v25  ;;  %v2547_v27 = vld [vmem:[#allocation10 + $0x2f8] sm:$0xff] }
  0xf5   :  { %1061 = vmatpush.msrb.mxu3 %v523_v29  ;;  %1002 = vmatpush.msrb.mxu0 %v376_v30  ;;  %v725_v38 = vadd.f32 %v724_v35, %v705_v33  ;;  %v744_v41 = vpop.f32.mrf.mxu3  ;;  %v2552_v28 = vld [vmem:[#allocation10 + $0x258] sm:$0xff]  ;;  %v2558_v30 = vld [vmem:[#allocation10 + $0x2e0] sm:$0xff]  ;;  %2997 = vst [vmem:[#allocation30_spill] sm:$0xff] %v2562_v31  ;;  %v2571_v33 = vld [vmem:[#allocation10 + $0x2a8] sm:$0xff] }
  0xf6   :  { %1021 = vmatpush.msrb.mxu1 %v427_v5  ;;  %1042 = vmatpush.msrb.mxu2 %v472_v32  ;;  %2996 = vst [vmem:[#allocation29_spill] sm:$0xff] %v2552_v28  ;;  %v2556_v29 = vld [vmem:[#allocation10 + $0x2d8] sm:$0xff]  ;;  %v2564_v5 = vld [vmem:[#allocation10 + $0x2c0] sm:$0xff]  ;;  %v2566_v32 = vld [vmem:[#allocation10 + $0x2c8] sm:$0xff] }
  0xf7   :  { %1062 = vmatpush.msrb.mxu3 %v520_v34  ;;  %1003 = vmatmul.f32.vlgmr.msrb.gmra.mxu0 %v1998_v37  ;;  %v2446_v47 = vadd.f32 %v744_v41, %v725_v38  ;;  %v2573_v34 = vld [vmem:[#allocation10 + $0x2b0] sm:$0xff]  ;;  %v2584_v37 = vld [vmem:[#allocation10 + $0x278] sm:$0xff]  ;;  %v2586_v38 = vld [vmem:[#allocation10 + $0x280] sm:$0xff] }
  0xf8   :  { %1043 = vmatmul.f32.vlgmr.msrb.gmra.mxu2 %v1999_v39  ;;  %1233 = vmatpush.msra.mxu0 %v2428_v10  ;;  %2998 = vst [vmem:[#allocation31_spill] sm:$0xff] %v2573_v34  ;;  %v2578_v35 = vld [vmem:[#allocation10 + $0x290] sm:$0xff]  ;;  %v2588_v39 = vld [vmem:[#allocation10 + $0x228] sm:$0xff]  ;;  %v2592_v41 = vld [vmem:[#allocation10 + $0x260] sm:$0xff] }
  0xf9   :  { %1293 = vmatpush.msra.mxu3 %v2430_v11  ;;  %1022 = vmatpush.msrb.mxu1 %v424_v36  ;;  %2994 = vst [vmem:[#allocation27_spill] sm:$0xff] %v2446_v47  ;;  %v1068_v53 = vsel %vm1067_vm0, %v2446_v47, 0.0  ;;  %v2580_v36 = vld [vmem:[#allocation10 + $0x298] sm:$0xff]  ;;  %v2619_v47 = vld [vmem:[#allocation10 + $0x1c8] sm:$0xff] }
  0xfa   :  { %1023 = vmatmul.f32.vlgmr.msrb.gmra.mxu1 %v2000_v43  ;;  %1063 = vmatmul.f32.vlgmr.msrb.gmra.mxu3 %v2001_v44  ;;  %v1069_v58 = vrot.slane %v1068_v53, 4  ;;  %2999 = vst [vmem:[#allocation32_spill] sm:$0xff] %v2578_v35  ;;  %v2594_v43 = vld [vmem:[#allocation10 + $0x268] sm:$0xff]  ;;  %v2597_v44 = vld [vmem:[#allocation10 + $0x210] sm:$0xff] }
  0xfb   :  { %1234 = vmatpush.msra.mxu0 %v2433_v40  ;;  %1294 = vmatpush.msra.mxu3 %v2435_v16  ;;  %3000 = vst [vmem:[#allocation33_spill] sm:$0xff] %v2580_v36 }
  0xfc   :  { %1253 = vmatpush.msra.mxu1 %v2438_v42  ;;  %v1070_v0 = vadd.f32 %v1069_v58, %v1068_v53  ;;  %3001 = vst [vmem:[#allocation34_spill] sm:$0xff] %v2584_v37  ;;  %v2601_v53 = vld [vmem:[#allocation10 + $0x248] sm:$0xff]  ;;  %v2603_v58 = vld [vmem:[#allocation10 + $0x250] sm:$0xff] }
  0xfd   :  { %1235 = vmatpush.msra.mxu0 %v2440_v45  ;;  %1295 = vmatpush.msra.mxu3 %v2442_v46  ;;  %3002 = vst [vmem:[#allocation35_spill] sm:$0xff] %v2586_v38 }
  0xfe   :  { %v1071_v7 = vrot.slane %v1070_v0, 2  ;;  %1254 = vmatpush.msra.mxu1 %v2493_v6  ;;  %3003 = vst [vmem:[#allocation36_spill] sm:$0xff] %v2588_v39 }
  0xff   :  { %1236 = vmatpush.msra.mxu0 %v2448_v48  ;;  %1296 = vmatpush.msra.mxu3 %v2450_v50  ;;  %3004 = vst [vmem:[#allocation37_spill] sm:$0xff] %v2592_v41 }
 0x100   :  { %v1072_v15 = vadd.f32 %v1071_v7, %v1070_v0  ;;  %1255 = vmatpush.msra.mxu1 %v2508_v14  ;;  %3005 = vst [vmem:[#allocation38_spill] sm:$0xff] %v2594_v43  ;;  %v2606_v0 = vld [vmem:[#allocation10 + $0x1f8] sm:$0xff]  ;;  %v2610_v7 = vld [vmem:[#allocation10 + $0x230] sm:$0xff] }
 0x101   :  { %1237 = vmatpush.msra.mxu0 %v2455_v51  ;;  %1297 = vmatpush.msra.mxu3 %v2457_v52  ;;  %3006 = vst [vmem:[#allocation39_spill] sm:$0xff] %v2597_v44 }
 0x102   :  { %1256 = vmatpush.msra.mxu1 %v2517_v19  ;;  %v1073_v22 = vrot.slane %v1072_v15, 1  ;;  %3007 = vst [vmem:[#allocation40_spill] sm:$0xff] %v2601_v53 }
 0x103   :  { %1238 = vmatpush.msra.mxu0 %v2463_v56  ;;  %1298 = vmatpush.msra.mxu3 %v2465_v57  ;;  %3008 = vst [vmem:[#allocation41_spill] sm:$0xff] %v2603_v58 }
 0x104   :  { %1257 = vmatpush.msra.mxu1 %v2526_v21  ;;  %v2543_v60 = vadd.f32 %v1073_v22, %v1072_v15  ;;  %3009 = vst [vmem:[#allocation42_spill] sm:$0xff] %v2606_v0  ;;  %v2612_v15 = vld [vmem:[#allocation10 + $0x238] sm:$0xff]  ;;  %v2615_v22 = vld [vmem:[#allocation10 + $0x1e0] sm:$0xff] }
 0x105   :  { %1239 = vmatpush.msra.mxu0 %v2469_v59  ;;  %1299 = vmatpush.msra.mxu3 %v2471_v61  ;;  %3010 = vst [vmem:[#allocation43_spill] sm:$0xff] %v2610_v7 }
 0x106   :  { %1258 = vmatpush.msra.mxu1 %v2539_v25  ;;  %3011 = vst [vmem:[#allocation44_spill] sm:$0xff] %v2612_v15 }
 0x107   :  { %1240 = vmatpush.msra.mxu0 %v2475_v62  ;;  %1300 = vmatpush.msra.mxu3 %v2477_v63  ;;  %3012 = vst [vmem:[#allocation45_spill] sm:$0xff] %v2615_v22 }
 0x108   :  { %1259 = vmatpush.msra.mxu1 %v2552_v28  ;;  %3013 = vst [vmem:[#allocation46_spill] sm:$0xff] %v2619_v47  ;;  %v2639_v28 = vld [vmem:[#allocation10 + $0x1e8] sm:$0xff] }
 0x109   :  { %1241 = vmatpush.msra.mxu0 %v2481_v1  ;;  %1301 = vmatpush.msra.mxu3 %v2483_v2  ;;  %3020 = vst [vmem:[#allocation53_spill] sm:$0xff] %v2639_v28 }
 0x10a   :  { %1260 = vmatpush.msra.mxu1 %v2562_v31  ;;  %v2630_v31 = vld [vmem:[#allocation10 + $0x200] sm:$0xff] }
 0x10b   :  { %1242 = vmatpush.msra.mxu0 %v2487_v3  ;;  %1302 = vmatpush.msra.mxu3 %v2489_v4  ;;  %3017 = vst [vmem:[#allocation50_spill] sm:$0xff] %v2630_v31 }
 0x10c   :  { %1261 = vmatpush.msra.mxu1 %v2588_v39  ;;  %v2623_v39 = vld [vmem:[#allocation10 + $0x220] sm:$0xff] }
 0x10d   :  { %1243 = vmatpush.msra.mxu0 %v2495_v8  ;;  %1303 = vmatpush.msra.mxu3 %v2497_v9  ;;  %3015 = vst [vmem:[#allocation48_spill] sm:$0xff] %v2623_v39 }
 0x10e   :  { %1262 = vmatpush.msra.mxu1 %v2597_v44  ;;  %v2621_v44 = vld [vmem:[#allocation10 + $0x218] sm:$0xff] }
 0x10f   :  { %1244 = vmatpush.msra.mxu0 %v2502_v12  ;;  %1304 = vmatpush.msra.mxu3 %v2504_v13  ;;  %3014 = vst [vmem:[#allocation47_spill] sm:$0xff] %v2621_v44 }
 0x110   :  { %1263 = vmatpush.msra.mxu1 %v2606_v0  ;;  %v2628_v0 = vld [vmem:[#allocation10 + $0x1b0] sm:$0xff] }
 0x111   :  { %1245 = vmatpush.msra.mxu0 %v2510_v17  ;;  %1305 = vmatpush.msra.mxu3 %v2512_v18  ;;  %3016 = vst [vmem:[#allocation49_spill] sm:$0xff] %v2628_v0 }
 0x112   :  { %1264 = vmatpush.msra.mxu1 %v2615_v22  ;;  %v1230_v22 = vld [vmem:[#allocation10 + $0x468] sm:$0xff] }
 0x113   :  { %1246 = vmatpush.msra.mxu0 %v2519_v49  ;;  %1306 = vmatpush.msra.mxu3 %v2521_v20 }
 0x114   :  { %1265 = vmatpush.msra.mxu1 %v2619_v47  ;;  %1273 = vmatpush.msra.mxu2 %v1230_v22  ;;  %v2646_v47 = vld [vmem:[#allocation10 + $0x180] sm:$0xff] }
 0x115   :  { %1247 = vmatpush.msra.mxu0 %v2528_v23  ;;  %1307 = vmatpush.msra.mxu3 %v2530_v54  ;;  %3022 = vst [vmem:[#allocation55_spill] sm:$0xff] %v2646_v47 }
 0x116   :  { %1266 = vmatpush.msra.mxu1 %v2628_v0  ;;  %v2657_v0 = vld [vmem:[#allocation10 + $0x1c0] sm:$0xff] }
 0x117   :  { %1248 = vmatpush.msra.mxu0 %v2535_v55  ;;  %1308 = vmatpush.msra.mxu3 %v2537_v24  ;;  %3026 = vst [vmem:[#allocation59_spill] sm:$0xff] %v2657_v0 }
 0x118   :  { %1249 = vmatmul.f32.vlgmr.msra.gmra.mxu0 %v2543_v60  ;;  %1309 = vmatmul.f32.vlgmr.msra.gmra.mxu3 %v2543_v60 }
 0x119   :  { %1313 = vmatpush.msrb.mxu0 %v2545_v26  ;;  %1373 = vmatpush.msrb.mxu3 %v2547_v27 }
 0x11b   :  { %1314 = vmatpush.msrb.mxu0 %v2556_v29  ;;  %1374 = vmatpush.msrb.mxu3 %v2558_v30 }
 0x11d   :  { %1315 = vmatpush.msrb.mxu0 %v2564_v5  ;;  %1375 = vmatpush.msrb.mxu3 %v2566_v32 }
 0x11f   :  { %1316 = vmatpush.msrb.mxu0 %v2571_v33  ;;  %1376 = vmatpush.msrb.mxu3 %v2573_v34 }
 0x121   :  { %1317 = vmatpush.msrb.mxu0 %v2578_v35  ;;  %1377 = vmatpush.msrb.mxu3 %v2580_v36  ;;  %v2650_v36 = vld [vmem:[#allocation10 + $0x1d8] sm:$0xff] }
 0x122   :  { %3024 = vst [vmem:[#allocation57_spill] sm:$0xff] %v2650_v36 }
 0x123   :  { %1318 = vmatpush.msrb.mxu0 %v2584_v37  ;;  %1378 = vmatpush.msrb.mxu3 %v2586_v38 }
 0x125   :  { %1319 = vmatpush.msrb.mxu0 %v2592_v41  ;;  %1379 = vmatpush.msrb.mxu3 %v2594_v43  ;;  %v1227_v41 = vld [vmem:[#allocation10 + $0x450] sm:$0xff] }
 0x126   :  { %1274 = vmatpush.msra.mxu2 %v1227_v41 }
 0x127   :  { %1320 = vmatpush.msrb.mxu0 %v2601_v53  ;;  %1380 = vmatpush.msrb.mxu3 %v2603_v58  ;;  %v2632_v53 = vld [vmem:[#allocation10 + $0x208] sm:$0xff]  ;;  %v2637_v58 = vld [vmem:[#allocation10 + $0x198] sm:$0xff] }
 0x128   :  { %3018 = vst [vmem:[#allocation51_spill] sm:$0xff] %v2632_v53  ;;  %1267 = vmatpush.msra.mxu1 %v2637_v58 }
 0x129   :  { %v764_v43 = vpop.f32.mrf.mxu0  ;;  %1321 = vmatpush.msrb.mxu0 %v2610_v7  ;;  %1381 = vmatpush.msrb.mxu3 %v2612_v15  ;;  %3019 = vst [vmem:[#allocation52_spill] sm:$0xff] %v2637_v58  ;;  %v2641_v15 = vld [vmem:[#allocation10 + $0x1f0] sm:$0xff]  ;;  %v1218_v58 = vld [vmem:[#allocation10 + $0x408] sm:$0xff] }
 0x12a   :  { %3021 = vst [vmem:[#allocation54_spill] sm:$0xff] %v2641_v15  ;;  %1268 = vmatpush.msra.mxu1 %v2646_v47  ;;  %v2668_v47 = vld [vmem:[#allocation10 + $0x188] sm:$0xff] }
 0x12b   :  { %1322 = vmatpush.msrb.mxu0 %v2621_v44  ;;  %1382 = vmatpush.msrb.mxu3 %v2623_v39  ;;  %v1224_v39 = vld [vmem:[#allocation10 + $0x438] sm:$0xff]  ;;  %v2648_v44 = vld [vmem:[#allocation10 + $0x1d0] sm:$0xff]  ;;  %3029 = vst [vmem:[#allocation62_spill] sm:$0xff] %v2668_v47 }
 0x12c   :  { %v784_v38 = vpop.f32.mrf.mxu1  ;;  %v804_v7 = vpop.f32.mrf.mxu2  ;;  %3023 = vst [vmem:[#allocation56_spill] sm:$0xff] %v2648_v44  ;;  %1275 = vmatpush.msra.mxu2 %v1224_v39 }
 0x12d   :  { %v785_v37 = vadd.f32 %v784_v38, %v764_v43  ;;  %1323 = vmatpush.msrb.mxu0 %v2630_v31  ;;  %1383 = vmatpush.msrb.mxu3 %v2632_v53  ;;  %v1221_v38 = vld [vmem:[#allocation10 + $0x420] sm:$0xff]  ;;  %v2655_v43 = vld [vmem:[#allocation10 + $0x1b8] sm:$0xff] }
 0x12e   :  { %3025 = vst [vmem:[#allocation58_spill] sm:$0xff] %v2655_v43  ;;  %1276 = vmatpush.msra.mxu2 %v1221_v38 }
 0x12f   :  { %v805_v25 = vadd.f32 %v804_v7, %v785_v37  ;;  %v824_v35 = vpop.f32.mrf.mxu3  ;;  %1324 = vmatpush.msrb.mxu0 %v2639_v28  ;;  %1384 = vmatpush.msrb.mxu3 %v2641_v15  ;;  %v2662_v37 = vld [vmem:[#allocation10 + $0x1a0] sm:$0xff]  ;;  %v2664_v7 = vld [vmem:[#allocation10 + $0x1a8] sm:$0xff]  ;;  %v1215_v28 = vld [vmem:[#allocation10 + $0x3f0] sm:$0xff] }
 0x130   :  { %3027 = vst [vmem:[#allocation60_spill] sm:$0xff] %v2662_v37  ;;  %1277 = vmatpush.msra.mxu2 %v1218_v58 }
 0x131   :  { %v825_v53 = vadd.f32 %v824_v35, %v805_v25  ;;  %1325 = vmatpush.msrb.mxu0 %v2648_v44  ;;  %1385 = vmatpush.msrb.mxu3 %v2650_v36  ;;  %3028 = vst [vmem:[#allocation61_spill] sm:$0xff] %v2664_v7  ;;  %v2670_v25 = vld [vmem:[#allocation10 + $0x190] sm:$0xff]  ;;  %v1212_v35 = vld [vmem:[#allocation10 + $0x3d8] sm:$0xff] }
 0x132   :  { %3030 = vst [vmem:[#allocation63_spill] sm:$0xff] %v2670_v25  ;;  %1278 = vmatpush.msra.mxu2 %v1215_v28 }
 0x133   :  { %v844_v15 = vpop.f32.mrf.mxu0  ;;  %1326 = vmatpush.msrb.mxu0 %v2655_v43  ;;  %1386 = vmatpush.msrb.mxu3 %v2657_v0  ;;  %v1209_v0 = vld [vmem:[#allocation10 + $0x3c0] sm:$0xff]  ;;  %v1206_v43 = vld [vmem:[#allocation10 + $0x3a8] sm:$0xff] }
 0x134   :  { %v845_v31 = vadd.f32 %v844_v15, %v825_v53  ;;  %1279 = vmatpush.msra.mxu2 %v1212_v35 }
 0x135   :  { %1327 = vmatpush.msrb.mxu0 %v2662_v37  ;;  %1387 = vmatpush.msrb.mxu3 %v2664_v7  ;;  %v1203_v7 = vld [vmem:[#allocation10 + $0x390] sm:$0xff] }
 0x136   :  { %v864_v36 = vpop.f32.mrf.mxu1  ;;  %v884_v44 = vpop.f32.mrf.mxu2  ;;  %1280 = vmatpush.msra.mxu2 %v1209_v0 }
 0x137   :  { %v865_v34 = vadd.f32 %v864_v36, %v845_v31  ;;  %1328 = vmatpush.msrb.mxu0 %v2668_v47  ;;  %1388 = vmatpush.msrb.mxu3 %v2670_v25  ;;  %v1200_v36 = vld [vmem:[#allocation10 + $0x378] sm:$0xff] }
 0x138   :  { %1281 = vmatpush.msra.mxu2 %v1206_v43 }
 0x139   :  { %1486 = vmatpush.msra.mxu3 %v1230_v22  ;;  %v885_v53 = vadd.f32 %v884_v44, %v865_v34  ;;  %v904_v15 = vpop.f32.mrf.mxu3 }
 0x13a   :  { %1282 = vmatpush.msra.mxu2 %v1203_v7 }
 0x13b   :  { %1487 = vmatpush.msra.mxu3 %v1227_v41  ;;  %v2676_v37 = vadd.f32 %v904_v15, %v885_v53  ;;  %v2680_v53 = vld [vmem:[#allocation10 + $0x470] sm:$0xff]  ;;  %v2682_v15 = vld [vmem:[#allocation10 + $0x478] sm:$0xff] }
 0x13c   :  { %1283 = vmatpush.msra.mxu2 %v1200_v36  ;;  %3032 = vst [vmem:[#allocation65_spill] sm:$0xff] %v2682_v15  ;;  %1333 = vmatpush.msrb.mxu1 %v2680_v53 }
 0x13d   :  { %3031 = vst [vmem:[#allocation64_spill] sm:$0xff] %v2676_v37  ;;  %1488 = vmatpush.msra.mxu3 %v1224_v39  ;;  %v1075_v31 = vsel %vm1067_vm0, %v2676_v37, 0.0  ;;  %v1197_v39 = vld [vmem:[#allocation10 + $0x360] sm:$0xff]  ;;  %1393 = vmatpush.msra.mxu0 %v2682_v15  ;;  %v1118_v37 = vld [vmem:[#allocation10 + $0xe8] sm:$0xff] }
 0x13e   :  { %v1076_v47 = vrot.slane %v1075_v31, 4  ;;  %1284 = vmatpush.msra.mxu2 %v1197_v39  ;;  %v1121_v15 = vld [vmem:[#allocation10 + $0x100] sm:$0xff] }
 0x13f   :  { %1489 = vmatpush.msra.mxu3 %v1221_v38  ;;  %v2692_v38 = vld [vmem:[#allocation10 + $0x440] sm:$0xff] }
 0x140   :  { %v1077_v25 = vadd.f32 %v1076_v47, %v1075_v31  ;;  %v1194_v47 = vld [vmem:[#allocation10 + $0x348] sm:$0xff]  ;;  %v1185_v31 = vld [vmem:[#allocation10 + $0x300] sm:$0xff] }
 0x141   :  { %1490 = vmatpush.msra.mxu3 %v1218_v58  ;;  %v2688_v58 = vld [vmem:[#allocation10 + $0x460] sm:$0xff]  ;;  %1285 = vmatpush.msra.mxu2 %v1194_v47 }
 0x142   :  { %v1078_v34 = vrot.slane %v1077_v25, 2  ;;  %3033 = vst [vmem:[#allocation66_spill] sm:$0xff] %v2688_v58  ;;  %1394 = vmatpush.msra.mxu0 %v2688_v58  ;;  %v2728_v58 = vld [vmem:[#allocation10 + $0x3b0] sm:$0xff] }
 0x143   :  { %1491 = vmatpush.msra.mxu3 %v1215_v28  ;;  %v2686_v28 = vld [vmem:[#allocation10 + $0x458] sm:$0xff]  ;;  %3043 = vst [vmem:[#allocation76_spill] sm:$0xff] %v2728_v58 }
 0x144   :  { %v1079_v44 = vadd.f32 %v1078_v34, %v1077_v25  ;;  %1334 = vmatpush.msrb.mxu1 %v2686_v28  ;;  %v2698_v25 = vld [vmem:[#allocation10 + $0x428] sm:$0xff]  ;;  %v1136_v34 = vld [vmem:[#allocation10 + $0x178] sm:$0xff] }
 0x145   :  { %1492 = vmatpush.msra.mxu3 %v1212_v35  ;;  %v2700_v35 = vld [vmem:[#allocation10 + $0x430] sm:$0xff] }
 0x146   :  { %v1080_v41 = vrot.slane %v1079_v44, 1  ;;  %1335 = vmatpush.msrb.mxu1 %v2692_v38  ;;  %3035 = vst [vmem:[#allocation68_spill] sm:$0xff] %v2700_v35 }
 0x147   :  { %1493 = vmatpush.msra.mxu3 %v1209_v0  ;;  %v1191_v0 = vld [vmem:[#allocation10 + $0x330] sm:$0xff] }
 0x148   :  { %v1081_v22 = vadd.f32 %v1080_v41, %v1079_v44  ;;  %1286 = vmatpush.msra.mxu2 %v1191_v0  ;;  %1336 = vmatpush.msrb.mxu1 %v2698_v25  ;;  %v2707_v44 = vld [vmem:[#allocation10 + $0x418] sm:$0xff] }
 0x149   :  { %1494 = vmatpush.msra.mxu3 %v1206_v43  ;;  %v2694_v43 = vld [vmem:[#allocation10 + $0x448] sm:$0xff]  ;;  %3036 = vst [vmem:[#allocation69_spill] sm:$0xff] %v2707_v44  ;;  %v2710_v41 = vld [vmem:[#allocation10 + $0x3f8] sm:$0xff] }
 0x14a   :  { %1269 = vmatmul.f32.vlgmr.msra.gmra.mxu1 %v1081_v22  ;;  %1329 = vmatmul.f32.vlgmr.msrb.gmra.mxu0 %v1081_v22  ;;  %3034 = vst [vmem:[#allocation67_spill] sm:$0xff] %v2694_v43 }
 0x14b   :  { %1389 = vmatmul.f32.vlgmr.msrb.gmra.mxu3 %v1081_v22  ;;  %1395 = vmatpush.msra.mxu0 %v2694_v43  ;;  %3037 = vst [vmem:[#allocation70_spill] sm:$0xff] %v2710_v41  ;;  %v1133_v22 = vld [vmem:[#allocation10 + $0x160] sm:$0xff]  ;;  %v1127_v43 = vld [vmem:[#allocation10 + $0x130] sm:$0xff] }
 0x14c   :  { %1495 = vmatpush.msra.mxu3 %v1203_v7  ;;  %v1188_v7 = vld [vmem:[#allocation10 + $0x318] sm:$0xff] }
 0x14d   :  { %1287 = vmatpush.msra.mxu2 %v1188_v7  ;;  %1396 = vmatpush.msra.mxu0 %v2700_v35  ;;  %v2717_v35 = vld [vmem:[#allocation10 + $0x3e8] sm:$0xff] }
 0x14e   :  { %1496 = vmatpush.msra.mxu3 %v1200_v36  ;;  %v2704_v36 = vld [vmem:[#allocation10 + $0x410] sm:$0xff]  ;;  %3040 = vst [vmem:[#allocation73_spill] sm:$0xff] %v2717_v35 }
 0x14f   :  { %1288 = vmatpush.msra.mxu2 %v1185_v31  ;;  %1337 = vmatpush.msrb.mxu1 %v2704_v36 }
 0x150   :  { %1497 = vmatpush.msra.mxu3 %v1197_v39  ;;  %1397 = vmatpush.msra.mxu0 %v2707_v44  ;;  %v2712_v39 = vld [vmem:[#allocation10 + $0x400] sm:$0xff]  ;;  %v2722_v44 = vld [vmem:[#allocation10 + $0x3c8] sm:$0xff] }
 0x151   :  { %1353 = vmatpush.msrb.mxu2 %v1136_v34  ;;  %3038 = vst [vmem:[#allocation71_spill] sm:$0xff] %v2712_v39  ;;  %1338 = vmatpush.msrb.mxu1 %v2710_v41  ;;  %v1097_v41 = vld [vmem:[#allocation10 + $0x40] sm:$0xff] }
 0x152   :  { %1498 = vmatpush.msra.mxu3 %v1194_v47  ;;  %v2715_v47 = vld [vmem:[#allocation10 + $0x3e0] sm:$0xff]  ;;  %1398 = vmatpush.msra.mxu0 %v2712_v39  ;;  %3041 = vst [vmem:[#allocation74_spill] sm:$0xff] %v2722_v44  ;;  %v1124_v39 = vld [vmem:[#allocation10 + $0x118] sm:$0xff] }
 0x153   :  { %1354 = vmatpush.msrb.mxu2 %v1133_v22  ;;  %3039 = vst [vmem:[#allocation72_spill] sm:$0xff] %v2715_v47  ;;  %1339 = vmatpush.msrb.mxu1 %v2715_v47  ;;  %v2771_v47 = vld [vmem:[#allocation10 + $0x310] sm:$0xff] }
 0x154   :  { %1499 = vmatpush.msra.mxu3 %v1191_v0  ;;  %v1130_v0 = vld [vmem:[#allocation10 + $0x148] sm:$0xff]  ;;  %1399 = vmatpush.msra.mxu0 %v2717_v35  ;;  %v2734_v35 = vld [vmem:[#allocation10 + $0x398] sm:$0xff]  ;;  %3057 = vst [vmem:[#allocation90_spill] sm:$0xff] %v2771_v47 }
 0x155   :  { %1355 = vmatpush.msrb.mxu2 %v1130_v0  ;;  %1340 = vmatpush.msrb.mxu1 %v2722_v44  ;;  %3045 = vst [vmem:[#allocation78_spill] sm:$0xff] %v2734_v35  ;;  %v2765_v44 = vld [vmem:[#allocation10 + $0x328] sm:$0xff] }
 0x156   :  { %1500 = vmatpush.msra.mxu3 %v1188_v7  ;;  %v2724_v7 = vld [vmem:[#allocation10 + $0x3d0] sm:$0xff]  ;;  %3056 = vst [vmem:[#allocation89_spill] sm:$0xff] %v2765_v44 }
 0x157   :  { %3042 = vst [vmem:[#allocation75_spill] sm:$0xff] %v2724_v7  ;;  %1356 = vmatpush.msrb.mxu2 %v1127_v43  ;;  %1400 = vmatpush.msra.mxu0 %v2724_v7  ;;  %v2740_v7 = vld [vmem:[#allocation10 + $0x380] sm:$0xff] }
 0x158   :  { %1501 = vmatpush.msra.mxu3 %v1185_v31  ;;  %v2730_v31 = vld [vmem:[#allocation10 + $0x3b8] sm:$0xff]  ;;  %1341 = vmatpush.msrb.mxu1 %v2728_v58  ;;  %3047 = vst [vmem:[#allocation80_spill] sm:$0xff] %v2740_v7  ;;  %v1115_v58 = vld [vmem:[#allocation10 + $0xd0] sm:$0xff] }
 0x159   :  { %3044 = vst [vmem:[#allocation77_spill] sm:$0xff] %v2730_v31  ;;  %1357 = vmatpush.msrb.mxu2 %v1124_v39  ;;  %1401 = vmatpush.msra.mxu0 %v2730_v31  ;;  %v2746_v31 = vld [vmem:[#allocation10 + $0x368] sm:$0xff] }
 0x15a   :  { %1566 = vmatpush.msrb.mxu3 %v1136_v34  ;;  %v2736_v34 = vld [vmem:[#allocation10 + $0x3a0] sm:$0xff]  ;;  %1342 = vmatpush.msrb.mxu1 %v2734_v35  ;;  %3049 = vst [vmem:[#allocation82_spill] sm:$0xff] %v2746_v31  ;;  %v1112_v35 = vld [vmem:[#allocation10 + $0xb8] sm:$0xff] }
 0x15b   :  { %3046 = vst [vmem:[#allocation79_spill] sm:$0xff] %v2736_v34  ;;  %1358 = vmatpush.msrb.mxu2 %v1121_v15  ;;  %1402 = vmatpush.msra.mxu0 %v2736_v34  ;;  %v2752_v34 = vld [vmem:[#allocation10 + $0x350] sm:$0xff] }
 0x15c   :  { %1567 = vmatpush.msrb.mxu3 %v1133_v22  ;;  %v2742_v22 = vld [vmem:[#allocation10 + $0x388] sm:$0xff]  ;;  %1343 = vmatpush.msrb.mxu1 %v2740_v7  ;;  %3051 = vst [vmem:[#allocation84_spill] sm:$0xff] %v2752_v34  ;;  %v1109_v7 = vld [vmem:[#allocation10 + $0xa0] sm:$0xff] }
 0x15d   :  { %3048 = vst [vmem:[#allocation81_spill] sm:$0xff] %v2742_v22  ;;  %1359 = vmatpush.msrb.mxu2 %v1118_v37  ;;  %1403 = vmatpush.msra.mxu0 %v2742_v22  ;;  %v2758_v22 = vld [vmem:[#allocation10 + $0x338] sm:$0xff] }
 0x15e   :  { %1568 = vmatpush.msrb.mxu3 %v1130_v0  ;;  %v2748_v0 = vld [vmem:[#allocation10 + $0x370] sm:$0xff]  ;;  %1344 = vmatpush.msrb.mxu1 %v2746_v31  ;;  %3053 = vst [vmem:[#allocation86_spill] sm:$0xff] %v2758_v22  ;;  %v1106_v31 = vld [vmem:[#allocation10 + $0x88] sm:$0xff] }
 0x15f   :  { %3050 = vst [vmem:[#allocation83_spill] sm:$0xff] %v2748_v0  ;;  %1360 = vmatpush.msrb.mxu2 %v1115_v58  ;;  %1404 = vmatpush.msra.mxu0 %v2748_v0  ;;  %v2763_v0 = vld [vmem:[#allocation10 + $0x320] sm:$0xff] }
 0x160   :  { %1569 = vmatpush.msrb.mxu3 %v1127_v43  ;;  %v2754_v43 = vld [vmem:[#allocation10 + $0x358] sm:$0xff]  ;;  %1345 = vmatpush.msrb.mxu1 %v2752_v34  ;;  %3055 = vst [vmem:[#allocation88_spill] sm:$0xff] %v2763_v0  ;;  %v1103_v34 = vld [vmem:[#allocation10 + $0x70] sm:$0xff] }
 0x161   :  { %3052 = vst [vmem:[#allocation85_spill] sm:$0xff] %v2754_v43  ;;  %1361 = vmatpush.msrb.mxu2 %v1112_v35  ;;  %1405 = vmatpush.msra.mxu0 %v2754_v43 }
 0x162   :  { %1570 = vmatpush.msrb.mxu3 %v1124_v39  ;;  %v2760_v39 = vld [vmem:[#allocation10 + $0x340] sm:$0xff]  ;;  %1346 = vmatpush.msrb.mxu1 %v2758_v22 }
 0x163   :  { %3054 = vst [vmem:[#allocation87_spill] sm:$0xff] %v2760_v39  ;;  %1362 = vmatpush.msrb.mxu2 %v1109_v7  ;;  %1406 = vmatpush.msra.mxu0 %v2760_v39  ;;  %v1100_v39 = vld [vmem:[#allocation10 + $0x58] sm:$0xff] }
 0x164   :  { %1571 = vmatpush.msrb.mxu3 %v1121_v15  ;;  %v2768_v15 = vld [vmem:[#allocation10 + $0x308] sm:$0xff]  ;;  %1347 = vmatpush.msrb.mxu1 %v2763_v0 }
 0x165   :  { %1363 = vmatpush.msrb.mxu2 %v1106_v31  ;;  %1407 = vmatpush.msra.mxu0 %v2765_v44  ;;  %v1094_v0 = vld [vmem:[#allocation10 + $0x28] sm:$0xff] }
 0x166   :  { %1572 = vmatpush.msrb.mxu3 %v1118_v37  ;;  %1348 = vmatpush.msrb.mxu1 %v2768_v15 }
 0x167   :  { %1364 = vmatpush.msrb.mxu2 %v1103_v34  ;;  %1408 = vmatpush.msra.mxu0 %v2771_v47 }
 0x168   :  { %1573 = vmatpush.msrb.mxu3 %v1115_v58  ;;  %1446 = vmatpush.msra.mxu1 %v2428_v10 }
 0x169   :  { %1365 = vmatpush.msrb.mxu2 %v1100_v39  ;;  %1506 = vmatpush.msrb.mxu0 %v2430_v11 }
 0x16a   :  { %1574 = vmatpush.msrb.mxu3 %v1112_v35  ;;  %1447 = vmatpush.msra.mxu1 %v2433_v40 }
 0x16b   :  { %v924_v43 = vpop.f32.mrf.mxu0  ;;  %1366 = vmatpush.msrb.mxu2 %v1097_v41  ;;  %1507 = vmatpush.msrb.mxu0 %v2435_v16 }
 0x16c   :  { %1575 = vmatpush.msrb.mxu3 %v1109_v7  ;;  %1448 = vmatpush.msra.mxu1 %v2440_v45  ;;  %v3091_v7 = vld [vmem:[#allocation61_spill] sm:$0xff] }
 0x16d   :  { %1367 = vmatpush.msrb.mxu2 %v1094_v0  ;;  %1508 = vmatpush.msrb.mxu0 %v2442_v46 }
 0x16e   :  { %v944_v37 = vpop.f32.mrf.mxu1  ;;  %v964_v22 = vpop.f32.mrf.mxu2  ;;  %1576 = vmatpush.msrb.mxu3 %v1106_v31  ;;  %1449 = vmatpush.msra.mxu1 %v2448_v48  ;;  %v3092_v31 = vld [vmem:[#allocation62_spill] sm:$0xff] }
 0x16f   :  { %v945_v58 = vadd.f32 %v944_v37, %v924_v43  ;;  %v1091_v43 = vld [vmem:[#allocation10 + $0x10] sm:$0xff]  ;;  %1509 = vmatpush.msrb.mxu0 %v2450_v50 }
 0x170   :  { %1577 = vmatpush.msrb.mxu3 %v1103_v34  ;;  %1368 = vmatpush.msrb.mxu2 %v1091_v43  ;;  %v3093_v34 = vld [vmem:[#allocation63_spill] sm:$0xff]  ;;  %v3097_v37 = vld [vmem:[#allocation76_spill] sm:$0xff] }
 0x171   :  { %v965_v35 = vadd.f32 %v964_v22, %v945_v58  ;;  %v984_v44 = vpop.f32.mrf.mxu3  ;;  %1450 = vmatpush.msra.mxu1 %v2455_v51  ;;  %1510 = vmatpush.msrb.mxu0 %v2457_v52  ;;  %v3094_v22 = vld [vmem:[#allocation70_spill] sm:$0xff]  ;;  %v3099_v58 = vld [vmem:[#allocation80_spill] sm:$0xff] }
 0x172   :  { %1578 = vmatpush.msrb.mxu3 %v1100_v39  ;;  %v3096_v39 = vld [vmem:[#allocation74_spill] sm:$0xff] }
 0x173   :  { %v985_v47 = vadd.f32 %v984_v44, %v965_v35  ;;  %1451 = vmatpush.msra.mxu1 %v2463_v56  ;;  %1511 = vmatpush.msrb.mxu0 %v2465_v57  ;;  %v3088_v44 = vld [vmem:[#allocation59_spill] sm:$0xff]  ;;  %v3100_v35 = vld [vmem:[#allocation82_spill] sm:$0xff] }
 0x174   :  { %v1004_v10 = vpop.f32.mrf.mxu0  ;;  %1579 = vmatpush.msrb.mxu3 %v1097_v41  ;;  %v3089_v41 = vld [vmem:[#allocation60_spill] sm:$0xff] }
 0x175   :  { %v1005_v11 = vadd.f32 %v1004_v10, %v985_v47  ;;  %1452 = vmatpush.msra.mxu1 %v2469_v59  ;;  %1512 = vmatpush.msrb.mxu0 %v2471_v61  ;;  %v3090_v47 = vld [vmem:[#allocation55_spill] sm:$0xff] }
 0x176   :  { %1580 = vmatpush.msrb.mxu3 %v1094_v0  ;;  %v3095_v0 = vld [vmem:[#allocation72_spill] sm:$0xff] }
 0x177   :  { %v1024_v40 = vpop.f32.mrf.mxu1  ;;  %1453 = vmatpush.msra.mxu1 %v2475_v62  ;;  %1513 = vmatpush.msrb.mxu0 %v2477_v63  ;;  %v3059_v63 = vld [vmem:[#allocation32_spill] sm:$0xff] }
 0x178   :  { %v1025_v16 = vadd.f32 %v1024_v40, %v1005_v11  ;;  %1581 = vmatpush.msrb.mxu3 %v1091_v43 }
 0x179   :  { %1454 = vmatpush.msra.mxu1 %v2481_v1  ;;  %1514 = vmatpush.msrb.mxu0 %v2483_v2  ;;  %v3060_v1 = vld [vmem:[#allocation28_spill] sm:$0xff]  ;;  %v3061_v2 = vld [vmem:[#allocation33_spill] sm:$0xff] }
 0x17b   :  { %v1044_v45 = vpop.f32.mrf.mxu2  ;;  %1455 = vmatpush.msra.mxu1 %v2487_v3  ;;  %1515 = vmatpush.msrb.mxu0 %v2489_v4  ;;  %v3062_v3 = vld [vmem:[#allocation34_spill] sm:$0xff]  ;;  %v3063_v4 = vld [vmem:[#allocation29_spill] sm:$0xff] }
 0x17c   :  { %v1045_v46 = vadd.f32 %v1044_v45, %v1025_v16 }
 0x17d   :  { %v1064_v48 = vpop.f32.mrf.mxu3  ;;  %1456 = vmatpush.msra.mxu1 %v2495_v8  ;;  %1516 = vmatpush.msrb.mxu0 %v2497_v9  ;;  %v3065_v8 = vld [vmem:[#allocation37_spill] sm:$0xff]  ;;  %v3066_v9 = vld [vmem:[#allocation30_spill] sm:$0xff] }
 0x17e   :  { %v2792_v50 = vadd.f32 %v1064_v48, %v1045_v46 }
 0x17f   :  { %1457 = vmatpush.msra.mxu1 %v2502_v12  ;;  %1517 = vmatpush.msrb.mxu0 %v2504_v13  ;;  %v3067_v12 = vld [vmem:[#allocation38_spill] sm:$0xff]  ;;  %v3068_v13 = vld [vmem:[#allocation40_spill] sm:$0xff] }
 0x180   :  { %v1082_v51 = vsel %vm1067_vm0, %v2792_v50, 0.0 }
 0x181   :  { %v1083_v52 = vrot.slane %v1082_v51, 4  ;;  %1458 = vmatpush.msra.mxu1 %v2510_v17  ;;  %1518 = vmatpush.msrb.mxu0 %v2512_v18  ;;  %v3070_v17 = vld [vmem:[#allocation41_spill] sm:$0xff]  ;;  %v3071_v18 = vld [vmem:[#allocation43_spill] sm:$0xff] }
 0x183   :  { %v1084_v56 = vadd.f32 %v1083_v52, %v1082_v51  ;;  %1459 = vmatpush.msra.mxu1 %v2519_v49  ;;  %1519 = vmatpush.msrb.mxu0 %v2521_v20  ;;  %v3073_v49 = vld [vmem:[#allocation44_spill] sm:$0xff]  ;;  %v3074_v20 = vld [vmem:[#allocation47_spill] sm:$0xff] }
 0x185   :  { %v1085_v57 = vrot.slane %v1084_v56, 2  ;;  %1460 = vmatpush.msra.mxu1 %v2528_v23  ;;  %1520 = vmatpush.msrb.mxu0 %v2530_v54  ;;  %v3076_v23 = vld [vmem:[#allocation48_spill] sm:$0xff]  ;;  %v3077_v54 = vld [vmem:[#allocation50_spill] sm:$0xff] }
 0x187   :  { %v1086_v59 = vadd.f32 %v1085_v57, %v1084_v56  ;;  %1461 = vmatpush.msra.mxu1 %v2535_v55  ;;  %1521 = vmatpush.msrb.mxu0 %v2537_v24  ;;  %v3078_v55 = vld [vmem:[#allocation45_spill] sm:$0xff]  ;;  %v3079_v24 = vld [vmem:[#allocation51_spill] sm:$0xff]  ;;  %v3104_v56 = vld [vmem:[#allocation64_spill] sm:$0xff] }
 0x189   :  { %v1087_v61 = vrot.slane %v1086_v59, 1 }
 0x18b   :  { %v1088_v62 = vadd.f32 %v1087_v61, %v1086_v59 }
 0x18d   :  { %1289 = vmatmul.f32.vlgmr.msra.gmra.mxu2 %v1088_v62  ;;  %1349 = vmatmul.f32.vlgmr.msrb.gmra.mxu1 %v1088_v62 }
 0x18e   :  { %1409 = vmatmul.f32.vlgmr.msra.gmra.mxu0 %v1088_v62  ;;  %1466 = vmatpush.msra.mxu2 %v2438_v42  ;;  %v3058_v42 = vld [vmem:[#allocation31_spill] sm:$0xff] }
 0x18f   :  { %1526 = vmatpush.msrb.mxu1 %v2545_v26  ;;  %1586 = vmatpush.msra.mxu0 %v2547_v27  ;;  %v3081_v26 = vld [vmem:[#allocation46_spill] sm:$0xff] }
 0x190   :  { %1467 = vmatpush.msra.mxu2 %v2493_v6  ;;  %v3064_v6 = vld [vmem:[#allocation35_spill] sm:$0xff]  ;;  %v3082_v27 = vld [vmem:[#allocation54_spill] sm:$0xff] }
 0x191   :  { %1527 = vmatpush.msrb.mxu1 %v2556_v29  ;;  %1587 = vmatpush.msra.mxu0 %v2558_v30  ;;  %v3083_v29 = vld [vmem:[#allocation56_spill] sm:$0xff]  ;;  %v3084_v30 = vld [vmem:[#allocation49_spill] sm:$0xff] }
 0x192   :  { %1468 = vmatpush.msra.mxu2 %v2508_v14  ;;  %v3069_v14 = vld [vmem:[#allocation36_spill] sm:$0xff] }
 0x193   :  { %1528 = vmatpush.msrb.mxu1 %v2564_v5  ;;  %1588 = vmatpush.msra.mxu0 %v2566_v32  ;;  %v3085_v5 = vld [vmem:[#allocation57_spill] sm:$0xff]  ;;  %v3086_v32 = vld [vmem:[#allocation58_spill] sm:$0xff] }
 0x194   :  { %1469 = vmatpush.msra.mxu2 %v2517_v19  ;;  %v3072_v19 = vld [vmem:[#allocation39_spill] sm:$0xff] }
 0x195   :  { %1369 = vmatmul.f32.vlgmr.msrb.gmra.mxu2 %v2543_v60  ;;  %1529 = vmatpush.msrb.mxu1 %v2571_v33  ;;  %v3080_v60 = vld [vmem:[#allocation53_spill] sm:$0xff]  ;;  %v3087_v33 = vld [vmem:[#allocation52_spill] sm:$0xff] }
 0x196   :  { %1470 = vmatpush.msra.mxu2 %v2526_v21  ;;  %1589 = vmatpush.msra.mxu0 %v3058_v42  ;;  %v3075_v21 = vld [vmem:[#allocation42_spill] sm:$0xff] }
 0x197   :  { %1530 = vmatpush.msrb.mxu1 %v3059_v63 }
 0x198   :  { %1471 = vmatpush.msra.mxu2 %v3060_v1  ;;  %1590 = vmatpush.msra.mxu0 %v3061_v2  ;;  %v3105_v1 = vld [vmem:[#allocation27_spill] sm:$0xff] }
 0x199   :  { %1531 = vmatpush.msrb.mxu1 %v3062_v3 }
 0x19a   :  { %1472 = vmatpush.msra.mxu2 %v3063_v4  ;;  %1591 = vmatpush.msra.mxu0 %v3064_v6 }
 0x19b   :  { %1532 = vmatpush.msrb.mxu1 %v3065_v8  ;;  %v1310_v11 = vpop.f32.mrf.mxu3 }
 0x19c   :  { %1473 = vmatpush.msra.mxu2 %v3066_v9  ;;  %1592 = vmatpush.msra.mxu0 %v3067_v12 }
 0x19d   :  { %1533 = vmatpush.msrb.mxu1 %v3068_v13 }
 0x19e   :  { %1474 = vmatpush.msra.mxu2 %v3069_v14  ;;  %1593 = vmatpush.msra.mxu0 %v3070_v17 }
 0x19f   :  { %1534 = vmatpush.msrb.mxu1 %v3071_v18 }
 0x1a0   :  { %1475 = vmatpush.msra.mxu2 %v3072_v19  ;;  %1594 = vmatpush.msra.mxu0 %v3073_v49 }
 0x1a1   :  { %1535 = vmatpush.msrb.mxu1 %v3074_v20 }
 0x1a2   :  { %1476 = vmatpush.msra.mxu2 %v3075_v21  ;;  %1595 = vmatpush.msra.mxu0 %v3076_v23 }
 0x1a3   :  { %1536 = vmatpush.msrb.mxu1 %v3077_v54 }
 0x1a4   :  { %1477 = vmatpush.msra.mxu2 %v3078_v55  ;;  %1596 = vmatpush.msra.mxu0 %v3079_v24 }
 0x1a5   :  { %1537 = vmatpush.msrb.mxu1 %v3080_v60 }
 0x1a6   :  { %1478 = vmatpush.msra.mxu2 %v3081_v26  ;;  %1597 = vmatpush.msra.mxu0 %v3082_v27 }
 0x1a7   :  { %1538 = vmatpush.msrb.mxu1 %v3083_v29 }
 0x1a8   :  { %1479 = vmatpush.msra.mxu2 %v3084_v30  ;;  %1598 = vmatpush.msra.mxu0 %v3085_v5 }
 0x1a9   :  { %1539 = vmatpush.msrb.mxu1 %v3086_v32 }
 0x1aa   :  { %1480 = vmatpush.msra.mxu2 %v3087_v33  ;;  %1599 = vmatpush.msra.mxu0 %v3088_v44  ;;  %v3106_v33 = vld [vmem:[#allocation65_spill] sm:$0xff] }
 0x1ab   :  { %1540 = vmatpush.msrb.mxu1 %v3089_v41  ;;  %v3107_v41 = vld [vmem:[#allocation66_spill] sm:$0xff] }
 0x1ac   :  { %1481 = vmatpush.msra.mxu2 %v3090_v47  ;;  %1600 = vmatpush.msra.mxu0 %v3091_v7  ;;  %v3108_v47 = vld [vmem:[#allocation67_spill] sm:$0xff] }
 0x1ad   :  { %1541 = vmatpush.msrb.mxu1 %v3092_v31  ;;  %v3109_v31 = vld [vmem:[#allocation68_spill] sm:$0xff] }
 0x1ae   :  { %1546 = vmatpush.msrb.mxu2 %v2680_v53  ;;  %1601 = vmatpush.msra.mxu0 %v3093_v34  ;;  %v3098_v53 = vld [vmem:[#allocation78_spill] sm:$0xff] }
 0x1b0   :  { %1547 = vmatpush.msrb.mxu2 %v2686_v28  ;;  %v3101_v28 = vld [vmem:[#allocation84_spill] sm:$0xff] }
 0x1b2   :  { %1548 = vmatpush.msrb.mxu2 %v2692_v38  ;;  %v3102_v38 = vld [vmem:[#allocation86_spill] sm:$0xff] }
 0x1b4   :  { %1549 = vmatpush.msrb.mxu2 %v2698_v25  ;;  %v3103_v25 = vld [vmem:[#allocation88_spill] sm:$0xff] }
 0x1b6   :  { %1550 = vmatpush.msrb.mxu2 %v2704_v36  ;;  %v1250_v36 = vpop.f32.mrf.mxu0 }
 0x1b8   :  { %1551 = vmatpush.msrb.mxu2 %v3094_v22  ;;  %v3110_v22 = vld [vmem:[#allocation69_spill] sm:$0xff] }
 0x1ba   :  { %1552 = vmatpush.msrb.mxu2 %v3095_v0  ;;  %v3111_v0 = vld [vmem:[#allocation71_spill] sm:$0xff] }
 0x1bc   :  { %1553 = vmatpush.msrb.mxu2 %v3096_v39  ;;  %v3112_v39 = vld [vmem:[#allocation73_spill] sm:$0xff] }
 0x1be   :  { %1554 = vmatpush.msrb.mxu2 %v3097_v37  ;;  %v3113_v37 = vld [vmem:[#allocation75_spill] sm:$0xff] }
 0x1c0   :  { %1555 = vmatpush.msrb.mxu2 %v3098_v53  ;;  %v3114_v53 = vld [vmem:[#allocation77_spill] sm:$0xff] }
 0x1c2   :  { %1556 = vmatpush.msrb.mxu2 %v3099_v58  ;;  %v3115_v58 = vld [vmem:[#allocation79_spill] sm:$0xff] }
 0x1c4   :  { %1557 = vmatpush.msrb.mxu2 %v3100_v35  ;;  %v3116_v35 = vld [vmem:[#allocation81_spill] sm:$0xff] }
 0x1c6   :  { %1558 = vmatpush.msrb.mxu2 %v3101_v28  ;;  %v3117_v28 = vld [vmem:[#allocation83_spill] sm:$0xff] }
 0x1c7   :  { %v1270_v10 = vpop.f32.mrf.mxu1  ;;  %v1330_v43 = vpop.f32.mrf.mxu0 }
 0x1c8   :  { %1559 = vmatpush.msrb.mxu2 %v3102_v38  ;;  %v1331_v40 = vadd.f32 %v1330_v43, %v1310_v11  ;;  %v1271_v48 = vadd.f32 %v1270_v10, %v1250_v36  ;;  %v3118_v38 = vld [vmem:[#allocation85_spill] sm:$0xff]  ;;  %v3121_v10 = vld [vmem:[#allocation90_spill] sm:$0xff] }
 0x1c9   :  { %v3120_v36 = vld [vmem:[#allocation89_spill] sm:$0xff] }
 0x1ca   :  { %1560 = vmatpush.msrb.mxu2 %v3103_v25  ;;  %v3119_v25 = vld [vmem:[#allocation87_spill] sm:$0xff]  ;;  %v1708_v43 = vld [vmem:[#allocation11 + $0x78] sm:$0xff] }
 0x1cb   :  { %v1724_v11 = vld [vmem:[#allocation11 + $0xf8] sm:$0xff] }
 0x1cc   :  { %1561 = vmatpush.msrb.mxu2 %v2768_v15 }
 0x1ce   :  { %v1390_v3 = vpop.f32.mrf.mxu3 }
 0x20a   :  { %v1350_v16 = vpop.f32.mrf.mxu1 }
 0x20b   :  { %v1351_v45 = vadd.f32 %v1350_v16, %v1331_v40  ;;  %v1410_v13 = vpop.f32.mrf.mxu0  ;;  %v1707_v40 = vld [vmem:[#allocation11 + $0x70] sm:$0xff] }
 0x20c   :  { %v1723_v16 = vld [vmem:[#allocation11 + $0xf0] sm:$0xff] }
 0x20d   :  { %v1414_v46 = vmul.f32 0.013888889, %v1351_v45  ;;  %v1706_v45 = vld [vmem:[#allocation11 + $0x68] sm:$0xff] }
 0x20f   :  { %v1417_v51 = vperm.slane %v1414_v46, 0  ;;  %v1722_v46 = vld [vmem:[#allocation11 + $0xe8] sm:$0xff] }
 0x210   :  { %v1290_v52 = vpop.f32.mrf.mxu2 }
 0x211   :  { %v2878_v57 = vsub.f32 %v3104_v56, %v1417_v51  ;;  %v1291_v59 = vadd.f32 %v1290_v52, %v1271_v48  ;;  %v1705_v48 = vld [vmem:[#allocation11 + $0x60] sm:$0xff]  ;;  %v1704_v52 = vld [vmem:[#allocation11 + $0x58] sm:$0xff] }
 0x212   :  { %v1721_v51 = vld [vmem:[#allocation11 + $0xe0] sm:$0xff]  ;;  %v1720_v56 = vld [vmem:[#allocation11 + $0xd8] sm:$0xff] }
 0x213   :  { %v1423_v61 = vmul.f32 %v2878_v57, %v2878_v57  ;;  %v1413_v62 = vmul.f32 0.013888889, %v1291_v59  ;;  %v1703_v59 = vld [vmem:[#allocation11 + $0x50] sm:$0xff] }
 0x215   :  { %v1432_v15 = vsel %vm1067_vm0, %v1423_v61, 0.0  ;;  %v1416_v42 = vperm.slane %v1413_v62, 0  ;;  %v1719_v61 = vld [vmem:[#allocation11 + $0xd0] sm:$0xff]  ;;  %v1702_v62 = vld [vmem:[#allocation11 + $0x48] sm:$0xff] }
 0x216   :  { %v1433_v63 = vrot.slane %v1432_v15, 4 }
 0x217   :  { %v2884_v2 = vsub.f32 %v3105_v1, %v1416_v42  ;;  %v1717_v1 = vld [vmem:[#allocation11 + $0xc0] sm:$0xff] }
 0x218   :  { %v1434_v4 = vadd.f32 %v1433_v63, %v1432_v15  ;;  %v1370_v6 = vpop.f32.mrf.mxu2  ;;  %v1718_v15 = vld [vmem:[#allocation11 + $0xc8] sm:$0xff]  ;;  %v1701_v63 = vld [vmem:[#allocation11 + $0x40] sm:$0xff] }
 0x219   :  { %v1422_v8 = vmul.f32 %v2884_v2, %v2884_v2  ;;  %v1391_v9 = vadd.f32 %v1390_v3, %v1370_v6  ;;  %v1740_v3 = vld [vmem:[#allocation11 + $0x178] sm:$0xff] }
 0x21a   :  { %v1435_v12 = vrot.slane %v1434_v4, 2  ;;  %v1716_v6 = vld [vmem:[#allocation11 + $0xb8] sm:$0xff] }
 0x21b   :  { %v1425_v14 = vsel %vm1067_vm0, %v1422_v8, 0.0  ;;  %v1411_v17 = vadd.f32 %v1410_v13, %v1391_v9  ;;  %v1739_v8 = vld [vmem:[#allocation11 + $0x170] sm:$0xff]  ;;  %v1738_v13 = vld [vmem:[#allocation11 + $0x168] sm:$0xff] }
 0x21c   :  { %v1426_v18 = vrot.slane %v1425_v14, 4  ;;  %v1436_v19 = vadd.f32 %v1435_v12, %v1434_v4  ;;  %v1700_v4 = vld [vmem:[#allocation11 + $0x38] sm:$0xff]  ;;  %v1699_v9 = vld [vmem:[#allocation11 + $0x30] sm:$0xff] }
 0x21d   :  { %v1415_v49 = vmul.f32 0.013888889, %v1411_v17  ;;  %v1715_v12 = vld [vmem:[#allocation11 + $0xb0] sm:$0xff]  ;;  %v1698_v17 = vld [vmem:[#allocation11 + $0x28] sm:$0xff] }
 0x21e   :  { %v1427_v20 = vadd.f32 %v1426_v18, %v1425_v14  ;;  %v1437_v21 = vrot.slane %v1436_v19, 1  ;;  %v1714_v18 = vld [vmem:[#allocation11 + $0xa8] sm:$0xff] }
 0x21f   :  { %v1418_v23 = vperm.slane %v1415_v49, 0  ;;  %v1697_v49 = vld [vmem:[#allocation11 + $0x20] sm:$0xff] }
 0x220   :  { %v1428_v54 = vrot.slane %v1427_v20, 2  ;;  %v1438_v55 = vadd.f32 %v1437_v21, %v1436_v19  ;;  %v1737_v19 = vld [vmem:[#allocation11 + $0x160] sm:$0xff]  ;;  %v1736_v21 = vld [vmem:[#allocation11 + $0x158] sm:$0xff] }
 0x221   :  { %v2890_v24 = vsub.f32 %v2792_v50, %v1418_v23 }
 0x222   :  { %1482 = vmatmul.f32.vlgmr.msra.gmra.mxu2 %v1438_v55  ;;  %v1429_v60 = vadd.f32 %v1428_v54, %v1427_v20  ;;  %v1713_v20 = vld [vmem:[#allocation11 + $0xa0] sm:$0xff]  ;;  %v1696_v54 = vld [vmem:[#allocation11 + $0x18] sm:$0xff] }
 0x223   :  { %v1424_v26 = vmul.f32 %v2890_v24, %v2890_v24  ;;  %1741 = vmatpush.msra.mxu2 %v1708_v43 }
 0x224   :  { %v1430_v27 = vrot.slane %v1429_v60, 1 }
 0x225   :  { %v1439_v29 = vsel %vm1067_vm0, %v1424_v26, 0.0  ;;  %1742 = vmatpush.msra.mxu2 %v1707_v40 }
 0x226   :  { %v1440_v30 = vrot.slane %v1439_v29, 4  ;;  %v1431_v5 = vadd.f32 %v1430_v27, %v1429_v60  ;;  %v1735_v60 = vld [vmem:[#allocation11 + $0x150] sm:$0xff] }
 0x227   :  { %1743 = vmatpush.msra.mxu2 %v1706_v45  ;;  %v1695_v27 = vld [vmem:[#allocation11 + $0x10] sm:$0xff] }
 0x228   :  { %v1441_v32 = vadd.f32 %v1440_v30, %v1439_v29  ;;  %1462 = vmatmul.f32.vlgmr.msra.gmra.mxu1 %v1431_v5  ;;  %1522 = vmatmul.f32.vlgmr.msrb.gmra.mxu0 %v1431_v5  ;;  %v1711_v29 = vld [vmem:[#allocation11 + $0x90] sm:$0xff] }
 0x229   :  { %1606 = vmatpush.msra.mxu1 %v3106_v33  ;;  %1744 = vmatpush.msra.mxu2 %v1705_v48 }
 0x22a   :  { %v1442_v44 = vrot.slane %v1441_v32, 2  ;;  %1781 = vmatpush.msrb.mxu0 %v1740_v3 }
 0x22b   :  { %1607 = vmatpush.msra.mxu1 %v3107_v41  ;;  %1745 = vmatpush.msra.mxu2 %v1704_v52  ;;  %v1694_v41 = vld [vmem:[#allocation11 + $0x8] sm:$0xff] }
 0x22c   :  { %v1443_v50 = vadd.f32 %v1442_v44, %v1441_v32  ;;  %1782 = vmatpush.msrb.mxu0 %v1739_v8  ;;  %v1734_v32 = vld [vmem:[#allocation11 + $0x148] sm:$0xff] }
 0x22d   :  { %1608 = vmatpush.msra.mxu1 %v3108_v47  ;;  %1746 = vmatpush.msra.mxu2 %v1703_v59 }
 0x22e   :  { %v1444_v7 = vrot.slane %v1443_v50, 1  ;;  %1783 = vmatpush.msrb.mxu0 %v1738_v13 }
 0x22f   :  { %1609 = vmatpush.msra.mxu1 %v3109_v31  ;;  %1747 = vmatpush.msra.mxu2 %v1702_v62  ;;  %v1733_v31 = vld [vmem:[#allocation11 + $0x140] sm:$0xff] }
 0x230   :  { %1542 = vmatmul.f32.vlgmr.msrb.gmra.mxu1 %v1438_v55  ;;  %1602 = vmatmul.f32.vlgmr.msra.gmra.mxu0 %v1438_v55  ;;  %v1445_v34 = vadd.f32 %v1444_v7, %v1443_v50  ;;  %v1712_v55 = vld [vmem:[#allocation11 + $0x98] sm:$0xff]  ;;  %v1710_v50 = vld [vmem:[#allocation11 + $0x88] sm:$0xff] }
 0x231   :  { %1610 = vmatpush.msra.mxu1 %v3110_v22  ;;  %1748 = vmatpush.msra.mxu2 %v1701_v63  ;;  %v1709_v22 = vld [vmem:[#allocation11 + $0x80] sm:$0xff] }
 0x232   :  { %1502 = vmatmul.f32.vlgmr.msra.gmra.mxu3 %v1445_v34  ;;  %1562 = vmatmul.f32.vlgmr.msrb.gmra.mxu2 %v1445_v34 }
 0x233   :  { %1611 = vmatpush.msra.mxu1 %v3111_v0  ;;  %1761 = vmatpush.msra.mxu3 %v1724_v11  ;;  %v1726_v11 = vld [vmem:[#allocation11 + $0x108] sm:$0xff] }
 0x234   :  { %1749 = vmatpush.msra.mxu2 %v1700_v4  ;;  %1784 = vmatpush.msrb.mxu0 %v1737_v19 }
 0x235   :  { %1612 = vmatpush.msra.mxu1 %v3112_v39  ;;  %1762 = vmatpush.msra.mxu3 %v1723_v16 }
 0x236   :  { %1750 = vmatpush.msra.mxu2 %v1699_v9  ;;  %1785 = vmatpush.msrb.mxu0 %v1736_v21 }
 0x237   :  { %1613 = vmatpush.msra.mxu1 %v3113_v37  ;;  %1763 = vmatpush.msra.mxu3 %v1722_v46  ;;  %v1732_v37 = vld [vmem:[#allocation11 + $0x138] sm:$0xff] }
 0x238   :  { %1751 = vmatpush.msra.mxu2 %v1698_v17  ;;  %1786 = vmatpush.msrb.mxu0 %v1735_v60 }
 0x239   :  { %1614 = vmatpush.msra.mxu1 %v3114_v53  ;;  %1764 = vmatpush.msra.mxu3 %v1721_v51  ;;  %v1725_v51 = vld [vmem:[#allocation11 + $0x100] sm:$0xff] }
 0x23a   :  { %1582 = vmatmul.f32.vlgmr.msrb.gmra.mxu3 %v1431_v5  ;;  %1752 = vmatpush.msra.mxu2 %v1697_v49 }
 0x23b   :  { %1615 = vmatpush.msra.mxu1 %v3115_v58  ;;  %1765 = vmatpush.msra.mxu3 %v1720_v56 }
 0x23c   :  { %1753 = vmatpush.msra.mxu2 %v1696_v54  ;;  %1787 = vmatpush.msrb.mxu0 %v1734_v32 }
 0x23d   :  { %1616 = vmatpush.msra.mxu1 %v3116_v35  ;;  %1766 = vmatpush.msra.mxu3 %v1719_v61  ;;  %v1731_v35 = vld [vmem:[#allocation11 + $0x130] sm:$0xff] }
 0x23e   :  { %1754 = vmatpush.msra.mxu2 %v1695_v27  ;;  %1788 = vmatpush.msrb.mxu0 %v1733_v31 }
 0x23f   :  { %1617 = vmatpush.msra.mxu1 %v3117_v28  ;;  %1767 = vmatpush.msra.mxu3 %v1718_v15  ;;  %v1730_v28 = vld [vmem:[#allocation11 + $0x128] sm:$0xff] }
 0x240   :  { %1755 = vmatpush.msra.mxu2 %v1694_v41  ;;  %1789 = vmatpush.msrb.mxu0 %v1732_v37 }
 0x241   :  { %1618 = vmatpush.msra.mxu1 %v3118_v38  ;;  %1768 = vmatpush.msra.mxu3 %v1717_v1  ;;  %v1729_v38 = vld [vmem:[#allocation11 + $0x120] sm:$0xff] }
 0x242   :  { %1790 = vmatpush.msrb.mxu0 %v1731_v35  ;;  %v1857_v35 = vld [vmem:[#allocation16 + $0x78] sm:$0xff] }
 0x243   :  { %1619 = vmatpush.msra.mxu1 %v3119_v25  ;;  %1769 = vmatpush.msra.mxu3 %v1716_v6  ;;  %v1728_v25 = vld [vmem:[#allocation11 + $0x118] sm:$0xff] }
 0x244   :  { %1791 = vmatpush.msrb.mxu0 %v1730_v28  ;;  %v1668_v6 = vld [vmem:[#allocation7] sm:$0x7] }
 0x245   :  { %1620 = vmatpush.msra.mxu1 %v3120_v36  ;;  %1770 = vmatpush.msra.mxu3 %v1715_v12  ;;  %v1727_v36 = vld [vmem:[#allocation11 + $0x110] sm:$0xff]  ;;  %v1679_v12 = vld [vmem:[#allocation8] sm:$0x7]  ;;  %v1670_v17 = vperm.slane %v1668_v6, 0  ;;  %v1671_v19 = vperm.slane %v1668_v6, 1 }
 0x246   :  { %1792 = vmatpush.msrb.mxu0 %v1729_v38  ;;  %v1856_v38 = vld [vmem:[#allocation16 + $0x70] sm:$0xff] }
 0x247   :  { %1621 = vmatpush.msra.mxu1 %v3121_v10  ;;  %1771 = vmatpush.msra.mxu3 %v1714_v18 }
 0x248   :  { %1622 = vmatmul.f32.vlgmr.msra.gmra.mxu1 %v1445_v34  ;;  %v1693_v34 = vld [vmem:[#allocation11] sm:$0xff]  ;;  %1793 = vmatpush.msrb.mxu0 %v1728_v25 }
 0x249   :  { %1772 = vmatpush.msra.mxu3 %v1713_v20  ;;  %1756 = vmatpush.msra.mxu2 %v1693_v34  ;;  %v1681_v20 = vperm.slane %v1679_v12, 0 }
 0x24a   :  { %1794 = vmatpush.msrb.mxu0 %v1727_v36  ;;  %1862 = vmatpush.msrb.mxu1 %v1857_v35  ;;  %v1855_v36 = vld [vmem:[#allocation16 + $0x68] sm:$0xff] }
 0x24b   :  { %1773 = vmatpush.msra.mxu3 %v1712_v55 }
 0x24c   :  { %1795 = vmatpush.msrb.mxu0 %v1726_v11  ;;  %1863 = vmatpush.msrb.mxu1 %v1856_v38  ;;  %v1853_v11 = vld [vmem:[#allocation16 + $0x58] sm:$0xff] }
 0x24d   :  { %1774 = vmatpush.msra.mxu3 %v1711_v29 }
 0x24e   :  { %1796 = vmatpush.msrb.mxu0 %v1725_v51  ;;  %1864 = vmatpush.msrb.mxu1 %v1855_v36  ;;  %v1850_v51 = vld [vmem:[#allocation16 + $0x40] sm:$0xff] }
 0x24f   :  { %1775 = vmatpush.msra.mxu3 %v1710_v50  ;;  %v1672_v50 = vperm.slane %v1668_v6, 2 }
 0x251   :  { %1776 = vmatpush.msra.mxu3 %v1709_v22 }
 0x2a5   :  { %v1463_v42 = vpop.f32.mrf.mxu1  ;;  %v1483_v14 = vpop.f32.mrf.mxu2 }
 0x2a6   :  { %v1523_v26 = vpop.f32.mrf.mxu0  ;;  %v1484_v30 = vadd.f32 %v1483_v14, %v1463_v42 }
 0x2ad   :  { %v1543_v23 = vpop.f32.mrf.mxu1 }
 0x2ae   :  { %v1544_v5 = vadd.f32 %v1543_v23, %v1523_v26  ;;  %v1603_v16 = vpop.f32.mrf.mxu0  ;;  %v1682_v23 = vperm.slane %v1679_v12, 1 }
 0x2b5   :  { %v1503_v33 = vpop.f32.mrf.mxu3  ;;  %v1563_v44 = vpop.f32.mrf.mxu2 }
 0x2b6   :  { %v1504_v47 = vadd.f32 %v1503_v33, %v1484_v30  ;;  %v1564_v7 = vadd.f32 %v1563_v44, %v1544_v5 }
 0x2b8   :  { %v1626_v0 = vmul.f32 0.013888889, %v1504_v47  ;;  %v1627_v39 = vmul.f32 0.013888889, %v1564_v7  ;;  %v1683_v7 = vperm.slane %v1679_v12, 2 }
 0x2ba   :  { %v1629_v53 = vadd.f32 1e-05, %v1626_v0  ;;  %v1630_v58 = vadd.f32 1e-05, %v1627_v39 }
 0x2bc   :  { %1982 = vrsqrt.f32 %v1629_v53  ;;  %vm1638_vm3 = vweird.f32 %v1629_v53  ;;  %vm1648_vm5 = vweird.f32 %v1630_v58 }
 0x2bd   :  { %1984 = vrsqrt.f32 %v1630_v58  ;;  %v1583_v10 = vpop.f32.mrf.mxu3 }
 0x2be   :  { %v1604_v48 = vadd.f32 %v1603_v16, %v1583_v10  ;;  %v1852_v16 = vld [vmem:[#allocation16 + $0x50] sm:$0xff] }
 0x2c2   :  { %v1983_v43 = vpop.eup %1982 }
 0x2c3   :  { %v1985_v40 = vpop.eup %1984  ;;  %v1633_v45 = vmul.f32 %v1983_v43, %v1629_v53  ;;  %vm1639_vm1 = vweird.f32 %v1983_v43 }
 0x2c4   :  { %v1643_v46 = vmul.f32 %v1985_v40, %v1630_v58  ;;  %vm1649_vm2 = vweird.f32 %v1985_v40  ;;  %vm1640_vm4 = vmor %vm1638_vm3, %vm1639_vm1  ;;  %vm1931_vm3 = vcmask 97280  }
 0x2c5   :  { %v1634_v52 = vmul.f32 %v1983_v43, %v1633_v45  ;;  %v1623_v56 = vpop.f32.mrf.mxu1  ;;  %vm1650_vm6 = vmor %vm1648_vm5, %vm1649_vm2  ;;  %vm1929_vm2 = vcmask 48128  }
 0x2c6   :  { %v1644_v59 = vmul.f32 %v1985_v40, %v1643_v46  ;;  %v1624_v61 = vadd.f32 %v1623_v56, %v1604_v48  ;;  %v1851_v46 = vld [vmem:[#allocation16 + $0x48] sm:$0xff]  ;;  %v1849_v56 = vld [vmem:[#allocation16 + $0x38] sm:$0xff] }
 0x2c7   :  { %v1635_v62 = vmul.f32 0.5, %v1634_v52 }
 0x2c8   :  { %v1645_v15 = vmul.f32 0.5, %v1644_v59  ;;  %v1628_v42 = vmul.f32 0.013888889, %v1624_v61  ;;  %v1848_v61 = vld [vmem:[#allocation16 + $0x30] sm:$0xff] }
 0x2c9   :  { %v1636_v63 = vsub.f32 1.5, %v1635_v62 }
 0x2ca   :  { %v1646_v1 = vsub.f32 1.5, %v1645_v15  ;;  %v1631_v3 = vadd.f32 1e-05, %v1628_v42  ;;  %v1847_v15 = vld [vmem:[#allocation16 + $0x28] sm:$0xff] }
 0x2cb   :  { %v1637_v4 = vmul.f32 %v1983_v43, %v1636_v63 }
 0x2cc   :  { %v1647_v8 = vmul.f32 %v1985_v40, %v1646_v1  ;;  %1986 = vrsqrt.f32 %v1631_v3  ;;  %vm1658_vm8 = vweird.f32 %v1631_v3  ;;  %v1846_v1 = vld [vmem:[#allocation16 + $0x20] sm:$0xff] }
 0x2cd   :  { %v1641_v9 = vsel %vm1640_vm4, %v1983_v43, %v1637_v4  ;;  %v1845_v4 = vld [vmem:[#allocation16 + $0x18] sm:$0xff]  ;;  %vm1933_vm4 = vcmask 146432  }
 0x2ce   :  { %v1662_v13 = vperm.slane %v1641_v9, 0  ;;  %v1651_v14 = vsel %vm1650_vm6, %v1985_v40, %v1647_v8  ;;  %v1844_v8 = vld [vmem:[#allocation16 + $0x10] sm:$0xff]  ;;  %v1843_v9 = vld [vmem:[#allocation16 + $0x8] sm:$0xff] }
 0x2cf   :  { %v1663_v18 = vperm.slane %v1651_v14, 0 }
 0x2d0   :  { %v1665_v49 = vmul.f32 %v1662_v13, %v2884_v2  ;;  %v1842_v13 = vld [vmem:[#allocation16] sm:$0xff] }
 0x2d1   :  { %v1666_v21 = vmul.f32 %v1663_v18, %v2878_v57 }
 0x2d2   :  { %v1987_v54 = vpop.eup %1986  ;;  %v1676_v55 = vmul.f32 %v1670_v17, %v1665_v49 }
 0x2d3   :  { %v1653_v60 = vmul.f32 %v1987_v54, %v1631_v3  ;;  %v1677_v26 = vmul.f32 %v1671_v19, %v1666_v21  ;;  %vm1659_vm7 = vweird.f32 %v1987_v54 }
 0x2d4   :  { %v1687_v27 = vadd.f32 %v1681_v20, %v1676_v55  ;;  %vm1660_vm9 = vmor %vm1658_vm8, %vm1659_vm7 }
 0x2d5   :  { %v1654_v29 = vmul.f32 %v1987_v54, %v1653_v60  ;;  %v1688_v30 = vadd.f32 %v1682_v23, %v1677_v26  ;;  %v1979_v60 = vld [vmem:[#allocation13] ss:$0 sm:$0xff] }
 0x2d6   :  { %v1690_v5 = vmax.f32 %v1687_v27, 0.0 }
 0x2d7   :  { %v1655_v32 = vmul.f32 0.5, %v1654_v29  ;;  %v1691_v33 = vmax.f32 %v1688_v30, 0.0  ;;  %v1980_v29 = vld [vmem:[#allocation14] ss:$0 sm:$0xff] }
 0x2d8   :  { %1757 = vmatmul.f32.vlgmr.msra.gmra.mxu2 %v1690_v5 }
 0x2d9   :  { %v1656_v44 = vsub.f32 1.5, %v1655_v32  ;;  %1777 = vmatmul.f32.vlgmr.msra.gmra.mxu3 %v1691_v33  ;;  %v2294_v33 = vmov 6  }
 0x2da   :  { %1977 = vset.pattern.permute.xlu2 %v2294_v33  ;;  %1978 = vset.pattern.permute.xlu0 %v2294_v33 }
 0x2db   :  { %v1657_v41 = vmul.f32 %v1987_v54, %v1656_v44  ;;  %v1981_v44 = vld [vmem:[#allocation17] ss:$0 sm:$0xff] }
 0x2dd   :  { %v1661_v2 = vsel %vm1660_vm9, %v1987_v54, %v1657_v41 }
 0x2de   :  { %v1664_v57 = vperm.slane %v1661_v2, 0 }
 0x2e0   :  { %v1667_v47 = vmul.f32 %v1664_v57, %v2890_v24  ;;  %v1854_v24 = vld [vmem:[#allocation16 + $0x60] sm:$0xff] }
 0x2e1   :  { %1865 = vmatpush.msrb.mxu1 %v1854_v24 }
 0x2e2   :  { %v1678_v31 = vmul.f32 %v1672_v50, %v1667_v47 }
 0x2e3   :  { %1866 = vmatpush.msrb.mxu1 %v1853_v11 }
 0x2e4   :  { %v1689_v34 = vadd.f32 %v1683_v7, %v1678_v31 }
 0x2e5   :  { %1867 = vmatpush.msrb.mxu1 %v1852_v16 }
 0x2e6   :  { %v1692_v22 = vmax.f32 %v1689_v34, 0.0 }
 0x2e7   :  { %1868 = vmatpush.msrb.mxu1 %v1851_v46 }
 0x2e8   :  { %1797 = vmatmul.f32.vlgmr.msrb.gmra.mxu0 %v1692_v22 }
 0x2e9   :  { %1869 = vmatpush.msrb.mxu1 %v1850_v51 }
 0x2eb   :  { %1870 = vmatpush.msrb.mxu1 %v1849_v56 }
 0x2ed   :  { %1871 = vmatpush.msrb.mxu1 %v1848_v61 }
 0x2ef   :  { %1872 = vmatpush.msrb.mxu1 %v1847_v15 }
 0x2f1   :  { %1873 = vmatpush.msrb.mxu1 %v1846_v1 }
 0x2f3   :  { %1874 = vmatpush.msrb.mxu1 %v1845_v4 }
 0x2f5   :  { %1875 = vmatpush.msrb.mxu1 %v1844_v8 }
 0x2f7   :  { %1876 = vmatpush.msrb.mxu1 %v1843_v9 }
 0x2f9   :  { %1877 = vmatpush.msrb.mxu1 %v1842_v13 }
 0x35b   :  { %v1758_v0 = vpop.f32.mrf.mxu2 }
 0x35c   :  { %v1778_v39 = vpop.f32.mrf.mxu3 }
 0x35d   :  { %v1779_v37 = vadd.f32 %v1778_v39, %v1758_v0 }
 0x365   :  { %v1798_v53 = vpop.f32.mrf.mxu0 }
 0x366   :  { %v1799_v58 = vadd.f32 %v1798_v53, %v1779_v37 }
 0x368   :  { %v1801_v28 = vsel %vm1067_vm0, %v1799_v58, 0.0 }
 0x369   :  { %v1802_v25 = vrot.slane %v1801_v28, 4 }
 0x36b   :  { %v1803_v10 = vadd.f32 %v1802_v25, %v1801_v28 }
 0x36d   :  { %v1804_v43 = vrot.slane %v1803_v10, 2 }
 0x36f   :  { %v1805_v40 = vadd.f32 %v1804_v43, %v1803_v10 }
 0x371   :  { %v1806_v45 = vrot.slane %v1805_v40, 1 }
 0x373   :  { %v1807_v48 = vadd.f32 %v1806_v45, %v1805_v40 }
 0x375   :  { %v1808_v52 = vmul.f32 0.5, %v1807_v48 }
 0x377   :  { %v1809_v59 = vsub.f32 %v1799_v58, %v1808_v52 }
 0x379   :  { %v1810_v62 = vmul.f32 %v1809_v59, %v1809_v59 }
 0x37b   :  { %v1811_v42 = vsel %vm1067_vm0, %v1810_v62, 0.0 }
 0x37c   :  { %v1812_v63 = vrot.slane %v1811_v42, 4 }
 0x37e   :  { %v1813_v3 = vadd.f32 %v1812_v63, %v1811_v42 }
 0x380   :  { %v1814_v6 = vrot.slane %v1813_v3, 2 }
 0x382   :  { %v1815_v12 = vadd.f32 %v1814_v6, %v1813_v3 }
 0x384   :  { %v1816_v14 = vrot.slane %v1815_v12, 1 }
 0x386   :  { %v1817_v17 = vadd.f32 %v1816_v14, %v1815_v12 }
 0x388   :  { %v1818_v18 = vmul.f32 0.5, %v1817_v17 }
 0x38a   :  { %v1819_v19 = vadd.f32 1e-05, %v1818_v18 }
 0x38c   :  { %1988 = vrsqrt.f32 %v1819_v19  ;;  %vm1826_vm11 = vweird.f32 %v1819_v19 }
 0x392   :  { %v1989_v49 = vpop.eup %1988 }
 0x393   :  { %v1821_v20 = vmul.f32 %v1989_v49, %v1819_v19  ;;  %vm1827_vm10 = vweird.f32 %v1989_v49 }
 0x394   :  { %vm1828_vm12 = vmor %vm1826_vm11, %vm1827_vm10 }
 0x395   :  { %v1822_v21 = vmul.f32 %v1989_v49, %v1821_v20 }
 0x397   :  { %v1823_v23 = vmul.f32 0.5, %v1822_v21 }
 0x399   :  { %v1824_v54 = vsub.f32 1.5, %v1823_v23 }
 0x39b   :  { %v1825_v55 = vmul.f32 %v1989_v49, %v1824_v54 }
 0x39d   :  { %v1829_v26 = vsel %vm1828_vm12, %v1989_v49, %v1825_v55 }
 0x39e   :  { %v1830_v27 = vmul.f32 %v1829_v26, %v1809_v59 }
 0x3a0   :  { %v1835_v30 = vmul.f32 %v1979_v60, %v1830_v27 }
 0x3a2   :  { %v1840_v5 = vadd.f32 %v1980_v29, %v1835_v30 }
 0x3a4   :  { %v1841_v32 = vmax.f32 %v1840_v5, 0.0 }
 0x3a6   :  { %1878 = vmatmul.f32.vlgmr.msrb.gmra.mxu1 %v1841_v32 }
 0x423   :  { %v1879_v41 = vpop.f32.mrf.mxu1 }
 0x424   :  { %v1880_v2 = vadd.f32 %v1981_v44, %v1879_v41 }
 0x426   :  { %1892 = vperm.xlu2 %1977, %v1880_v2   ;;  %v1897_v57 = vsel %vm1886_vm13, %v1880_v2, -inf }
 0x427   :  { %1898 = vmax.xlane.f32.xlu0 %v1897_v57 }
 0x43b   :  { %1883 = vrot.lane.b32.xlu0 %v1880_v2, %s2295_s8 }
 0x480   :  { %v1893_v37 = vpop.permute.xlu2 %1892 }
 0x481   :  { %v1895_v28 = vadd.f32 %v1893_v37, %v1880_v2 }
 0x49a   :  { %v1899_v50 = vpop.xlane.xlu0 %1898 }
 0x49b   :  { %v1900_v47 = vsub.f32 %v1880_v2, %v1899_v50 }
 0x49d   :  { %v1901_v7 = vmul.f32 1.442695, %v1900_v47 }
 0x49f   :  { %1990 = vpow2.f32 %v1901_v7 }
 0x4a5   :  { %v1991_v31 = vpop.eup %1990 }
 0x4a6   :  { %v1903_v34 = vsel %vm1886_vm13, %v1991_v31, 0.0 }
 0x4a7   :  { %1904 = vadd.xlane.f32.xlu1 %v1903_v34 }
 0x4ad   :  { %v1884_v22 = vpop.permute.xlu0 %1883 }
 0x4ae   :  { %v1887_v0 = vsel %vm1886_vm13, %v1884_v22, 0.0 }
 0x4af   :  { %1888 = vadd.xlane.f32.xlu1 %v1887_v0 }
 0x51a   :  { %v1905_v39 = vpop.xlane.xlu1 %1904 }
 0x51b   :  { %1992 = vrcp.f32 %v1905_v39  ;;  %v1917_v36 = vand.u32 2147483648, %v1905_v39  ;;  %v1915_v43 = vand.u32 2147483647, %v1905_v39  ;;  %vm1911_vm15 = vweird.f32 %v1905_v39 }
 0x51d   :  { %v1918_v40 = vor.u32 1.1754944e-38, %v1917_v36  ;;  %vm1916_vm1 = vcmp.eq.f32.partialorder %v1915_v43, 8.507059e+37 }
 0x521   :  { %v1993_v53 = vpop.eup %1992 }
 0x522   :  { %v1907_v58 = vmul.f32 %v1993_v53, %v1905_v39  ;;  %v1889_v35 = vpop.xlane.xlu1 %1888  ;;  %vm1912_vm14 = vweird.f32 %v1993_v53 }
 0x523   :  { %v1890_v38 = vmul.f32 0.16666667, %v1889_v35  ;;  %vm1913_vm0 = vmor %vm1911_vm15, %vm1912_vm14 }
 0x524   :  { %v1908_v25 = vsub.f32 1.0, %v1907_v58 }
 0x525   :  { %v1896_v10 = vsub.f32 %v1895_v28, %v1890_v38 }
 0x526   :  { %v1909_v24 = vmul.f32 %v1993_v53, %v1908_v25 }
 0x527   :  { %1926 = vrot.lane.b32.xlu1 %v1896_v10, %s2296_s9 }
 0x528   :  { %v1910_v11 = vadd.f32 %v1993_v53, %v1909_v24 }
 0x52a   :  { %v1914_v16 = vsel %vm1913_vm0, %v1993_v53, %v1910_v11 }
 0x52b   :  { %v1919_v45 = vsel %vm1916_vm1, %v1918_v40, %v1914_v16 }
 0x52c   :  { %v1920_v46 = vmul.f32 %v1991_v31, %v1919_v45 }
 0x52e   :  { %1922 = vrot.lane.b32.xlu2 %v1920_v46, %s2297_s11 }
 0x588   :  { %v1923_v48 = vpop.permute.xlu2 %1922 }
 0x589   :  { %v1930_v51 = vsel %vm1929_vm2, %v1880_v2, %v1923_v48 }
 0x599   :  { %v1927_v52 = vpop.permute.xlu1 %1926 }
 0x59a   :  { %v1932_v56 = vsel %vm1931_vm3, %v1930_v51, %v1927_v52 }
 0x59b   :  { %v1934_v59 = vsel %vm1933_vm4, %v1932_v56, 0.0 }
 0x59c   :  { %1935 = vst [vmem:[#allocation19] sm:$0x3] %v1934_v59 }
 0x59d   :  { %1946 = dma.vmem_to_hbm [thread:$0]  %s1942_s18, 32, %s1944_s20, [#allocation4]  }
 0x59e   :  { %2278 = dma.done.wait [#allocation4], 32  }
 0x59f   :  { %2279 = vsyncadd [#allocation4], 4294967264 }
 0x5a0   :  { %1951 = vsyncpa [#allocation3], 1 }
 0x5a1   :  { %1952 = vsyncpa [#allocation6], 1 }
 0x5a2   :  { %1953 = vsyncpa [#allocation9], 1 }
 0x5a3   :  { %1954 = vsyncpa [#allocation12], 1 }
 0x5a4   :  { %1955 = vsyncpa [#allocation15], 1 }
 0x5a5   :  { %1956 = vsyncpa [#allocation18], 1 }
 0x5a6   :  { %1957 = vsyncpa [#allocation4], 1 }

</bundles_post_ra>
